<compile_context>
chip_gen: v7x
topology: tpu7x:2x2x1
jax: 0.10.0
libtpu: 0.0.40
codegen_flags: <defaults>
</compile_context>

<pallas_src>
import functools

import jax
import jax.numpy as jnp
from jax.experimental import pallas as pl
from jax.experimental.pallas import tpu as pltpu

NB_STATES = 3      # Pendulum-v0 observation dim
NB_ACTIONS = 1     # Pendulum-v0 action dim
H1 = 400
H2 = 300

# Lane-multiple padded sizes.
H1P = 512
H2P = 384
W3_ROWS = 8        # fc3 weight padded to 8 sublane rows (row 0 is real)


def _round_up(n, m):
    return (n + m - 1) // m * m


def actor_kernel(x_ref, w1_ref, b1_ref, w2_ref, b2_ref, w3_ref, b3_ref, o_ref,
                 *, n_sub):
    """Transposed dataflow: activations are (features, batch)."""
    blk = o_ref.shape[1]
    sub = blk // n_sub

    # n_sub independent chains in one basic block: lets the LLO scheduler overlap
    # the VPU fc1 of sub-tile t+1 with the MXU fc2 of sub-tile t.
    for t in range(n_sub):
        xs = x_ref[:, t * sub:(t + 1) * sub]          # (3, sub) f32

        # ---- fc1 on the VPU: K=3 would waste >97% of an MXU pass. ----
        # (H1P,1) lane-broadcast  *  (1,sub) sublane-broadcast  ->  (H1P, sub)
        h1 = w1_ref[:, 0:1] * xs[0:1, :]
        for k in range(1, NB_STATES):
            h1 = h1 + w1_ref[:, k:k + 1] * xs[k:k + 1, :]
        h1 = jnp.maximum(h1 + b1_ref[...], 0.0)        # (H1P, sub) f32

        # ---- fc2 on the MXU: bf16 operands, f32 accumulation. ----
        h2 = jnp.dot(w2_ref[...], h1.astype(jnp.bfloat16),
                     preferred_element_type=jnp.float32)   # (H2P, sub) f32
        h2 = jnp.maximum(h2 + b2_ref[...], 0.0)

        # ---- fc3 as a tiny padded f32 matmul; output already lane-dense. ----
        h3 = jnp.dot(w3_ref[...], h2,
                     preferred_element_type=jnp.float32)   # (8, sub) f32
        y = jnp.tanh(h3[0:1, :] + b3_ref[...])             # (1, sub) f32, EUP

        # ---- lane-dense, unmasked store of the action row. ----
        o_ref[:, t * sub:(t + 1) * sub] = y


def _choose_block(B, block_b):
    """Pick the batch block (lane) width."""
    if B <= 256:
        # Single full-extent block: lane dim == full array, so any multiple of 8 works.
        return _round_up(max(B, 1), 8)
    # Large batches: blocks must be lane multiples of 128.  Pick the candidate
    # <= block_b that minimizes trailing-batch padding, keeping >= 2 grid steps
    # so v7x's two TensorCores both get work.
    best_blk = 128
    best_pad = pl.cdiv(B, 128) * 128 - B
    for blk in range(256, max(block_b, 256) + 1, 128):
        n = pl.cdiv(B, blk)
        if n < 2:
            continue
        pad = n * blk - B
        if pad < best_pad or (pad == best_pad and blk > best_blk):
            best_blk, best_pad = blk, pad
    return best_blk


def actor_forward(x, packed_params, *, block_b=512):
    """x: (B, NB_STATES) float32 -> (B, NB_ACTIONS) float32."""
    w1p, b1p, w2p, b2p, w3p, b3p = packed_params
    B = x.shape[0]

    blk = _choose_block(B, block_b)
    n_blocks = pl.cdiv(B, blk)
    B_pad = n_blocks * blk

    x_t = x.T                                        # (3, B) — batch into lanes
    if B_pad != B:
        x_t = jnp.pad(x_t, ((0, 0), (0, B_pad - B)))

    # Two independent sub-tiles per block when the block is wide enough that each
    # half stays lane-aligned (multiple of 128).
    n_sub = 2 if blk % 256 == 0 else 1

    out = pl.pallas_call(
        functools.partial(actor_kernel, n_sub=n_sub),
        out_shape=jax.ShapeDtypeStruct((1, B_pad), jnp.float32),
        grid=(n_blocks,),
        in_specs=[
            pl.BlockSpec((NB_STATES, blk), lambda i: (0, i)),   # x^T, tiled over batch
            pl.BlockSpec((H1P, NB_STATES), lambda i: (0, 0)),   # w1^T (f32)
            pl.BlockSpec((H1P, 1),         lambda i: (0, 0)),   # b1 column (f32)
            pl.BlockSpec((H2P, H1P),       lambda i: (0, 0)),   # w2^T (bf16)
            pl.BlockSpec((H2P, 1),         lambda i: (0, 0)),   # b2 column (f32)
            pl.BlockSpec((W3_ROWS, H2P),   lambda i: (0, 0)),   # w3^T padded rows (f32)
            pl.BlockSpec((1, 1),           lambda i: (0, 0)),   # b3 (f32)
        ],
        out_specs=pl.BlockSpec((1, blk), lambda i: (0, i)),     # lane-dense action row
        compiler_params=pltpu.CompilerParams(
            dimension_semantics=("parallel",)),
    )(x_t, w1p, b1p, w2p, b2p, w3p, b3p)

    return out[0, :B].reshape(B, NB_ACTIONS)


def init_params(key):
    """PyTorch-default-style init: U(-1/sqrt(fan_in), 1/sqrt(fan_in)). (in,out) layout."""
    ks = jax.random.split(key, 6)

    def lin(kw, kb, fan_in, fan_out):
        bound = 1.0 / jnp.sqrt(fan_in)
        w = jax.random.uniform(kw, (fan_in, fan_out), jnp.float32, -bound, bound)
        b = jax.random.uniform(kb, (1, fan_out), jnp.float32, -bound, bound)
        return w, b

    w1, b1 = lin(ks[0], ks[1], NB_STATES, H1)
    w2, b2 = lin(ks[2], ks[3], H1, H2)
    w3, b3 = lin(ks[4], ks[5], H2, NB_ACTIONS)
    return (w1, b1, w2, b2, w3, b3)


def prepare_params(params):
    """One-time packing: transpose to (out,in), zero-pad to lane/sublane multiples.

    Only w2 (the big matrix) is stored bf16; everything else stays f32.
    Zero padding is exact: relu(0)=0 and zero rows/cols contribute nothing.
    """
    w1, b1, w2, b2, w3, b3 = params
    assert w3.shape[1] == NB_ACTIONS == 1, \
        "fc3 lane-dense path assumes nb_actions == 1 (Pendulum-v0)"
    w1p = jnp.zeros((H1P, NB_STATES), jnp.float32).at[:H1, :].set(w1.T)
    b1p = jnp.zeros((H1P, 1), jnp.float32).at[:H1, :].set(b1.reshape(H1, 1))
    w2p = jnp.zeros((H2P, H1P), jnp.float32).at[:H2, :H1].set(w2.T).astype(jnp.bfloat16)
    b2p = jnp.zeros((H2P, 1), jnp.float32).at[:H2, :].set(b2.reshape(H2, 1))
    w3p = jnp.zeros((W3_ROWS, H2P), jnp.float32).at[0:1, :H2].set(w3.T)
    b3p = b3.astype(jnp.float32).reshape(1, 1)
    return (w1p, b1p, w2p, b2p, w3p, b3p)


def actor_reference(x, params):
    w1, b1, w2, b2, w3, b3 = params
    h1 = jnp.maximum(x @ w1 + b1, 0.0)
    h2 = jnp.maximum(h1 @ w2 + b2, 0.0)
    return jnp.tanh(h2 @ w3 + b3)


if __name__ == "__main__":
    key = jax.random.PRNGKey(0)
    k_params, k_x = jax.random.split(key)

    params = init_params(k_params)
    packed = prepare_params(params)
    x = jax.random.normal(k_x, (2, NB_STATES), jnp.float32)  # batch=2 observations

    out = jax.block_until_ready(actor_forward(x, packed))

    ref = actor_reference(x, params)
    assert out.shape == (2, NB_ACTIONS)
    # bf16 fc2 weights/activations => slightly looser tolerance than pure-f32.
    assert jnp.allclose(out, ref, atol=2e-2, rtol=0.0), (out, ref)

    print("KERNEL_OK")
</pallas_src>

<mosaic_0001>
module attributes {stable_mosaic.version = 11 : i64} {
  func.func @actor_kernel(%arg0: i32, %arg1: memref<3x8xf32, #tpu.memory_space<vmem>>, %arg2: memref<512x3xf32, #tpu.memory_space<vmem>>, %arg3: memref<512x1xf32, #tpu.memory_space<vmem>>, %arg4: memref<384x512xbf16, #tpu.memory_space<vmem>>, %arg5: memref<384x1xf32, #tpu.memory_space<vmem>>, %arg6: memref<8x384xf32, #tpu.memory_space<vmem>>, %arg7: memref<1x1xf32, #tpu.memory_space<vmem>>, %arg8: memref<1x8xf32, #tpu.memory_space<vmem>>) attributes {dimension_semantics = [#tpu.dimension_semantics<parallel>], iteration_bounds = array<i64: 1>, scalar_prefetch = 0 : i64, scratch_operands = 0 : i64, tpu.core_type = #tpu.core_type<tc>, window_params = [{transform_indices = @transform_0, window_bounds = array<i64: 3, 8>}, {pipeline_mode = #tpu.pipeline_mode<synchronous>, transform_indices = @transform_1, window_bounds = array<i64: 512, 3>}, {pipeline_mode = #tpu.pipeline_mode<synchronous>, transform_indices = @transform_2, window_bounds = array<i64: 512, 1>}, {pipeline_mode = #tpu.pipeline_mode<synchronous>, transform_indices = @transform_3, window_bounds = array<i64: 384, 512>}, {pipeline_mode = #tpu.pipeline_mode<synchronous>, transform_indices = @transform_4, window_bounds = array<i64: 384, 1>}, {pipeline_mode = #tpu.pipeline_mode<synchronous>, transform_indices = @transform_5, window_bounds = array<i64: 8, 384>}, {pipeline_mode = #tpu.pipeline_mode<synchronous>, transform_indices = @transform_6, window_bounds = array<i64: 1, 1>}, {transform_indices = @transform_7, window_bounds = array<i64: 1, 8>}]} {
    %c0 = arith.constant 0 : index
    %c0_0 = arith.constant 0 : index
    %0 = vector.load %arg1[%c0, %c0_0] : memref<3x8xf32, #tpu.memory_space<vmem>>, vector<3x8xf32>
    %c0_1 = arith.constant 0 : index
    %c0_2 = arith.constant 0 : index
    %1 = vector.load %arg2[%c0_1, %c0_2] : memref<512x3xf32, #tpu.memory_space<vmem>>, vector<512x1xf32>
    %2 = vector.extract_strided_slice %0 {offsets = [0, 0], sizes = [1, 8], strides = [1, 1]} : vector<3x8xf32> to vector<1x8xf32>
    %3 = vector.broadcast %1 : vector<512x1xf32> to vector<512x8xf32>
    %4 = vector.broadcast %2 : vector<1x8xf32> to vector<512x8xf32>
    %5 = arith.mulf %3, %4 : vector<512x8xf32>
    %c0_3 = arith.constant 0 : index
    %c1 = arith.constant 1 : index
    %6 = vector.load %arg2[%c0_3, %c1] : memref<512x3xf32, #tpu.memory_space<vmem>>, vector<512x1xf32>
    %7 = vector.extract_strided_slice %0 {offsets = [1, 0], sizes = [1, 8], strides = [1, 1]} : vector<3x8xf32> to vector<1x8xf32>
    %8 = vector.broadcast %6 : vector<512x1xf32> to vector<512x8xf32>
    %9 = vector.broadcast %7 : vector<1x8xf32> to vector<512x8xf32>
    %10 = arith.mulf %8, %9 : vector<512x8xf32>
    %11 = arith.addf %5, %10 : vector<512x8xf32>
    %c0_4 = arith.constant 0 : index
    %c2 = arith.constant 2 : index
    %12 = vector.load %arg2[%c0_4, %c2] : memref<512x3xf32, #tpu.memory_space<vmem>>, vector<512x1xf32>
    %13 = vector.extract_strided_slice %0 {offsets = [2, 0], sizes = [1, 8], strides = [1, 1]} : vector<3x8xf32> to vector<1x8xf32>
    %14 = vector.broadcast %12 : vector<512x1xf32> to vector<512x8xf32>
    %15 = vector.broadcast %13 : vector<1x8xf32> to vector<512x8xf32>
    %16 = arith.mulf %14, %15 : vector<512x8xf32>
    %17 = arith.addf %11, %16 : vector<512x8xf32>
    %c0_5 = arith.constant 0 : index
    %c0_6 = arith.constant 0 : index
    %18 = vector.load %arg3[%c0_5, %c0_6] : memref<512x1xf32, #tpu.memory_space<vmem>>, vector<512x1xf32>
    %19 = vector.broadcast %18 : vector<512x1xf32> to vector<512x8xf32>
    %20 = arith.addf %17, %19 : vector<512x8xf32>
    %cst = arith.constant 0.000000e+00 : f32
    %21 = vector.broadcast %cst : f32 to vector<512x8xf32>
    %22 = arith.maximumf %20, %21 : vector<512x8xf32>
    %c0_7 = arith.constant 0 : index
    %c0_8 = arith.constant 0 : index
    %23 = vector.load %arg4[%c0_7, %c0_8] : memref<384x512xbf16, #tpu.memory_space<vmem>>, vector<384x512xbf16>
    %24 = arith.truncf %22 : vector<512x8xf32> to vector<512x8xbf16>
    %cst_9 = arith.constant dense<0.000000e+00> : vector<384x8xf32>
    %25 = tpu.matmul %23, %24, %cst_9 {dimension_numbers = #tpu.dot_dimension_numbers<[1], [0], [0], [1], [0, 0, 1, 1], [], []>} : vector<384x512xbf16>, vector<512x8xbf16>, vector<384x8xf32> -> vector<384x8xf32>
    %c0_10 = arith.constant 0 : index
    %c0_11 = arith.constant 0 : index
    %26 = vector.load %arg5[%c0_10, %c0_11] : memref<384x1xf32, #tpu.memory_space<vmem>>, vector<384x1xf32>
    %27 = vector.broadcast %26 : vector<384x1xf32> to vector<384x8xf32>
    %28 = arith.addf %25, %27 : vector<384x8xf32>
    %cst_12 = arith.constant 0.000000e+00 : f32
    %29 = vector.broadcast %cst_12 : f32 to vector<384x8xf32>
    %30 = arith.maximumf %28, %29 : vector<384x8xf32>
    %c0_13 = arith.constant 0 : index
    %c0_14 = arith.constant 0 : index
    %31 = vector.load %arg6[%c0_13, %c0_14] : memref<8x384xf32, #tpu.memory_space<vmem>>, vector<8x384xf32>
    %cst_15 = arith.constant dense<0.000000e+00> : vector<8x8xf32>
    %32 = tpu.matmul %31, %30, %cst_15 {dimension_numbers = #tpu.dot_dimension_numbers<[1], [0], [0], [1], [0, 0, 1, 1], [], []>} : vector<8x384xf32>, vector<384x8xf32>, vector<8x8xf32> -> vector<8x8xf32>
    %33 = vector.extract_strided_slice %32 {offsets = [0, 0], sizes = [1, 8], strides = [1, 1]} : vector<8x8xf32> to vector<1x8xf32>
    %c0_16 = arith.constant 0 : index
    %c0_17 = arith.constant 0 : index
    %34 = vector.load %arg7[%c0_16, %c0_17] : memref<1x1xf32, #tpu.memory_space<vmem>>, vector<1x1xf32>
    %35 = vector.broadcast %34 : vector<1x1xf32> to vector<1x8xf32>
    %36 = arith.addf %33, %35 : vector<1x8xf32>
    %37 = math.tanh %36 : vector<1x8xf32>
    %c0_18 = arith.constant 0 : index
    %c0_19 = arith.constant 0 : index
    %38 = vector.load %arg8[%c0_18, %c0_19] : memref<1x8xf32, #tpu.memory_space<vmem>>, vector<1x8xf32>
    tpu.vector_store %arg8[%c0_18, %c0_19], %37 {strides = array<i32>} : memref<1x8xf32, #tpu.memory_space<vmem>>, vector<1x8xf32>,
    return
  }
  func.func @transform_0(%arg0: i32) -> (i32, i32) {
    %c0_i32 = arith.constant 0 : i32
    %c0_i32_0 = arith.constant 0 : i32
    return %c0_i32, %arg0 : i32, i32
  }
  func.func @transform_1(%arg0: i32) -> (i32, i32) {
    %c0_i32 = arith.constant 0 : i32
    %c0_i32_0 = arith.constant 0 : i32
    %c0_i32_1 = arith.constant 0 : i32
    return %c0_i32, %c0_i32_0 : i32, i32
  }
  func.func @transform_2(%arg0: i32) -> (i32, i32) {
    %c0_i32 = arith.constant 0 : i32
    %c0_i32_0 = arith.constant 0 : i32
    %c0_i32_1 = arith.constant 0 : i32
    return %c0_i32, %c0_i32_0 : i32, i32
  }
  func.func @transform_3(%arg0: i32) -> (i32, i32) {
    %c0_i32 = arith.constant 0 : i32
    %c0_i32_0 = arith.constant 0 : i32
    %c0_i32_1 = arith.constant 0 : i32
    return %c0_i32, %c0_i32_0 : i32, i32
  }
  func.func @transform_4(%arg0: i32) -> (i32, i32) {
    %c0_i32 = arith.constant 0 : i32
    %c0_i32_0 = arith.constant 0 : i32
    %c0_i32_1 = arith.constant 0 : i32
    return %c0_i32, %c0_i32_0 : i32, i32
  }
  func.func @transform_5(%arg0: i32) -> (i32, i32) {
    %c0_i32 = arith.constant 0 : i32
    %c0_i32_0 = arith.constant 0 : i32
    %c0_i32_1 = arith.constant 0 : i32
    return %c0_i32, %c0_i32_0 : i32, i32
  }
  func.func @transform_6(%arg0: i32) -> (i32, i32) {
    %c0_i32 = arith.constant 0 : i32
    %c0_i32_0 = arith.constant 0 : i32
    %c0_i32_1 = arith.constant 0 : i32
    return %c0_i32, %c0_i32_0 : i32, i32
  }
  func.func @transform_7(%arg0: i32) -> (i32, i32) {
    %c0_i32 = arith.constant 0 : i32
    %c0_i32_0 = arith.constant 0 : i32
    return %c0_i32, %arg0 : i32, i32
  }
}

</mosaic_0001>

<bundles_post_ra>
// kernel: tpu_custom_call.1
= control target key start
LH: loop header
LB: loop body
LE: loop exit
PB: predicated region body
PF: predicated region fallthrough
CT: control target
= control target key end

     0   :  { %s6198_s0 = inlined_call_operand.vmem [shape: f32[3,8], index: 0, kind: input, shape index: {}]   ;;  %s6199_s1 = inlined_call_operand.vmem [shape: f32[512,3], index: 1, kind: input, shape index: {}]   ;;  %s6200_s2 = inlined_call_operand.vmem [shape: f32[512,1], index: 2, kind: input, shape index: {}]   ;;  %s6201_s3 = inlined_call_operand.vmem [shape: bf16[384,512], index: 3, kind: input, shape index: {}]   ;;  %s6202_s4 = inlined_call_operand.vmem [shape: f32[384,1], index: 4, kind: input, shape index: {}]   ;;  %s6203_s5 = inlined_call_operand.vmem [shape: f32[8,384], index: 5, kind: input, shape index: {}]   ;;  %s6204_s6 = inlined_call_operand.<no memory space> [shape: f32[1,1], index: 6, kind: input, shape index: {}]   ;;  %s6205_s7 = inlined_call_operand.hbm [shape: f32[1,8], index: 7, kind: output, shape index: {}]  }
   0x1   :  { %v12_v0 = vstv %s6204_s6 }
   0x2   :  { %13 = vst [vmem:[#allocation2] sm:$0x1] %v12_v0 }
   0x3   :  { %v4053_v1 = vld [vmem:[%s6199_s1 + $0x10] sm:$0xff]  ;;  %v4058_v2 = vld [vmem:[%s6199_s1] sm:$0xff]  ;;  %v6206_v3 = vmov 0   ;;  %v4067_v4 = vld [vmem:[%s6199_s1 + $0x18] sm:$0xff] }
   0x4   :  { %3717 = vset.pattern.permute.xlu1 %v6206_v3  ;;  %3716 = vset.pattern.permute.xlu0 %v6206_v3  ;;  %v4072_v5 = vld [vmem:[%s6199_s1 + $0x8] sm:$0xff]  ;;  %v4086_v7 = vld [vmem:[%s6199_s1 + $0x20] sm:$0xff]  ;;  %v4093_v8 = vld [vmem:[%s6199_s1 + $0x38] sm:$0xff] }
   0x5   :  { %107 = vperm.xlu1 %3717, %v4053_v1   ;;  %97 = vperm.xlu0 %3716, %v4058_v2   ;;  %v4081_v6 = vld [vmem:[%s6199_s1 + $0x28] sm:$0xff]  ;;  %v4098_v9 = vld [vmem:[%s6199_s1 + $0x30] sm:$0xff]  ;;  %v4110_v11 = vld [vmem:[%s6199_s1 + $0x40] sm:$0xff] }
   0x6   :  { %2667 = vmatprep.subr.bf16.mxu0 %v6206_v3  ;;  %3575 = vmatprep.subr.bf16.mxu1 %v6206_v3  ;;  %v4105_v10 = vld [vmem:[%s6199_s1 + $0x48] sm:$0xff]  ;;  %v4117_v12 = vld [vmem:[%s6199_s1 + $0x58] sm:$0xff]  ;;  %v4122_v13 = vld [vmem:[%s6199_s1 + $0x50] sm:$0xff] }
   0x7   :  { %v4129_v14 = vld [vmem:[%s6199_s1 + $0x68] sm:$0xff]  ;;  %v4134_v15 = vld [vmem:[%s6199_s1 + $0x60] sm:$0xff]  ;;  %v4139_v16 = vld [vmem:[%s6199_s1 + $0x78] sm:$0xff] }
   0x8   :  { %v4144_v17 = vld [vmem:[%s6199_s1 + $0x70] sm:$0xff]  ;;  %v4151_v18 = vld [vmem:[%s6199_s1 + $0x88] sm:$0xff]  ;;  %v4156_v19 = vld [vmem:[%s6199_s1 + $0x80] sm:$0xff] }
   0x9   :  { %112 = vperm.xlu1 %3717, %v4067_v4   ;;  %102 = vperm.xlu0 %3716, %v4072_v5   ;;  %v4163_v20 = vld [vmem:[%s6199_s1 + $0x98] sm:$0xff]  ;;  %v4168_v21 = vld [vmem:[%s6199_s1 + $0x90] sm:$0xff]  ;;  %v4175_v22 = vld [vmem:[%s6199_s1 + $0xa8] sm:$0xff] }
   0xa   :  { %v4180_v23 = vld [vmem:[%s6199_s1 + $0xa0] sm:$0xff]  ;;  %v4187_v24 = vld [vmem:[%s6199_s1 + $0xb8] sm:$0xff]  ;;  %v4192_v25 = vld [vmem:[%s6199_s1 + $0xb0] sm:$0xff] }
   0xb   :  { %v4199_v26 = vld [vmem:[%s6199_s1 + $0xc8] sm:$0xff]  ;;  %v4204_v27 = vld [vmem:[%s6199_s1 + $0xc0] sm:$0xff]  ;;  %v4211_v28 = vld [vmem:[%s6199_s1 + $0xd8] sm:$0xff] }
   0xc   :  { %v4216_v29 = vld [vmem:[%s6199_s1 + $0xd0] sm:$0xff]  ;;  %v4223_v30 = vld [vmem:[%s6199_s1 + $0xe8] sm:$0xff]  ;;  %v4228_v31 = vld [vmem:[%s6199_s1 + $0xe0] sm:$0xff] }
   0xd   :  { %122 = vperm.xlu1 %3717, %v4081_v6   ;;  %117 = vperm.xlu0 %3716, %v4086_v7  }
  0x11   :  { %132 = vperm.xlu1 %3717, %v4093_v8   ;;  %127 = vperm.xlu0 %3716, %v4098_v9  }
  0x15   :  { %142 = vperm.xlu1 %3717, %v4105_v10   ;;  %137 = vperm.xlu0 %3716, %v4110_v11  }
  0x19   :  { %152 = vperm.xlu1 %3717, %v4117_v12   ;;  %147 = vperm.xlu0 %3716, %v4122_v13  }
  0x1d   :  { %162 = vperm.xlu1 %3717, %v4129_v14   ;;  %157 = vperm.xlu0 %3716, %v4134_v15  }
  0x21   :  { %172 = vperm.xlu1 %3717, %v4139_v16   ;;  %167 = vperm.xlu0 %3716, %v4144_v17  }
  0x25   :  { %182 = vperm.xlu1 %3717, %v4151_v18   ;;  %177 = vperm.xlu0 %3716, %v4156_v19  }
  0x29   :  { %192 = vperm.xlu1 %3717, %v4163_v20   ;;  %187 = vperm.xlu0 %3716, %v4168_v21  }
  0x2d   :  { %202 = vperm.xlu1 %3717, %v4175_v22   ;;  %197 = vperm.xlu0 %3716, %v4180_v23  }
  0x31   :  { %212 = vperm.xlu1 %3717, %v4187_v24   ;;  %207 = vperm.xlu0 %3716, %v4192_v25  }
  0x35   :  { %222 = vperm.xlu1 %3717, %v4199_v26   ;;  %217 = vperm.xlu0 %3716, %v4204_v27  }
  0x39   :  { %232 = vperm.xlu1 %3717, %v4211_v28   ;;  %227 = vperm.xlu0 %3716, %v4216_v29  }
  0x3d   :  { %242 = vperm.xlu1 %3717, %v4223_v30   ;;  %237 = vperm.xlu0 %3716, %v4228_v31  }
  0x3e   :  { %14 = vsyncpa [#allocation4], 0  ;;  %v4237_v32 = vld [vmem:[%s6199_s1 + $0xf8] sm:$0xff]  ;;  %v4242_v33 = vld [vmem:[%s6199_s1 + $0xf0] sm:$0xff]  ;;  %vm4004_vm0 = vmmov 0   ;;  %s4006_s26 = smov [#allocation3]  }
  0x3f   :  { %v4249_v34 = vld [vmem:[%s6199_s1 + $0x108] sm:$0xff]  ;;  %v4254_v35 = vld [vmem:[%s6199_s1 + $0x100] sm:$0xff]  ;;  %v66_v36 = vld [vmem:[%s6199_s1 + $0x118] sm:$0xff]  ;;  %s3328_s27 = sshll.u32 %s4006_s26, 4  ;;  %vm3320_vm1 = vcmask 57344   ;;  %s3329_s27 = int_to_ptr.vmem [resolvable:$true] %s3328_s27 }
  0x40   :  { %6216 = vst [vmem:[#allocation6_spill] sm:$0xff] %v4254_v35  ;;  %v4264_v37 = vld [vmem:[%s6199_s1 + $0x110] sm:$0xff]  ;;  %v68_v38 = vld [vmem:[%s6199_s1 + $0x128] sm:$0xff]  ;;  %v4273_v39 = vld [vmem:[%s6199_s1 + $0x120] sm:$0xff]  ;;  %s3980_s28 = scalar_lea.vmem %s3329_s27, 32  ;;  %p3981_p1 = scmp.lt.s32.totalorder %s3329_s27, %s3329_s27 }
  0x41   :  { %252 = vperm.xlu1 %3717, %v4237_v32   ;;  %247 = vperm.xlu0 %3716, %v4242_v33   ;;  %v70_v40 = vld [vmem:[%s6199_s1 + $0x138] sm:$0xff]  ;;  %v4282_v41 = vld [vmem:[%s6199_s1 + $0x130] sm:$0xff]  ;;  %v72_v42 = vld [vmem:[%s6199_s1 + $0x148] sm:$0xff] }
  0x42   :  { %v4291_v43 = vld [vmem:[%s6199_s1 + $0x140] sm:$0xff]  ;;  %v74_v44 = vld [vmem:[%s6199_s1 + $0x158] sm:$0xff]  ;;  %v4300_v45 = vld [vmem:[%s6199_s1 + $0x150] sm:$0xff] }
  0x43   :  { %v76_v46 = vld [vmem:[%s6199_s1 + $0x168] sm:$0xff]  ;;  %v4309_v47 = vld [vmem:[%s6199_s1 + $0x160] sm:$0xff]  ;;  %v78_v48 = vld [vmem:[%s6199_s1 + $0x178] sm:$0xff] }
  0x44   :  { %v4318_v49 = vld [vmem:[%s6199_s1 + $0x170] sm:$0xff]  ;;  %v80_v50 = vld [vmem:[%s6199_s1 + $0x188] sm:$0xff]  ;;  %v4327_v51 = vld [vmem:[%s6199_s1 + $0x180] sm:$0xff] }
  0x45   :  { %262 = vperm.xlu1 %3717, %v4249_v34   ;;  %257 = vperm.xlu0 %3716, %v4254_v35   ;;  %v82_v52 = vld [vmem:[%s6199_s1 + $0x198] sm:$0xff]  ;;  %v4336_v53 = vld [vmem:[%s6199_s1 + $0x190] sm:$0xff]  ;;  %v84_v54 = vld [vmem:[%s6199_s1 + $0x1a8] sm:$0xff] }
  0x46   :  { %v4345_v55 = vld [vmem:[%s6199_s1 + $0x1a0] sm:$0xff]  ;;  %v86_v56 = vld [vmem:[%s6199_s1 + $0x1b8] sm:$0xff]  ;;  %v4354_v57 = vld [vmem:[%s6199_s1 + $0x1b0] sm:$0xff] }
  0x47   :  { %v88_v58 = vld [vmem:[%s6199_s1 + $0x1c8] sm:$0xff]  ;;  %v4363_v59 = vld [vmem:[%s6199_s1 + $0x1c0] sm:$0xff]  ;;  %v90_v60 = vld [vmem:[%s6199_s1 + $0x1d8] sm:$0xff] }
  0x48   :  { %v4372_v61 = vld [vmem:[%s6199_s1 + $0x1d0] sm:$0xff]  ;;  %v92_v62 = vld [vmem:[%s6199_s1 + $0x1e8] sm:$0xff]  ;;  %v4381_v63 = vld [vmem:[%s6199_s1 + $0x1e0] sm:$0xff] }
  0x49   :  { %272 = vperm.xlu1 %3717, %v66_v36   ;;  %267 = vperm.xlu0 %3716, %v4264_v37   ;;  %v94_v0 = vld [vmem:[%s6199_s1 + $0x1f8] sm:$0xff]  ;;  %v4390_v36 = vld [vmem:[%s6199_s1 + $0x1f0] sm:$0xff] }
  0x4d   :  { %282 = vperm.xlu1 %3717, %v68_v38   ;;  %277 = vperm.xlu0 %3716, %v4273_v39   ;;  %v1260_v38 = vld [vmem:[%s6200_s2 + $0x8] sm:$0xff] }
  0x51   :  { %292 = vperm.xlu1 %3717, %v70_v40   ;;  %287 = vperm.xlu0 %3716, %v4282_v41  }
  0x55   :  { %302 = vperm.xlu1 %3717, %v72_v42   ;;  %297 = vperm.xlu0 %3716, %v4291_v43  }
  0x59   :  { %312 = vperm.xlu1 %3717, %v74_v44   ;;  %307 = vperm.xlu0 %3716, %v4300_v45   ;;  %v6208_v44 = vmov 1  }
  0x5d   :  { %322 = vperm.xlu1 %3717, %v76_v46   ;;  %317 = vperm.xlu0 %3716, %v4309_v47   ;;  %v1261_v46 = vld [vmem:[%s6200_s2 + $0x10] sm:$0xff] }
  0x61   :  { %332 = vperm.xlu1 %3717, %v78_v48   ;;  %327 = vperm.xlu0 %3716, %v4318_v49  }
  0x65   :  { %342 = vperm.xlu1 %3717, %v80_v50   ;;  %337 = vperm.xlu0 %3716, %v4327_v51  }
  0x69   :  { %352 = vperm.xlu1 %3717, %v82_v52   ;;  %347 = vperm.xlu0 %3716, %v4336_v53   ;;  %v1264_v52 = vld [vmem:[%s6200_s2 + $0x28] sm:$0xff] }
  0x6d   :  { %362 = vperm.xlu1 %3717, %v84_v54   ;;  %357 = vperm.xlu0 %3716, %v4345_v55  }
  0x71   :  { %372 = vperm.xlu1 %3717, %v86_v56   ;;  %367 = vperm.xlu0 %3716, %v4354_v57  }
  0x75   :  { %382 = vperm.xlu1 %3717, %v88_v58   ;;  %377 = vperm.xlu0 %3716, %v4363_v59   ;;  %v1265_v58 = vld [vmem:[%s6200_s2 + $0x30] sm:$0xff] }
  0x79   :  { %392 = vperm.xlu1 %3717, %v90_v60   ;;  %387 = vperm.xlu0 %3716, %v4372_v61  }
  0x7d   :  { %402 = vperm.xlu1 %3717, %v92_v62   ;;  %397 = vperm.xlu0 %3716, %v4381_v63  }
  0x81   :  { %412 = vperm.xlu1 %3717, %v94_v0   ;;  %407 = vperm.xlu0 %3716, %v4390_v36   ;;  %v1268_v0 = vld [vmem:[%s6200_s2 + $0x48] sm:$0xff] }
  0x84   :  { %v4396_v40 = vpop.permute.xlu1 %107  ;;  %v4398_v42 = vpop.permute.xlu0 %97 }
  0x85   :  { %3718 = vset.pattern.permute.xlu1 %v6208_v44  ;;  %1330 = vperm.xlu0 %3716, %v1260_v38   ;;  %v1272_v44 = vld [vmem:[%s6200_s2 + $0x68] sm:$0xff] }
  0x86   :  { %488 = vperm.xlu1 %3718, %v4072_v5  }
  0x88   :  { %v4405_v48 = vpop.permute.xlu1 %112  ;;  %v4407_v50 = vpop.permute.xlu0 %102 }
  0x89   :  { %1335 = vperm.xlu0 %3716, %v1261_v46  }
  0x8a   :  { %492 = vperm.xlu1 %3718, %v4053_v1  }
  0x8c   :  { %v4413_v54 = vpop.permute.xlu1 %122  ;;  %v4415_v56 = vpop.permute.xlu0 %117 }
  0x8d   :  { %1350 = vperm.xlu0 %3716, %v1264_v52   ;;  %v1269_v52 = vld [vmem:[%s6200_s2 + $0x50] sm:$0xff] }
  0x8e   :  { %500 = vperm.xlu1 %3718, %v4086_v7  }
  0x90   :  { %v4421_v60 = vpop.permute.xlu1 %132  ;;  %v4423_v62 = vpop.permute.xlu0 %127 }
  0x91   :  { %1355 = vperm.xlu0 %3716, %v1265_v58  }
  0x92   :  { %508 = vperm.xlu1 %3718, %v4098_v9  }
  0x94   :  { %v4429_v38 = vpop.permute.xlu1 %142  ;;  %v4431_v46 = vpop.permute.xlu0 %137 }
  0x95   :  { %6217 = vst [vmem:[#allocation7_spill] sm:$0xff] %v4429_v38  ;;  %6218 = vst [vmem:[#allocation8_spill] sm:$0xff] %v4431_v46  ;;  %1370 = vperm.xlu0 %3716, %v1268_v0  }
  0x96   :  { %516 = vperm.xlu1 %3718, %v4110_v11  }
  0x98   :  { %v4437_v3 = vpop.permute.xlu1 %152  ;;  %v4439_v58 = vpop.permute.xlu0 %147 }
  0x99   :  { %6219 = vst [vmem:[#allocation9_spill] sm:$0xff] %v4437_v3  ;;  %6220 = vst [vmem:[#allocation10_spill] sm:$0xff] %v4439_v58  ;;  %1375 = vperm.xlu0 %3716, %v1269_v52   ;;  %v1273_v3 = vld [vmem:[%s6200_s2 + $0x70] sm:$0xff] }
  0x9a   :  { %524 = vperm.xlu1 %3718, %v4122_v13  }
  0x9c   :  { %v4445_v35 = vpop.permute.xlu1 %162  ;;  %v4447_v0 = vpop.permute.xlu0 %157 }
  0x9d   :  { %6221 = vst [vmem:[#allocation11_spill] sm:$0xff] %v4445_v35  ;;  %6222 = vst [vmem:[#allocation12_spill] sm:$0xff] %v4447_v0  ;;  %1390 = vperm.xlu0 %3716, %v1272_v44   ;;  %v1276_v35 = vld [vmem:[%s6200_s2 + $0x88] sm:$0xff] }
  0x9e   :  { %532 = vperm.xlu1 %3718, %v4134_v15  }
  0xa0   :  { %v4453_v46 = vpop.permute.xlu1 %172  ;;  %v4455_v52 = vpop.permute.xlu0 %167 }
  0xa1   :  { %6223 = vst [vmem:[#allocation13_spill] sm:$0xff] %v4453_v46  ;;  %6224 = vst [vmem:[#allocation14_spill] sm:$0xff] %v4455_v52  ;;  %1395 = vperm.xlu0 %3716, %v1273_v3   ;;  %v1277_v46 = vld [vmem:[%s6200_s2 + $0x90] sm:$0xff] }
  0xa2   :  { %540 = vperm.xlu1 %3718, %v4144_v17  }
  0xa4   :  { %v4461_v58 = vpop.permute.xlu1 %182  ;;  %v4463_v44 = vpop.permute.xlu0 %177 }
  0xa5   :  { %6225 = vst [vmem:[#allocation15_spill] sm:$0xff] %v4461_v58  ;;  %6226 = vst [vmem:[#allocation16_spill] sm:$0xff] %v4463_v44  ;;  %1410 = vperm.xlu0 %3716, %v1276_v35   ;;  %v1280_v58 = vld [vmem:[%s6200_s2 + $0xa8] sm:$0xff] }
  0xa6   :  { %548 = vperm.xlu1 %3718, %v4156_v19  }
  0xa8   :  { %v4469_v0 = vpop.permute.xlu1 %192  ;;  %v4471_v3 = vpop.permute.xlu0 %187 }
  0xa9   :  { %6227 = vst [vmem:[#allocation17_spill] sm:$0xff] %v4469_v0  ;;  %6228 = vst [vmem:[#allocation18_spill] sm:$0xff] %v4471_v3  ;;  %1415 = vperm.xlu0 %3716, %v1277_v46   ;;  %v1281_v0 = vld [vmem:[%s6200_s2 + $0xb0] sm:$0xff] }
  0xaa   :  { %556 = vperm.xlu1 %3718, %v4168_v21  }
  0xac   :  { %v4477_v52 = vpop.permute.xlu1 %202  ;;  %v4479_v35 = vpop.permute.xlu0 %197 }
  0xad   :  { %6229 = vst [vmem:[#allocation19_spill] sm:$0xff] %v4477_v52  ;;  %6230 = vst [vmem:[#allocation20_spill] sm:$0xff] %v4479_v35  ;;  %1430 = vperm.xlu0 %3716, %v1280_v58   ;;  %v1284_v52 = vld [vmem:[%s6200_s2 + $0xc8] sm:$0xff] }
  0xae   :  { %564 = vperm.xlu1 %3718, %v4180_v23  }
  0xb0   :  { %v4485_v44 = vpop.permute.xlu1 %212  ;;  %v4487_v46 = vpop.permute.xlu0 %207 }
  0xb1   :  { %6231 = vst [vmem:[#allocation21_spill] sm:$0xff] %v4485_v44  ;;  %6232 = vst [vmem:[#allocation22_spill] sm:$0xff] %v4487_v46  ;;  %1435 = vperm.xlu0 %3716, %v1281_v0   ;;  %v1289_v44 = vld [vmem:[%s6200_s2 + $0xf0] sm:$0xff] }
  0xb2   :  { %572 = vperm.xlu1 %3718, %v4192_v25  }
  0xb4   :  { %v4493_v3 = vpop.permute.xlu1 %222  ;;  %v4495_v58 = vpop.permute.xlu0 %217 }
  0xb5   :  { %6233 = vst [vmem:[#allocation23_spill] sm:$0xff] %v4493_v3  ;;  %6234 = vst [vmem:[#allocation24_spill] sm:$0xff] %v4495_v58  ;;  %1450 = vperm.xlu0 %3716, %v1284_v52   ;;  %v6239_v3 = vmov 1  }
  0xb6   :  { %580 = vperm.xlu1 %3718, %v4204_v27  }
  0xb8   :  { %v4501_v35 = vpop.permute.xlu1 %232  ;;  %v4503_v0 = vpop.permute.xlu0 %227 }
  0xb9   :  { %6235 = vst [vmem:[#allocation25_spill] sm:$0xff] %v4501_v35  ;;  %6236 = vst [vmem:[#allocation26_spill] sm:$0xff] %v4503_v0  ;;  %1475 = vperm.xlu0 %3716, %v1289_v44   ;;  %v6212_v35 = vmov 2  }
  0xba   :  { %588 = vperm.xlu1 %3718, %v4216_v29  }
  0xbc   :  { %v4506_v46 = vpop.permute.xlu1 %242  ;;  %v4508_v38 = vpop.permute.xlu0 %237 }
  0xbd   :  { %6237 = vst [vmem:[#allocation27_spill] sm:$0xff] %v4506_v46  ;;  %6238 = vst [vmem:[#allocation28_spill] sm:$0xff] %v4508_v38  ;;  %3751 = vset.pattern.permute.xlu0 %v6239_v3 }
  0xbe   :  { %596 = vperm.xlu1 %3718, %v4228_v31   ;;  %484 = vperm.xlu0 %3751, %v4058_v2  }
  0xc0   :  { %v4513_v52 = vpop.permute.xlu1 %252  ;;  %v4515_v58 = vpop.permute.xlu0 %247 }
  0xc1   :  { %6240 = vst [vmem:[#allocation29_spill] sm:$0xff] %v4513_v52  ;;  %6241 = vst [vmem:[#allocation30_spill] sm:$0xff] %v4515_v58  ;;  %v6246_v58 = vmov 0  }
  0xc2   :  { %3719 = vset.pattern.permute.xlu1 %v6212_v35  ;;  %496 = vperm.xlu0 %3751, %v4067_v4   ;;  %v1259_v35 = vld [vmem:[%s6200_s2] sm:$0xff] }
  0xc3   :  { %876 = vperm.xlu1 %3719, %v4072_v5  }
  0xc4   :  { %v4520_v44 = vpop.permute.xlu1 %262  ;;  %v4522_v46 = vpop.permute.xlu0 %257 }
  0xc5   :  { %6242 = vst [vmem:[#allocation31_spill] sm:$0xff] %v4520_v44  ;;  %6243 = vst [vmem:[#allocation32_spill] sm:$0xff] %v4522_v46 }
  0xc6   :  { %504 = vperm.xlu0 %3751, %v4081_v6  }
  0xc7   :  { %880 = vperm.xlu1 %3719, %v4053_v1  }
  0xc8   :  { %v4526_v38 = vpop.permute.xlu1 %272  ;;  %v4528_v52 = vpop.permute.xlu0 %267 }
  0xc9   :  { %6244 = vst [vmem:[#allocation33_spill] sm:$0xff] %v4526_v38  ;;  %6245 = vst [vmem:[#allocation34_spill] sm:$0xff] %v4528_v52  ;;  %v6250_v38 = vmov 2  }
  0xca   :  { %512 = vperm.xlu0 %3751, %v4093_v8  }
  0xcb   :  { %3720 = vset.pattern.permute.xlu1 %v6246_v58 }
  0xcc   :  { %v4535_v5 = vpop.permute.xlu1 %282  ;;  %1325 = vperm.xlu1 %3720, %v1259_v35   ;;  %v4537_v46 = vpop.permute.xlu0 %277  ;;  %v1262_v35 = vld [vmem:[%s6200_s2 + $0x18] sm:$0xff] }
  0xcd   :  { %6247 = vst [vmem:[#allocation35_spill] sm:$0xff] %v4535_v5  ;;  %6248 = vst [vmem:[#allocation36_spill] sm:$0xff] %v4537_v46  ;;  %v1279_v5 = vld [vmem:[%s6200_s2 + $0xa0] sm:$0xff] }
  0xce   :  { %520 = vperm.xlu0 %3751, %v4105_v10  }
  0xd0   :  { %v4540_v1 = vpop.permute.xlu1 %292  ;;  %3721 = vset.pattern.permute.xlu1 %v6250_v38  ;;  %v4543_v52 = vpop.permute.xlu0 %287 }
  0xd1   :  { %6249 = vst [vmem:[#allocation37_spill] sm:$0xff] %v4540_v1  ;;  %6251 = vst [vmem:[#allocation38_spill] sm:$0xff] %v4543_v52  ;;  %888 = vperm.xlu1 %3721, %v4086_v7  }
  0xd2   :  { %528 = vperm.xlu0 %3751, %v4117_v12  }
  0xd4   :  { %v4547_v44 = vpop.permute.xlu1 %302  ;;  %v4549_v0 = vpop.permute.xlu0 %297 }
  0xd5   :  { %6252 = vst [vmem:[#allocation39_spill] sm:$0xff] %v4547_v44  ;;  %6253 = vst [vmem:[#allocation40_spill] sm:$0xff] %v4549_v0  ;;  %892 = vperm.xlu1 %3721, %v4081_v6  }
  0xd6   :  { %536 = vperm.xlu0 %3751, %v4129_v14  }
  0xd8   :  { %v4556_v1 = vpop.permute.xlu1 %312  ;;  %v4558_v46 = vpop.permute.xlu0 %307 }
  0xd9   :  { %6254 = vst [vmem:[#allocation41_spill] sm:$0xff] %v4556_v1  ;;  %6255 = vst [vmem:[#allocation42_spill] sm:$0xff] %v4558_v46  ;;  %3722 = vset.pattern.permute.xlu1 %v6246_v58 }
  0xda   :  { %1340 = vperm.xlu1 %3722, %v1262_v35   ;;  %544 = vperm.xlu0 %3751, %v4139_v16   ;;  %v1263_v35 = vld [vmem:[%s6200_s2 + $0x20] sm:$0xff] }
  0xdc   :  { %v4562_v7 = vpop.permute.xlu1 %322  ;;  %v4564_v0 = vpop.permute.xlu0 %317 }
  0xdd   :  { %6256 = vst [vmem:[#allocation43_spill] sm:$0xff] %v4562_v7  ;;  %6257 = vst [vmem:[#allocation44_spill] sm:$0xff] %v4564_v0 }
  0xde   :  { %3723 = vset.pattern.permute.xlu1 %v6250_v38  ;;  %552 = vperm.xlu0 %3751, %v4151_v18  }
  0xdf   :  { %900 = vperm.xlu1 %3723, %v4093_v8  }
  0xe0   :  { %v4569_v6 = vpop.permute.xlu1 %332  ;;  %v4571_v1 = vpop.permute.xlu0 %327 }
  0xe1   :  { %6258 = vst [vmem:[#allocation45_spill] sm:$0xff] %v4569_v6  ;;  %6259 = vst [vmem:[#allocation46_spill] sm:$0xff] %v4571_v1 }
  0xe2   :  { %560 = vperm.xlu0 %3751, %v4163_v20  }
  0xe3   :  { %3724 = vset.pattern.permute.xlu1 %v6246_v58 }
  0xe4   :  { %v4578_v7 = vpop.permute.xlu1 %342  ;;  %1345 = vperm.xlu1 %3724, %v1263_v35   ;;  %v4580_v0 = vpop.permute.xlu0 %337  ;;  %v1266_v35 = vld [vmem:[%s6200_s2 + $0x38] sm:$0xff] }
  0xe5   :  { %6260 = vst [vmem:[#allocation47_spill] sm:$0xff] %v4578_v7  ;;  %6261 = vst [vmem:[#allocation48_spill] sm:$0xff] %v4580_v0 }
  0xe6   :  { %568 = vperm.xlu0 %3751, %v4175_v22  }
  0xe8   :  { %v4583_v8 = vpop.permute.xlu1 %352  ;;  %3725 = vset.pattern.permute.xlu1 %v6250_v38  ;;  %v4586_v1 = vpop.permute.xlu0 %347 }
  0xe9   :  { %6262 = vst [vmem:[#allocation49_spill] sm:$0xff] %v4583_v8  ;;  %6263 = vst [vmem:[#allocation50_spill] sm:$0xff] %v4586_v1  ;;  %904 = vperm.xlu1 %3725, %v4110_v11  }
  0xea   :  { %576 = vperm.xlu0 %3751, %v4187_v24  }
  0xec   :  { %v4590_v6 = vpop.permute.xlu1 %362  ;;  %v4592_v46 = vpop.permute.xlu0 %357 }
  0xed   :  { %6264 = vst [vmem:[#allocation51_spill] sm:$0xff] %v4590_v6  ;;  %6265 = vst [vmem:[#allocation52_spill] sm:$0xff] %v4592_v46  ;;  %908 = vperm.xlu1 %3725, %v4105_v10  }
  0xee   :  { %584 = vperm.xlu0 %3751, %v4199_v26  }
  0xf0   :  { %v4599_v8 = vpop.permute.xlu1 %372  ;;  %v4601_v0 = vpop.permute.xlu0 %367 }
  0xf1   :  { %6266 = vst [vmem:[#allocation53_spill] sm:$0xff] %v4599_v8  ;;  %6267 = vst [vmem:[#allocation54_spill] sm:$0xff] %v4601_v0  ;;  %3726 = vset.pattern.permute.xlu1 %v6246_v58 }
  0xf2   :  { %1360 = vperm.xlu1 %3726, %v1266_v35   ;;  %592 = vperm.xlu0 %3751, %v4211_v28   ;;  %v1267_v35 = vld [vmem:[%s6200_s2 + $0x40] sm:$0xff] }
  0xf4   :  { %v4605_v11 = vpop.permute.xlu1 %382  ;;  %v4607_v46 = vpop.permute.xlu0 %377 }
  0xf5   :  { %6268 = vst [vmem:[#allocation55_spill] sm:$0xff] %v4605_v11  ;;  %6269 = vst [vmem:[#allocation56_spill] sm:$0xff] %v4607_v46 }
  0xf6   :  { %3727 = vset.pattern.permute.xlu1 %v6250_v38  ;;  %604 = vperm.xlu0 %3751, %v4242_v33  }
  0xf7   :  { %916 = vperm.xlu1 %3727, %v4117_v12  }
  0xf8   :  { %v4612_v10 = vpop.permute.xlu1 %392  ;;  %v4614_v8 = vpop.permute.xlu0 %387 }
  0xf9   :  { %6270 = vst [vmem:[#allocation57_spill] sm:$0xff] %v4612_v10  ;;  %6271 = vst [vmem:[#allocation58_spill] sm:$0xff] %v4614_v8 }
  0xfa   :  { %616 = vperm.xlu0 %3751, %v4249_v34  }
  0xfb   :  { %3728 = vset.pattern.permute.xlu1 %v6246_v58 }
  0xfc   :  { %v4621_v11 = vpop.permute.xlu1 %402  ;;  %1365 = vperm.xlu1 %3728, %v1267_v35   ;;  %v4623_v46 = vpop.permute.xlu0 %397 }
  0xfd   :  { %6272 = vst [vmem:[#allocation59_spill] sm:$0xff] %v4621_v11  ;;  %6273 = vst [vmem:[#allocation60_spill] sm:$0xff] %v4623_v46 }
  0xfe   :  { %620 = vperm.xlu0 %3751, %v4264_v37  }
 0x100   :  { %v4626_v12 = vpop.permute.xlu1 %412  ;;  %3729 = vset.pattern.permute.xlu1 %v6250_v38  ;;  %v4629_v8 = vpop.permute.xlu0 %407 }
 0x101   :  { %6274 = vst [vmem:[#allocation61_spill] sm:$0xff] %v4626_v12  ;;  %6275 = vst [vmem:[#allocation62_spill] sm:$0xff] %v4629_v8  ;;  %920 = vperm.xlu1 %3729, %v4134_v15   ;;  %v1270_v12 = vld [vmem:[%s6200_s2 + $0x58] sm:$0xff] }
 0x102   :  { %3754 = vset.pattern.permute.xlu0 %v6250_v38 }
 0x103   :  { %872 = vperm.xlu0 %3754, %v4058_v2  }
 0x104   :  { %v4634_v10 = vpop.permute.xlu0 %1330 }
 0x105   :  { %924 = vperm.xlu1 %3729, %v4129_v14   ;;  %v4637_v35 = vpop.permute.xlu1 %488 }
 0x107   :  { %884 = vperm.xlu0 %3754, %v4067_v4  }
 0x108   :  { %v4643_v46 = vpop.permute.xlu0 %1335 }
 0x109   :  { %3730 = vset.pattern.permute.xlu1 %v6246_v58  ;;  %v4646_v15 = vpop.permute.xlu1 %492 }
 0x10a   :  { %1380 = vperm.xlu1 %3730, %v1270_v12   ;;  %v1271_v12 = vld [vmem:[%s6200_s2 + $0x60] sm:$0xff] }
 0x10b   :  { %896 = vperm.xlu0 %3754, %v4098_v9  }
 0x10c   :  { %v4649_v2 = vpop.permute.xlu0 %1350 }
 0x10d   :  { %v4651_v14 = vpop.permute.xlu1 %500 }
 0x10e   :  { %3731 = vset.pattern.permute.xlu1 %v6250_v38 }
 0x10f   :  { %932 = vperm.xlu1 %3731, %v4139_v16   ;;  %912 = vperm.xlu0 %3754, %v4122_v13  }
 0x110   :  { %v4656_v4 = vpop.permute.xlu0 %1355 }
 0x111   :  { %v4658_v8 = vpop.permute.xlu1 %508 }
 0x113   :  { %3732 = vset.pattern.permute.xlu1 %v6246_v58  ;;  %928 = vperm.xlu0 %3754, %v4144_v17  }
 0x114   :  { %1385 = vperm.xlu1 %3732, %v1271_v12   ;;  %v4665_v9 = vpop.permute.xlu0 %1370 }
 0x115   :  { %v4667_v11 = vpop.permute.xlu1 %516 }
 0x117   :  { %944 = vperm.xlu0 %3754, %v4168_v21   ;;  %v1274_v21 = vld [vmem:[%s6200_s2 + $0x78] sm:$0xff] }
 0x118   :  { %3733 = vset.pattern.permute.xlu1 %v6250_v38  ;;  %v4671_v13 = vpop.permute.xlu0 %1375 }
 0x119   :  { %936 = vperm.xlu1 %3733, %v4156_v19   ;;  %v4674_v16 = vpop.permute.xlu1 %524 }
 0x11b   :  { %960 = vperm.xlu0 %3754, %v4192_v25  }
 0x11c   :  { %v4677_v0 = vpop.permute.xlu0 %1390 }
 0x11d   :  { %940 = vperm.xlu1 %3733, %v4151_v18   ;;  %v4680_v17 = vpop.permute.xlu1 %532 }
 0x11f   :  { %976 = vperm.xlu0 %3754, %v4216_v29  }
 0x120   :  { %v4686_v12 = vpop.permute.xlu0 %1395 }
 0x121   :  { %3734 = vset.pattern.permute.xlu1 %v6246_v58  ;;  %v4689_v19 = vpop.permute.xlu1 %540 }
 0x122   :  { %1400 = vperm.xlu1 %3734, %v1274_v21   ;;  %v1275_v21 = vld [vmem:[%s6200_s2 + $0x80] sm:$0xff] }
 0x123   :  { %988 = vperm.xlu0 %3754, %v4223_v30  }
 0x124   :  { %v4692_v25 = vpop.permute.xlu0 %1410 }
 0x125   :  { %6276 = vst [vmem:[#allocation63_spill] sm:$0xff] %v4692_v25  ;;  %v4694_v18 = vpop.permute.xlu1 %548 }
 0x126   :  { %3735 = vset.pattern.permute.xlu1 %v6250_v38 }
 0x127   :  { %948 = vperm.xlu1 %3735, %v4163_v20   ;;  %996 = vperm.xlu0 %3754, %v4237_v32  }
 0x128   :  { %v4699_v29 = vpop.permute.xlu0 %1415 }
 0x129   :  { %6277 = vst [vmem:[#allocation64_spill] sm:$0xff] %v4699_v29  ;;  %v4701_v6 = vpop.permute.xlu1 %556 }
 0x12a   :  { %6278 = vst [vmem:[#allocation65_spill] sm:$0xff] %v4701_v6 }
 0x12b   :  { %3736 = vset.pattern.permute.xlu1 %v6246_v58  ;;  %1008 = vperm.xlu0 %3754, %v4264_v37  }
 0x12c   :  { %1405 = vperm.xlu1 %3736, %v1275_v21   ;;  %v4708_v1 = vpop.permute.xlu0 %1430 }
 0x12d   :  { %6279 = vst [vmem:[#allocation66_spill] sm:$0xff] %v4708_v1  ;;  %v4710_v7 = vpop.permute.xlu1 %564 }
 0x12e   :  { %6280 = vst [vmem:[#allocation67_spill] sm:$0xff] %v4710_v7  ;;  %v1298_v7 = vld [vmem:[%s6200_s2 + $0x138] sm:$0xff] }
 0x12f   :  { %1016 = vperm.xlu0 %3754, %v4273_v39   ;;  %v1278_v39 = vld [vmem:[%s6200_s2 + $0x98] sm:$0xff] }
 0x130   :  { %3737 = vset.pattern.permute.xlu1 %v6250_v38  ;;  %v4714_v20 = vpop.permute.xlu0 %1435 }
 0x131   :  { %6281 = vst [vmem:[#allocation68_spill] sm:$0xff] %v4714_v20  ;;  %952 = vperm.xlu1 %3737, %v4180_v23   ;;  %v4717_v44 = vpop.permute.xlu1 %572  ;;  %v415_v20 = vlaneseq }
 0x132   :  { %6282 = vst [vmem:[#allocation69_spill] sm:$0xff] %v4717_v44 }
 0x133   :  { %1024 = vperm.xlu0 %3754, %v4282_v41  }
 0x134   :  { %v4720_v52 = vpop.permute.xlu0 %1450 }
 0x135   :  { %6283 = vst [vmem:[#allocation70_spill] sm:$0xff] %v4720_v52  ;;  %956 = vperm.xlu1 %3737, %v4175_v22   ;;  %v4723_v37 = vpop.permute.xlu1 %580  ;;  %v1294_v52 = vld [vmem:[%s6200_s2 + $0x118] sm:$0xff] }
 0x136   :  { %6284 = vst [vmem:[#allocation71_spill] sm:$0xff] %v4723_v37 }
 0x137   :  { %1032 = vperm.xlu0 %3754, %v4291_v43  }
 0x138   :  { %v4729_v21 = vpop.permute.xlu0 %1475 }
 0x139   :  { %6285 = vst [vmem:[#allocation72_spill] sm:$0xff] %v4729_v21  ;;  %3738 = vset.pattern.permute.xlu1 %v6246_v58  ;;  %v4732_v23 = vpop.permute.xlu1 %588 }
 0x13a   :  { %6286 = vst [vmem:[#allocation73_spill] sm:$0xff] %v4732_v23  ;;  %1420 = vperm.xlu1 %3738, %v1278_v39  }
 0x13b   :  { %1040 = vperm.xlu0 %3754, %v4300_v45  }
 0x13d   :  { %v4735_v41 = vpop.permute.xlu1 %596  ;;  %v4737_v22 = vpop.permute.xlu0 %484 }
 0x13e   :  { %6287 = vst [vmem:[#allocation74_spill] sm:$0xff] %v4735_v41  ;;  %3739 = vset.pattern.permute.xlu1 %v6250_v38 }
 0x13f   :  { %964 = vperm.xlu1 %3739, %v4187_v24   ;;  %1048 = vperm.xlu0 %3754, %v4309_v47  }
 0x141   :  { %v4742_v43 = vpop.permute.xlu0 %496 }
 0x142   :  { %v4747_v21 = vpop.permute.xlu1 %876 }
 0x143   :  { %3740 = vset.pattern.permute.xlu1 %v6246_v58  ;;  %1056 = vperm.xlu0 %3754, %v4318_v49  }
 0x144   :  { %1425 = vperm.xlu1 %3740, %v1279_v5   ;;  %v1282_v5 = vld [vmem:[%s6200_s2 + $0xb8] sm:$0xff] }
 0x145   :  { %v4751_v45 = vpop.permute.xlu0 %504 }
 0x146   :  { %v4753_v39 = vpop.permute.xlu1 %880 }
 0x147   :  { %1064 = vperm.xlu0 %3754, %v4327_v51  }
 0x148   :  { %3741 = vset.pattern.permute.xlu1 %v6250_v38 }
 0x149   :  { %968 = vperm.xlu1 %3741, %v4204_v27   ;;  %v4758_v24 = vpop.permute.xlu0 %512 }
 0x14b   :  { %v4760_v47 = vpop.permute.xlu1 %1325  ;;  %1072 = vperm.xlu0 %3754, %v4336_v53  }
 0x14d   :  { %972 = vperm.xlu1 %3741, %v4199_v26   ;;  %v4764_v49 = vpop.permute.xlu0 %520 }
 0x14f   :  { %1080 = vperm.xlu0 %3754, %v4345_v55  }
 0x150   :  { %v4770_v51 = vpop.permute.xlu1 %888 }
 0x151   :  { %3742 = vset.pattern.permute.xlu1 %v6246_v58  ;;  %v4773_v27 = vpop.permute.xlu0 %528 }
 0x152   :  { %1440 = vperm.xlu1 %3742, %v1282_v5   ;;  %v1283_v5 = vld [vmem:[%s6200_s2 + $0xc0] sm:$0xff] }
 0x153   :  { %1088 = vperm.xlu0 %3754, %v4354_v57  }
 0x154   :  { %v4776_v53 = vpop.permute.xlu1 %892 }
 0x155   :  { %v4778_v26 = vpop.permute.xlu0 %536 }
 0x156   :  { %3743 = vset.pattern.permute.xlu1 %v6250_v38 }
 0x157   :  { %980 = vperm.xlu1 %3743, %v4211_v28   ;;  %1096 = vperm.xlu0 %3754, %v4363_v59  }
 0x159   :  { %v4783_v55 = vpop.permute.xlu1 %1340  ;;  %v4785_v41 = vpop.permute.xlu0 %544 }
 0x15b   :  { %3744 = vset.pattern.permute.xlu1 %v6246_v58  ;;  %1104 = vperm.xlu0 %3754, %v4372_v61  }
 0x15c   :  { %1445 = vperm.xlu1 %3744, %v1283_v5   ;;  %v1292_v5 = vld [vmem:[%s6200_s2 + $0x108] sm:$0xff] }
 0x15d   :  { %v4792_v57 = vpop.permute.xlu0 %552 }
 0x15e   :  { %v4794_v23 = vpop.permute.xlu1 %900 }
 0x15f   :  { %1112 = vperm.xlu0 %3754, %v4381_v63  }
 0x160   :  { %3745 = vset.pattern.permute.xlu1 %v6239_v3 }
 0x161   :  { %600 = vperm.xlu1 %3745, %v4223_v30   ;;  %v4799_v28 = vpop.permute.xlu0 %560  ;;  %v1285_v30 = vld [vmem:[%s6200_s2 + $0xd0] sm:$0xff] }
 0x162   :  { %6288 = vst [vmem:[#allocation75_spill] sm:$0xff] %v4799_v28  ;;  %v1302_v28 = vld [vmem:[%s6200_s2 + $0x158] sm:$0xff] }
 0x163   :  { %v4801_v59 = vpop.permute.xlu1 %1345  ;;  %1120 = vperm.xlu0 %3754, %v4390_v36  }
 0x165   :  { %3746 = vset.pattern.permute.xlu1 %v6250_v38  ;;  %v4805_v61 = vpop.permute.xlu0 %568 }
 0x166   :  { %6289 = vst [vmem:[#allocation76_spill] sm:$0xff] %v4805_v61  ;;  %984 = vperm.xlu1 %3746, %v4228_v31   ;;  %v1286_v31 = vld [vmem:[%s6200_s2 + $0xd8] sm:$0xff] }
 0x167   :  { %3798 = vset.pattern.permute.xlu0 %v6246_v58 }
 0x168   :  { %v4812_v63 = vpop.permute.xlu1 %904  ;;  %1490 = vperm.xlu0 %3798, %v1292_v5   ;;  %v1296_v5 = vld [vmem:[%s6200_s2 + $0x128] sm:$0xff] }
 0x169   :  { %v4817_v36 = vpop.permute.xlu0 %576 }
 0x16a   :  { %6290 = vst [vmem:[#allocation77_spill] sm:$0xff] %v4817_v36  ;;  %3747 = vset.pattern.permute.xlu1 %v6246_v58  ;;  %v4833_v36 = vshrl.u32 %v415_v20, 7 }
 0x16b   :  { %1455 = vperm.xlu1 %3747, %v1285_v30  }
 0x16c   :  { %v4823_v37 = vpop.permute.xlu1 %908  ;;  %1500 = vperm.xlu0 %3798, %v1294_v52   ;;  %6292 = vst [vmem:[#allocation79_spill] sm:$0xff] %v4833_v36  ;;  %v741_v52 = vsub.s32 1, %v4833_v36  ;;  %v1129_v20 = vsub.s32 2, %v4833_v36 }
 0x16d   :  { %v4828_v44 = vpop.permute.xlu0 %584 }
 0x16e   :  { %6291 = vst [vmem:[#allocation78_spill] sm:$0xff] %v4828_v44  ;;  %v30_v44 = vld [vmem:[%s6198_s0] sm:$0x7] }
 0x16f   :  { %1460 = vperm.xlu1 %3747, %v1286_v31   ;;  %v6214_v31 = vsub.s32 0, %v4833_v36  ;;  %v4857_v61 = vrot.slane %v30_v44, %v741_v52 }
 0x170   :  { %1510 = vperm.xlu0 %3798, %v1296_v5  }
 0x171   :  { %v4835_v1 = vpop.permute.xlu1 %1360  ;;  %v4837_v30 = vpop.permute.xlu0 %592 }
 0x172   :  { %6293 = vst [vmem:[#allocation80_spill] sm:$0xff] %v4837_v30  ;;  %v1300_v30 = vld [vmem:[%s6200_s2 + $0x148] sm:$0xff] }
 0x173   :  { %3748 = vset.pattern.permute.xlu1 %v6239_v3 }
 0x174   :  { %608 = vperm.xlu1 %3748, %v4237_v32   ;;  %1520 = vperm.xlu0 %3798, %v1298_v7   ;;  %v4862_v32 = vrot.slane %v30_v44, %v6214_v31  ;;  %v4864_v7 = vrot.slane %v30_v44, %v1129_v20  ;;  %v1287_v44 = vld [vmem:[%s6200_s2 + $0xe0] sm:$0xff]  ;;  %v743_v20 = vmul.f32 %v4857_v61, %v4737_v22 }
 0x175   :  { %v4847_v5 = vpop.permute.xlu0 %604 }
 0x176   :  { %6294 = vst [vmem:[#allocation81_spill] sm:$0xff] %v4847_v5  ;;  %v4855_v29 = vpop.permute.xlu1 %916  ;;  %v420_v52 = vmul.f32 %v4862_v32, %v4407_v50  ;;  %v1132_v31 = vmul.f32 %v4864_v7, %v4747_v21  ;;  %v421_v21 = vmul.f32 %v4862_v32, %v4396_v40  ;;  %v1133_v22 = vmul.f32 %v4864_v7, %v4753_v39 }
 0x177   :  { %v748_v40 = vmul.f32 %v4857_v61, %v4751_v45  ;;  %v1135_v45 = vmul.f32 %v4864_v7, %v4770_v51  ;;  %v6297_v51 = vld [vmem:[#allocation7_spill] sm:$0xff] }
 0x178   :  { %3749 = vset.pattern.permute.xlu1 %v6250_v38  ;;  %1530 = vperm.xlu0 %3798, %v1300_v30   ;;  %v744_v30 = vmul.f32 %v4857_v61, %v4637_v35  ;;  %v1304_v35 = vld [vmem:[%s6200_s2 + $0x168] sm:$0xff] }
 0x179   :  { %992 = vperm.xlu1 %3749, %v4242_v33   ;;  %v4867_v5 = vpop.permute.xlu0 %616  ;;  %v419_v33 = vmul.f32 %v4862_v32, %v4398_v42  ;;  %v1288_v42 = vld [vmem:[%s6200_s2 + $0xe8] sm:$0xff] }
 0x17a   :  { %6295 = vst [vmem:[#allocation82_spill] sm:$0xff] %v4867_v5  ;;  %v808_v36 = vadd.f32 %v744_v30, %v420_v52  ;;  %v423_v52 = vmul.f32 %v4862_v32, %v4415_v56  ;;  %v1290_v56 = vld [vmem:[%s6200_s2 + $0xf8] sm:$0xff] }
 0x17b   :  { %v4876_v6 = vpop.permute.xlu1 %1365  ;;  %v807_v5 = vadd.f32 %v743_v20, %v419_v33  ;;  %v422_v33 = vmul.f32 %v4862_v32, %v4405_v48 }
 0x17c   :  { %1540 = vperm.xlu0 %3798, %v1302_v28   ;;  %v745_v28 = vmul.f32 %v4857_v61, %v4646_v15  ;;  %v1196_v25 = vadd.f32 %v1132_v31, %v808_v36  ;;  %v1306_v15 = vld [vmem:[%s6200_s2 + $0x178] sm:$0xff]  ;;  %v746_v36 = vmul.f32 %v4857_v61, %v4742_v43  ;;  %v426_v43 = vmul.f32 %v4862_v32, %v4421_v60 }
 0x17d   :  { %3750 = vset.pattern.permute.xlu1 %v6246_v58  ;;  %v4888_v50 = vpop.permute.xlu0 %620 }
 0x17e   :  { %6296 = vst [vmem:[#allocation83_spill] sm:$0xff] %v4888_v50  ;;  %1465 = vperm.xlu1 %3750, %v1287_v44   ;;  %v809_v30 = vadd.f32 %v745_v28, %v421_v21  ;;  %v747_v44 = vmul.f32 %v4857_v61, %v4651_v14  ;;  %v424_v14 = vmul.f32 %v4862_v32, %v4413_v54  ;;  %v1308_v54 = vld [vmem:[%s6200_s2 + $0x188] sm:$0xff] }
 0x17f   :  { %v425_v28 = vmul.f32 %v4862_v32, %v4423_v62  ;;  %v1644_v21 = vadd.f32 %v4634_v10, %v1196_v25 }
 0x180   :  { %v4902_v50 = vpop.permute.xlu1 %920  ;;  %1550 = vperm.xlu0 %3798, %v1304_v35   ;;  %v1197_v20 = vadd.f32 %v1133_v22, %v809_v30  ;;  %v1136_v35 = vmul.f32 %v4864_v7, %v4776_v53  ;;  %v428_v22 = vmul.f32 %v4862_v32, %v6297_v51  ;;  %v811_v53 = vadd.f32 %v747_v44, %v423_v52 }
 0x181   :  { %v812_v30 = vadd.f32 %v748_v40, %v424_v14  ;;  %v750_v51 = vmul.f32 %v4857_v61, %v4758_v24  ;;  %v752_v24 = vmul.f32 %v4857_v61, %v4764_v49 }
 0x182   :  { %1470 = vperm.xlu1 %3750, %v1288_v42   ;;  %v873_v39 = vpop.permute.xlu0 %872  ;;  %v1199_v44 = vadd.f32 %v1135_v45, %v811_v53 }
 0x183   :  { %v1131_v31 = vmul.f32 %v4864_v7, %v873_v39  ;;  %v6298_v39 = vld [vmem:[#allocation8_spill] sm:$0xff]  ;;  %v1200_v52 = vadd.f32 %v1136_v35, %v812_v30  ;;  %v1138_v35 = vmul.f32 %v4864_v7, %v4794_v23  ;;  %v814_v53 = vadd.f32 %v750_v51, %v426_v43 }
 0x184   :  { %v4927_v48 = vpop.permute.xlu1 %924  ;;  %1560 = vperm.xlu0 %3798, %v1306_v15   ;;  %v749_v15 = vmul.f32 %v4857_v61, %v4658_v8  ;;  %v427_v62 = vmul.f32 %v4862_v32, %v6298_v39  ;;  %v6299_v8 = vld [vmem:[#allocation10_spill] sm:$0xff]  ;;  %v1139_v23 = vmul.f32 %v4864_v7, %v4812_v63  ;;  %v816_v43 = vadd.f32 %v752_v24, %v428_v22 }
 0x185   :  { %v1195_v42 = vadd.f32 %v1131_v31, %v807_v5  ;;  %v810_v5 = vadd.f32 %v746_v36, %v422_v33  ;;  %v1645_v31 = vadd.f32 %v4643_v46, %v1197_v20  ;;  %v429_v40 = vmul.f32 %v4862_v32, %v6299_v8 }
 0x186   :  { %1480 = vperm.xlu1 %3750, %v1290_v56   ;;  %v885_v60 = vpop.permute.xlu0 %884  ;;  %v1708_v33 = vmax.f32 %v1644_v21, 0.0  ;;  %v813_v36 = vadd.f32 %v749_v15, %v425_v28  ;;  %v751_v46 = vmul.f32 %v4857_v61, %v4667_v11  ;;  %v1647_v20 = vadd.f32 %v4801_v59, %v1199_v44  ;;  %v3803_v15 = vld [vmem:[%s6201_s3 + $0x4] ss:$16 sps:$4 sm:$0xff]  }
 0x187   :  { %v1134_v10 = vmul.f32 %v4864_v7, %v885_v60  ;;  %v1643_v25 = vadd.f32 %v4760_v47, %v1195_v42  ;;  %v1310_v47 = vld [vmem:[%s6200_s2 + $0x198] sm:$0xff]  ;;  %v753_v11 = vmul.f32 %v4857_v61, %v4674_v16  ;;  %v1648_v49 = vadd.f32 %v4649_v2, %v1200_v52  ;;  %v1312_v16 = vld [vmem:[%s6200_s2 + $0x1a8] sm:$0xff]  ;;  %2699 = vmatprep.mubr.bf16.mxu0 %v3803_v15 }
 0x188   :  { %1570 = vperm.xlu0 %3798, %v1308_v54   ;;  %v6300_v54 = vld [vmem:[#allocation6_spill] sm:$0xff]  ;;  %v1709_v59 = vmax.f32 %v1645_v31, 0.0  ;;  %v815_v2 = vadd.f32 %v751_v46, %v427_v62  ;;  %v1202_v63 = vadd.f32 %v1138_v35, %v814_v53  ;;  %v6301_v52 = vld [vmem:[#allocation9_spill] sm:$0xff]  ;;  %v754_v22 = vmul.f32 %v4857_v61, %v4773_v27 }
 0x189   :  { %v1198_v56 = vadd.f32 %v1134_v10, %v810_v5  ;;  %v4950_v14 = vpop.permute.xlu1 %1380  ;;  %v1707_v39 = vmax.f32 %v1643_v25, 0.0  ;;  %v1711_v5 = vmax.f32 %v1647_v20, 0.0  ;;  %v430_v44 = vmul.f32 %v4862_v32, %v6301_v52  ;;  %v6304_v53 = vld [vmem:[#allocation14_spill] sm:$0xff] }
 0x18a   :  { %3752 = vset.pattern.permute.xlu1 %v6239_v3  ;;  %v897_v45 = vpop.permute.xlu0 %896  ;;  %v1712_v62 = vmax.f32 %v1648_v49, 0.0  ;;  %v817_v8 = vadd.f32 %v753_v11, %v429_v40  ;;  %v755_v27 = vmul.f32 %v4857_v61, %v4680_v17  ;;  %v756_v46 = vmul.f32 %v4857_v61, %v4778_v26  ;;  %v1316_v11 = vld [vmem:[%s6200_s2 + $0x1c8] sm:$0xff] }
 0x18b   :  { %v1646_v42 = vadd.f32 %v4783_v55, %v1198_v56  ;;  %v1137_v21 = vmul.f32 %v4864_v7, %v897_v45  ;;  %612 = vperm.xlu1 %3752, %v6300_v54   ;;  %v1867_v28 = vpack.c.bf16 %v1708_v33, %v1707_v39  ;;  %v1140_v55 = vmul.f32 %v4864_v7, %v4823_v37  ;;  %v1314_v33 = vld [vmem:[%s6200_s2 + $0x1b8] sm:$0xff] }
 0x18c   :  { %1580 = vperm.xlu0 %3798, %v1310_v47   ;;  %v1650_v39 = vadd.f32 %v4835_v1, %v1202_v63  ;;  %v6302_v47 = vld [vmem:[#allocation12_spill] sm:$0xff]  ;;  %v1869_v40 = vpack.c.bf16 %v1712_v62, %v1711_v5  ;;  %v1142_v1 = vmul.f32 %v4864_v7, %v4855_v29  ;;  %v1144_v29 = vmul.f32 %v4864_v7, %v4927_v48 }
 0x18d   :  { %v1201_v30 = vadd.f32 %v1137_v21, %v813_v36  ;;  %2668 = vmatpush1.bf16.msra.mxu0 %v1867_v28  ;;  %v1710_v60 = vmax.f32 %v1646_v42, 0.0  ;;  %v1204_v56 = vadd.f32 %v1140_v55, %v816_v43  ;;  %v431_v36 = vmul.f32 %v4862_v32, %v6302_v47  ;;  %v6303_v42 = vld [vmem:[#allocation11_spill] sm:$0xff]  ;;  %v1291_v47 = vld [vmem:[%s6200_s2 + $0x100] sm:$0xff] }
 0x18e   :  { %v4979_v10 = vpop.permute.xlu1 %932  ;;  %v913_v25 = vpop.permute.xlu0 %912  ;;  %2669 = vmatprep.subr.bf16.mxu0 %v6246_v58  ;;  %v432_v21 = vmul.f32 %v4862_v32, %v6303_v42  ;;  %v1714_v26 = vmax.f32 %v1650_v39, 0.0  ;;  %v1143_v28 = vmul.f32 %v4864_v7, %v4902_v50  ;;  %v433_v49 = vmul.f32 %v4862_v32, %v6304_v53  ;;  %v3948_v53 = vld [vmem:[%s6199_s1 + $0x120] sm:$0xff] }
 0x18f   :  { %v1649_v31 = vadd.f32 %v4656_v4, %v1201_v30  ;;  %v1141_v37 = vmul.f32 %v4864_v7, %v913_v25  ;;  %3753 = vset.pattern.permute.xlu1 %v6250_v38  ;;  %v1868_v51 = vpack.c.bf16 %v1710_v60, %v1709_v59  ;;  %v1203_v4 = vadd.f32 %v1139_v23, %v815_v2 }
 0x190   :  { %1000 = vperm.xlu1 %3753, %v6300_v54   ;;  %1590 = vperm.xlu0 %3798, %v1312_v16   ;;  %v818_v54 = vadd.f32 %v754_v22, %v430_v44  ;;  %v1652_v17 = vadd.f32 %v4665_v9, %v1204_v56  ;;  %v757_v9 = vmul.f32 %v4857_v61, %v4689_v19  ;;  %v3947_v19 = vld [vmem:[%s6199_s1 + $0x118] sm:$0xff] }
 0x191   :  { %2670 = vmatpush1.bf16.msra.mxu0 %v1868_v51  ;;  %v1651_v24 = vadd.f32 %v4876_v6, %v1203_v4  ;;  %v1205_v20 = vadd.f32 %v1141_v37, %v817_v8  ;;  %v1713_v35 = vmax.f32 %v1649_v31, 0.0  ;;  %v820_v59 = vadd.f32 %v756_v46, %v432_v21  ;;  %v6305_v37 = vld [vmem:[#allocation13_spill] sm:$0xff] }
 0x192   :  { %2671 = vmatprep.subr.bf16.mxu0 %v6246_v58  ;;  %v929_v6 = vpop.permute.xlu0 %928  ;;  %v1206_v15 = vadd.f32 %v1142_v1, %v818_v54  ;;  %v1716_v43 = vmax.f32 %v1652_v17, 0.0  ;;  %v821_v5 = vadd.f32 %v757_v9, %v433_v49  ;;  %v758_v25 = vmul.f32 %v4857_v61, %v4785_v41  ;;  %v1320_v41 = vld [vmem:[%s6200_s2 + $0x1e8] sm:$0xff]  ;;  %v1915_v46 = vld [vmem:[%s6202_s4 + $0x80] sm:$0xff]  ;;  %v1917_v49 = vld [vmem:[%s6202_s4 + $0x90] sm:$0xff] }
 0x193   :  { %v1386_v45 = vpop.permute.xlu1 %1385  ;;  %v1715_v50 = vmax.f32 %v1651_v24, 0.0  ;;  %v1653_v48 = vadd.f32 %v4671_v13, %v1205_v20  ;;  %v1870_v23 = vpack.c.bf16 %v1714_v26, %v1713_v35  ;;  %v1145_v55 = vmul.f32 %v4864_v7, %v929_v6  ;;  %v1318_v13 = vld [vmem:[%s6200_s2 + $0x1d8] sm:$0xff]  ;;  %v1899_v17 = vld [vmem:[%s6202_s4] sm:$0xff] }
 0x194   :  { %1004 = vperm.xlu1 %3753, %v4249_v34   ;;  %1600 = vperm.xlu0 %3798, %v1314_v33   ;;  %v819_v34 = vadd.f32 %v755_v27, %v431_v36  ;;  %v1208_v60 = vadd.f32 %v1144_v29, %v820_v59  ;;  %v1654_v16 = vadd.f32 %v4950_v14, %v1206_v15 }
 0x195   :  { %2672 = vmatpush1.bf16.msra.mxu0 %v1869_v40  ;;  %v1871_v14 = vpack.c.bf16 %v1716_v43, %v1715_v50  ;;  %v1717_v31 = vmax.f32 %v1653_v48, 0.0  ;;  %v434_v51 = vmul.f32 %v4862_v32, %v6305_v37  ;;  %v1146_v52 = vmul.f32 %v4864_v7, %v4979_v10  ;;  %v6306_v40 = vld [vmem:[#allocation15_spill] sm:$0xff] }
 0x196   :  { %2673 = vmatprep.subr.bf16.mxu0 %v6246_v58  ;;  %v1207_v2 = vadd.f32 %v1143_v28, %v819_v34  ;;  %v1209_v44 = vadd.f32 %v1145_v55, %v821_v5  ;;  %v1656_v62 = vadd.f32 %v4677_v0, %v1208_v60  ;;  %v1718_v8 = vmax.f32 %v1654_v16, 0.0  ;;  %v6308_v34 = vld [vmem:[#allocation63_spill] sm:$0xff]  ;;  %v6309_v55 = vld [vmem:[#allocation18_spill] sm:$0xff]  ;;  %v6310_v60 = vld [vmem:[#allocation65_spill] sm:$0xff] }
 0x197   :  { %v822_v56 = vadd.f32 %v758_v25, %v434_v51  ;;  %v760_v10 = vmul.f32 %v4857_v61, %v4792_v57  ;;  %v436_v1 = vmul.f32 %v4862_v32, %v6306_v40  ;;  %v759_v35 = vmul.f32 %v4857_v61, %v4694_v18  ;;  %v945_v18 = vpop.permute.xlu0 %944  ;;  %v3949_v48 = vld [vmem:[%s6199_s1 + $0x128] sm:$0xff]  ;;  %v1293_v51 = vld [vmem:[%s6200_s2 + $0x110] sm:$0xff] }
 0x198   :  { %3755 = vset.pattern.permute.xlu1 %v6239_v3  ;;  %v937_v30 = vpop.permute.xlu1 %936  ;;  %1610 = vperm.xlu0 %3798, %v1316_v11   ;;  %v1655_v63 = vadd.f32 %v1386_v45, %v1207_v2  ;;  %v1872_v4 = vpack.c.bf16 %v1718_v8, %v1717_v31  ;;  %v1657_v33 = vadd.f32 %v4686_v12, %v1209_v44  ;;  %v1720_v27 = vmax.f32 %v1656_v62, 0.0  ;;  %v6307_v12 = vld [vmem:[#allocation16_spill] sm:$0xff]  ;;  %v6311_v31 = vld [vmem:[#allocation75_spill] sm:$0xff] }
 0x199   :  { %624 = vperm.xlu1 %3755, %v3947_v19   ;;  %2674 = vmatpush1.bf16.msra.mxu0 %v1870_v23  ;;  %v1210_v0 = vadd.f32 %v1146_v52, %v822_v56  ;;  %v435_v20 = vmul.f32 %v4862_v32, %v6307_v12  ;;  %v824_v42 = vadd.f32 %v760_v10, %v436_v1  ;;  %v1901_v23 = vld [vmem:[%s6202_s4 + $0x10] sm:$0xff]  ;;  %v6312_v52 = vld [vmem:[#allocation17_spill] sm:$0xff] }
 0x19a   :  { %2675 = vmatprep.subr.bf16.mxu0 %v6246_v58  ;;  %v1719_v39 = vmax.f32 %v1655_v63, 0.0  ;;  %v1721_v54 = vmax.f32 %v1657_v33, 0.0  ;;  %v1147_v26 = vmul.f32 %v4864_v7, %v937_v30  ;;  %v437_v30 = vmul.f32 %v4862_v32, %v6309_v55  ;;  %v1919_v63 = vld [vmem:[%s6202_s4 + $0xa0] sm:$0xff]  ;;  %v6314_v33 = vld [vmem:[#allocation64_spill] sm:$0xff] }
 0x19b   :  { %v823_v11 = vadd.f32 %v759_v35, %v435_v20  ;;  %v761_v16 = vmul.f32 %v4857_v61, %v6310_v60  ;;  %v5085_v2 = vpop.permute.xlu0 %960  ;;  %v762_v37 = vmul.f32 %v4857_v61, %v6311_v31  ;;  %v438_v44 = vmul.f32 %v4862_v32, %v6312_v52  ;;  %v1903_v56 = vld [vmem:[%s6202_s4 + $0x20] sm:$0xff]  ;;  %v6316_v12 = vld [vmem:[#allocation20_spill] sm:$0xff]  ;;  %v6317_v35 = vld [vmem:[#allocation67_spill] sm:$0xff] }
 0x19c   :  { %v941_v22 = vpop.permute.xlu1 %940  ;;  %1620 = vperm.xlu0 %3798, %v1318_v13   ;;  %v1873_v45 = vpack.c.bf16 %v1720_v27, %v1719_v39  ;;  %v1149_v13 = vmul.f32 %v4864_v7, %v945_v18  ;;  %v1921_v27 = vld [vmem:[%s6202_s4 + $0xb0] sm:$0xff]  ;;  %v439_v20 = vmul.f32 %v4862_v32, %v6316_v12  ;;  %v3951_v18 = vld [vmem:[%s6199_s1 + $0x138] sm:$0xff]  ;;  %v6319_v55 = vld [vmem:[#allocation22_spill] sm:$0xff] }
 0x19d   :  { %3756 = vset.pattern.permute.xlu1 %v6250_v38  ;;  %2676 = vmatpush1.bf16.msra.mxu0 %v1871_v14  ;;  %v1148_v57 = vmul.f32 %v4864_v7, %v941_v22  ;;  %v1211_v59 = vadd.f32 %v1147_v26, %v823_v11  ;;  %v825_v14 = vadd.f32 %v761_v16, %v437_v30  ;;  %v1905_v26 = vld [vmem:[%s6202_s4 + $0x30] sm:$0xff]  ;;  %v6320_v60 = vld [vmem:[#allocation69_spill] sm:$0xff] }
 0x19e   :  { %1012 = vperm.xlu1 %3756, %v3947_v19   ;;  %2677 = vmatprep.subr.bf16.mxu0 %v6246_v58  ;;  %v826_v39 = vadd.f32 %v762_v37, %v438_v44  ;;  %v441_v30 = vmul.f32 %v4862_v32, %v6319_v55  ;;  %v765_v16 = vmul.f32 %v4857_v61, %v6320_v60  ;;  %v1925_v31 = vld [vmem:[%s6202_s4 + $0xd0] sm:$0xff] }
 0x19f   :  { %v1212_v28 = vadd.f32 %v1148_v57, %v824_v42  ;;  %v1213_v22 = vadd.f32 %v1149_v13, %v825_v14  ;;  %v5100_v62 = vpop.permute.xlu0 %976  ;;  %v763_v42 = vmul.f32 %v4857_v61, %v6317_v35  ;;  %v1295_v13 = vld [vmem:[%s6200_s2 + $0x120] sm:$0xff]  ;;  %v3953_v35 = vld [vmem:[%s6199_s1 + $0x148] sm:$0xff] }
 0x1a0   :  { %1630 = vperm.xlu0 %3798, %v1320_v41   ;;  %v829_v37 = vadd.f32 %v765_v16, %v441_v30 }
 0x1a1   :  { %v1401_v36 = vpop.permute.xlu1 %1400  ;;  %2678 = vmatpush1.bf16.msra.mxu0 %v1872_v4  ;;  %v1660_v9 = vadd.f32 %v6308_v34, %v1212_v28  ;;  %v6313_v4 = vld [vmem:[#allocation76_spill] sm:$0xff]  ;;  %v1923_v34 = vld [vmem:[%s6202_s4 + $0xc0] sm:$0xff] }
 0x1a2   :  { %v1658_v24 = vadd.f32 %v1401_v36, %v1210_v0  ;;  %3757 = vset.pattern.permute.xlu1 %v6246_v58  ;;  %2679 = vmatprep.subr.bf16.mxu0 %v6246_v58  ;;  %v764_v10 = vmul.f32 %v4857_v61, %v6313_v4  ;;  %v1661_v0 = vadd.f32 %v6314_v33, %v1213_v22  ;;  %v6323_v33 = vld [vmem:[#allocation78_spill] sm:$0xff] }
 0x1a3   :  { %1485 = vperm.xlu1 %3757, %v1291_v47   ;;  %v1724_v43 = vmax.f32 %v1660_v9, 0.0  ;;  %v5115_v1 = vpop.permute.xlu0 %988  ;;  %v6318_v9 = vld [vmem:[#allocation66_spill] sm:$0xff] }
 0x1a4   :  { %v1722_v21 = vmax.f32 %v1658_v24, 0.0  ;;  %2029 = vperm.xlu0 %3798, %v1915_v46   ;;  %v6315_v46 = vld [vmem:[#allocation19_spill] sm:$0xff] }
 0x1a5   :  { %2680 = vmatpush1.bf16.msra.mxu0 %v1873_v45  ;;  %v440_v40 = vmul.f32 %v4862_v32, %v6315_v46  ;;  %v3950_v45 = vld [vmem:[%s6199_s1 + $0x130] sm:$0xff] }
 0x1a6   :  { %v949_v29 = vpop.permute.xlu1 %948  ;;  %2681 = vmatprep.subr.bf16.mxu0 %v6246_v58  ;;  %v1874_v6 = vpack.c.bf16 %v1722_v21, %v1721_v54 }
 0x1a7   :  { %3758 = vset.pattern.permute.xlu1 %v6239_v3  ;;  %v1150_v8 = vmul.f32 %v4864_v7, %v949_v29  ;;  %v828_v21 = vadd.f32 %v764_v10, %v440_v40  ;;  %v3952_v10 = vld [vmem:[%s6199_s1 + $0x140] sm:$0xff] }
 0x1a8   :  { %628 = vperm.xlu1 %3758, %v3948_v53   ;;  %1949 = vperm.xlu0 %3798, %v1899_v17   ;;  %v1725_v17 = vmax.f32 %v1661_v0, 0.0  ;;  %v827_v53 = vadd.f32 %v763_v42, %v439_v20  ;;  %v768_v0 = vmul.f32 %v4857_v61, %v6323_v33  ;;  %v6326_v42 = vld [vmem:[#allocation24_spill] sm:$0xff] }
 0x1a9   :  { %2682 = vmatpush1.bf16.msra.mxu0 %v1874_v6  ;;  %v1214_v47 = vadd.f32 %v1150_v8, %v826_v39  ;;  %v1909_v39 = vld [vmem:[%s6202_s4 + $0x50] sm:$0xff] }
 0x1aa   :  { %2683 = vmatprep.subr.bf16.mxu0 %v6246_v58 }
 0x1ab   :  { %v1406_v50 = vpop.permute.xlu1 %1405 }
 0x1ac   :  { %v1659_v15 = vadd.f32 %v1406_v50, %v1211_v59  ;;  %632 = vperm.xlu1 %3758, %v3949_v48   ;;  %2039 = vperm.xlu0 %3798, %v1917_v49   ;;  %v5133_v49 = vpop.permute.xlu0 %996 }
 0x1ae   :  { %v1723_v19 = vmax.f32 %v1659_v15, 0.0 }
 0x1b0   :  { %3759 = vset.pattern.permute.xlu1 %v6250_v38  ;;  %v953_v5 = vpop.permute.xlu1 %952  ;;  %v1875_v25 = vpack.c.bf16 %v1724_v43, %v1723_v19  ;;  %1959 = vperm.xlu0 %3798, %v1901_v23   ;;  %v1907_v23 = vld [vmem:[%s6202_s4 + $0x40] sm:$0xff]  ;;  %v5148_v19 = vpop.permute.xlu0 %1008 }
 0x1b1   :  { %1020 = vperm.xlu1 %3759, %v3949_v48   ;;  %v1151_v28 = vmul.f32 %v4864_v7, %v953_v5 }
 0x1b2   :  { %2684 = vmatpush1.bf16.msra.mxu0 %v1875_v25  ;;  %v1153_v25 = vmul.f32 %v4864_v7, %v5085_v2  ;;  %v6322_v2 = vld [vmem:[#allocation21_spill] sm:$0xff] }
 0x1b3   :  { %2685 = vmatprep.subr.bf16.mxu0 %v6246_v58  ;;  %v1215_v50 = vadd.f32 %v1151_v28, %v827_v53  ;;  %v442_v22 = vmul.f32 %v4862_v32, %v6322_v2  ;;  %v6330_v2 = vld [vmem:[#allocation73_spill] sm:$0xff] }
 0x1b4   :  { %v957_v41 = vpop.permute.xlu1 %956  ;;  %2049 = vperm.xlu0 %3798, %v1919_v63   ;;  %v5161_v44 = vpop.permute.xlu0 %1016  ;;  %v1217_v8 = vadd.f32 %v1153_v25, %v829_v37 }
 0x1b5   :  { %3760 = vset.pattern.permute.xlu1 %v6246_v58  ;;  %v1152_v57 = vmul.f32 %v4864_v7, %v957_v41 }
 0x1b6   :  { %1495 = vperm.xlu1 %3760, %v1293_v51   ;;  %v6321_v51 = vld [vmem:[#allocation77_spill] sm:$0xff] }
 0x1b7   :  { %v1216_v29 = vadd.f32 %v1152_v57, %v828_v21  ;;  %v766_v52 = vmul.f32 %v4857_v61, %v6321_v51  ;;  %v1927_v57 = vld [vmem:[%s6202_s4 + $0xe0] sm:$0xff]  ;;  %v443_v21 = vmul.f32 %v4862_v32, %v6326_v42 }
 0x1b8   :  { %1969 = vperm.xlu0 %3798, %v1903_v56   ;;  %v5177_v46 = vpop.permute.xlu0 %1024  ;;  %v6329_v51 = vld [vmem:[#allocation26_spill] sm:$0xff] }
 0x1b9   :  { %v1421_v36 = vpop.permute.xlu1 %1420  ;;  %v1664_v59 = vadd.f32 %v6318_v9, %v1216_v29  ;;  %v830_v4 = vadd.f32 %v766_v52, %v442_v22  ;;  %v445_v52 = vmul.f32 %v4862_v32, %v6329_v51  ;;  %v769_v22 = vmul.f32 %v4857_v61, %v6330_v2 }
 0x1ba   :  { %v1662_v24 = vadd.f32 %v1421_v36, %v1214_v47  ;;  %3761 = vset.pattern.permute.xlu1 %v6239_v3  ;;  %v6324_v47 = vld [vmem:[#allocation68_spill] sm:$0xff] }
 0x1bb   :  { %636 = vperm.xlu1 %3761, %v3950_v45   ;;  %v1728_v5 = vmax.f32 %v1664_v59, 0.0  ;;  %v1665_v36 = vadd.f32 %v6324_v47, %v1217_v8  ;;  %v3955_v8 = vld [vmem:[%s6199_s1 + $0x158] sm:$0xff] }
 0x1bc   :  { %v1726_v54 = vmax.f32 %v1662_v24, 0.0  ;;  %2059 = vperm.xlu0 %3798, %v1921_v27   ;;  %v6325_v24 = vld [vmem:[#allocation23_spill] sm:$0xff]  ;;  %v5197_v9 = vpop.permute.xlu0 %1032 }
 0x1bd   :  { %v444_v12 = vmul.f32 %v4862_v32, %v6325_v24  ;;  %v1729_v29 = vmax.f32 %v1665_v36, 0.0  ;;  %v833_v36 = vadd.f32 %v769_v22, %v445_v52  ;;  %v1160_v52 = vmul.f32 %v4864_v7, %v5115_v1 }
 0x1be   :  { %v965_v6 = vpop.permute.xlu1 %964  ;;  %v1876_v11 = vpack.c.bf16 %v1726_v54, %v1725_v17  ;;  %v6327_v54 = vld [vmem:[#allocation71_spill] sm:$0xff]  ;;  %v1162_v1 = vmul.f32 %v4864_v7, %v5133_v49 }
 0x1bf   :  { %640 = vperm.xlu1 %3761, %v3951_v18   ;;  %v1154_v41 = vmul.f32 %v4864_v7, %v965_v6  ;;  %v767_v17 = vmul.f32 %v4857_v61, %v6327_v54  ;;  %v1911_v6 = vld [vmem:[%s6202_s4 + $0x60] sm:$0xff] }
 0x1c0   :  { %2686 = vmatpush1.bf16.msra.mxu0 %v1876_v11  ;;  %1979 = vperm.xlu0 %3798, %v1905_v26   ;;  %v832_v26 = vadd.f32 %v768_v0, %v444_v12  ;;  %v5208_v16 = vpop.permute.xlu0 %1040  ;;  %v6332_v0 = vld [vmem:[#allocation25_spill] sm:$0xff] }
 0x1c1   :  { %2687 = vmatprep.subr.bf16.mxu0 %v6246_v58  ;;  %v1218_v27 = vadd.f32 %v1154_v41, %v830_v4  ;;  %v831_v59 = vadd.f32 %v767_v17, %v443_v21  ;;  %v446_v47 = vmul.f32 %v4862_v32, %v6332_v0 }
 0x1c3   :  { %3762 = vset.pattern.permute.xlu1 %v6250_v38  ;;  %v1426_v15 = vpop.permute.xlu1 %1425 }
 0x1c4   :  { %v1663_v48 = vadd.f32 %v1426_v15, %v1215_v50  ;;  %1028 = vperm.xlu1 %3762, %v3951_v18   ;;  %2069 = vperm.xlu0 %3798, %v1923_v34   ;;  %v1297_v50 = vld [vmem:[%s6200_s2 + $0x130] sm:$0xff]  ;;  %v5220_v37 = vpop.permute.xlu0 %1048 }
 0x1c5   :  { %v1929_v15 = vld [vmem:[%s6202_s4 + $0xf0] sm:$0xff] }
 0x1c6   :  { %v1727_v43 = vmax.f32 %v1663_v48, 0.0  ;;  %v6328_v48 = vld [vmem:[#allocation70_spill] sm:$0xff] }
 0x1c8   :  { %3763 = vset.pattern.permute.xlu1 %v6246_v58  ;;  %v969_v63 = vpop.permute.xlu1 %968  ;;  %v1877_v14 = vpack.c.bf16 %v1728_v5, %v1727_v43  ;;  %1989 = vperm.xlu0 %3798, %v1907_v23   ;;  %v1913_v43 = vld [vmem:[%s6202_s4 + $0x70] sm:$0xff]  ;;  %v5237_v33 = vpop.permute.xlu0 %1056 }
 0x1c9   :  { %1505 = vperm.xlu1 %3763, %v1295_v13   ;;  %v1155_v11 = vmul.f32 %v4864_v7, %v969_v63 }
 0x1ca   :  { %2688 = vmatpush1.bf16.msra.mxu0 %v1877_v14  ;;  %v3954_v14 = vld [vmem:[%s6199_s1 + $0x150] sm:$0xff] }
 0x1cb   :  { %2689 = vmatprep.subr.bf16.mxu0 %v6246_v58  ;;  %v1219_v55 = vadd.f32 %v1155_v11, %v831_v59  ;;  %v3956_v11 = vld [vmem:[%s6199_s1 + $0x160] sm:$0xff] }
 0x1cc   :  { %v973_v56 = vpop.permute.xlu1 %972  ;;  %2079 = vperm.xlu0 %3798, %v1925_v31   ;;  %v1931_v31 = vld [vmem:[%s6202_s4 + $0x100] sm:$0xff]  ;;  %v5253_v21 = vpop.permute.xlu0 %1064 }
 0x1cd   :  { %3764 = vset.pattern.permute.xlu1 %v6239_v3  ;;  %v1156_v20 = vmul.f32 %v4864_v7, %v973_v56  ;;  %v1933_v56 = vld [vmem:[%s6202_s4 + $0x110] sm:$0xff] }
 0x1ce   :  { %644 = vperm.xlu1 %3764, %v3952_v10   ;;  %v1157_v10 = vmul.f32 %v4864_v7, %v5100_v62  ;;  %v1299_v62 = vld [vmem:[%s6200_s2 + $0x140] sm:$0xff] }
 0x1cf   :  { %v1220_v18 = vadd.f32 %v1156_v20, %v832_v26 }
 0x1d0   :  { %1999 = vperm.xlu0 %3798, %v1909_v39   ;;  %v6331_v39 = vld [vmem:[#allocation80_spill] sm:$0xff]  ;;  %v1221_v12 = vadd.f32 %v1157_v10, %v833_v36 }
 0x1d1   :  { %v1441_v40 = vpop.permute.xlu1 %1440  ;;  %v1668_v23 = vadd.f32 %v6328_v48, %v1220_v18  ;;  %v770_v4 = vmul.f32 %v4857_v61, %v6331_v39  ;;  %v5262_v18 = vpop.permute.xlu0 %1072  ;;  %v6338_v39 = vld [vmem:[#allocation29_spill] sm:$0xff] }
 0x1d2   :  { %v1666_v45 = vadd.f32 %v1441_v40, %v1218_v27  ;;  %648 = vperm.xlu1 %3764, %v3953_v35   ;;  %v1935_v40 = vld [vmem:[%s6202_s4 + $0x120] sm:$0xff] }
 0x1d3   :  { %v1732_v5 = vmax.f32 %v1668_v23, 0.0  ;;  %v834_v24 = vadd.f32 %v770_v4, %v446_v47  ;;  %v3957_v23 = vld [vmem:[%s6199_s1 + $0x168] sm:$0xff]  ;;  %v450_v4 = vmul.f32 %v4862_v32, %v6338_v39  ;;  %v1301_v47 = vld [vmem:[%s6200_s2 + $0x150] sm:$0xff] }
 0x1d4   :  { %v1730_v28 = vmax.f32 %v1666_v45, 0.0  ;;  %2089 = vperm.xlu0 %3798, %v1927_v57   ;;  %v3809_v39 = vld [vmem:[%s6201_s3 + $0x40] ss:$16 sps:$4 sm:$0xff]  }
 0x1d6   :  { %3765 = vset.pattern.permute.xlu1 %v6250_v38  ;;  %v981_v53 = vpop.permute.xlu1 %980  ;;  %v1878_v34 = vpack.c.bf16 %v1730_v28, %v1729_v29  ;;  %v1939_v28 = vld [vmem:[%s6202_s4 + $0x140] sm:$0xff] }
 0x1d7   :  { %1036 = vperm.xlu1 %3765, %v3953_v35   ;;  %v1158_v27 = vmul.f32 %v4864_v7, %v981_v53  ;;  %v1937_v35 = vld [vmem:[%s6202_s4 + $0x130] sm:$0xff] }
 0x1d8   :  { %2690 = vmatpush1.bf16.msra.mxu0 %v1878_v34  ;;  %2009 = vperm.xlu0 %3798, %v1911_v6   ;;  %v1941_v53 = vld [vmem:[%s6202_s4 + $0x150] sm:$0xff] }
 0x1d9   :  { %2691 = vmatprep.subr.bf16.mxu0 %v6246_v58  ;;  %v1222_v45 = vadd.f32 %v1158_v27, %v834_v24  ;;  %v6333_v34 = vld [vmem:[#allocation28_spill] sm:$0xff] }
 0x1da   :  { %v447_v59 = vmul.f32 %v4862_v32, %v6333_v34 }
 0x1db   :  { %3766 = vset.pattern.permute.xlu1 %v6246_v58  ;;  %v1446_v30 = vpop.permute.xlu1 %1445 }
 0x1dc   :  { %v1667_v60 = vadd.f32 %v1446_v30, %v1219_v55  ;;  %1515 = vperm.xlu1 %3766, %v1297_v50   ;;  %2099 = vperm.xlu0 %3798, %v1929_v15   ;;  %v6334_v50 = vld [vmem:[#allocation74_spill] sm:$0xff] }
 0x1dd   :  { %v771_v15 = vmul.f32 %v4857_v61, %v6334_v50  ;;  %v1943_v30 = vld [vmem:[%s6202_s4 + $0x160] sm:$0xff]  ;;  %v3959_v50 = vld [vmem:[%s6199_s1 + $0x178] sm:$0xff] }
 0x1de   :  { %v1731_v13 = vmax.f32 %v1667_v60, 0.0  ;;  %v6335_v60 = vld [vmem:[#allocation27_spill] sm:$0xff] }
 0x1df   :  { %v835_v51 = vadd.f32 %v771_v15, %v447_v59  ;;  %v3801_v15 = vld [vmem:[%s6201_s3] ss:$16 sps:$4 sm:$0xff]  }
 0x1e0   :  { %3767 = vset.pattern.permute.xlu1 %v6239_v3  ;;  %v601_v25 = vpop.permute.xlu1 %600  ;;  %v1879_v63 = vpack.c.bf16 %v1732_v5, %v1731_v13  ;;  %2019 = vperm.xlu0 %3798, %v1913_v43   ;;  %v448_v43 = vmul.f32 %v4862_v32, %v6335_v60  ;;  %v6336_v13 = vld [vmem:[#allocation30_spill] sm:$0xff] }
 0x1e1   :  { %652 = vperm.xlu1 %3767, %v3954_v14   ;;  %v772_v48 = vmul.f32 %v4857_v61, %v601_v25  ;;  %v449_v5 = vmul.f32 %v4862_v32, %v6336_v13  ;;  %v1303_v60 = vld [vmem:[%s6200_s2 + $0x160] sm:$0xff] }
 0x1e2   :  { %2692 = vmatpush1.bf16.msra.mxu0 %v1879_v63  ;;  %v6337_v63 = vld [vmem:[#allocation81_spill] sm:$0xff] }
 0x1e3   :  { %2693 = vmatprep.subr.bf16.mxu0 %v6246_v58  ;;  %v773_v25 = vmul.f32 %v4857_v61, %v6337_v63  ;;  %v836_v2 = vadd.f32 %v772_v48, %v448_v43  ;;  %v3806_v13 = vld [vmem:[%s6201_s3 + $0x20] ss:$16 sps:$4 sm:$0xff]  }
 0x1e4   :  { %2109 = vperm.xlu0 %3798, %v1931_v31   ;;  %v5286_v31 = vpop.permute.xlu0 %1080  ;;  %v6340_v63 = vld [vmem:[#allocation82_spill] sm:$0xff] }
 0x1e5   :  { %656 = vperm.xlu1 %3767, %v3955_v8   ;;  %v985_v41 = vpop.permute.xlu1 %984  ;;  %v837_v10 = vadd.f32 %v773_v25, %v449_v5  ;;  %v3807_v5 = vld [vmem:[%s6201_s3 + $0x44] ss:$16 sps:$4 sm:$0xff]   ;;  %v776_v25 = vmul.f32 %v4857_v61, %v6340_v63  ;;  %v1165_v63 = vmul.f32 %v4864_v7, %v5148_v19 }
 0x1e6   :  { %v1159_v14 = vmul.f32 %v4864_v7, %v985_v41  ;;  %v1945_v41 = vld [vmem:[%s6202_s4 + $0x170] sm:$0xff] }
 0x1e7   :  { %v3819_v19 = vld [vmem:[%s6201_s3 + $0xc4] ss:$16 sps:$4 sm:$0xff]  }
 0x1e8   :  { %2119 = vperm.xlu0 %3798, %v1933_v56   ;;  %v1223_v0 = vadd.f32 %v1159_v14, %v835_v51  ;;  %v5303_v24 = vpop.permute.xlu0 %1088 }
 0x1e9   :  { %3768 = vset.pattern.permute.xlu1 %v6250_v38 }
 0x1ea   :  { %1044 = vperm.xlu1 %3768, %v3955_v8   ;;  %v1456_v57 = vpop.permute.xlu1 %1455 }
 0x1eb   :  { %v1669_v20 = vadd.f32 %v1456_v57, %v1221_v12  ;;  %v1224_v57 = vadd.f32 %v1160_v52, %v836_v2  ;;  %v6341_v52 = vld [vmem:[#allocation31_spill] sm:$0xff] }
 0x1ec   :  { %2129 = vperm.xlu0 %3798, %v1935_v40   ;;  %v452_v2 = vmul.f32 %v4862_v32, %v6341_v52 }
 0x1ed   :  { %v1733_v17 = vmax.f32 %v1669_v20, 0.0 }
 0x1ee   :  { %3769 = vset.pattern.permute.xlu1 %v6246_v58  ;;  %v1461_v42 = vpop.permute.xlu1 %1460 }
 0x1ef   :  { %v1670_v54 = vadd.f32 %v1461_v42, %v1222_v45  ;;  %1525 = vperm.xlu1 %3769, %v1299_v62   ;;  %v3308_v62 = vld [vmem:[#allocation2] sm:$0x1]  ;;  %v6339_v45 = vld [vmem:[#allocation72_spill] sm:$0xff] }
 0x1f0   :  { %2139 = vperm.xlu0 %3798, %v1937_v35  }
 0x1f1   :  { %v1734_v26 = vmax.f32 %v1670_v54, 0.0 }
 0x1f3   :  { %3770 = vset.pattern.permute.xlu1 %v6239_v3  ;;  %v609_v29 = vpop.permute.xlu1 %608  ;;  %v1880_v6 = vpack.c.bf16 %v1734_v26, %v1733_v17 }
 0x1f4   :  { %660 = vperm.xlu1 %3770, %v3956_v11   ;;  %2149 = vperm.xlu0 %3798, %v1939_v28   ;;  %v774_v22 = vmul.f32 %v4857_v61, %v609_v29  ;;  %v5308_v28 = vpop.permute.xlu0 %1096 }
 0x1f5   :  { %2694 = vmatpush1.bf16.msra.mxu0 %v1880_v6  ;;  %v3958_v6 = vld [vmem:[%s6199_s1 + $0x170] sm:$0xff] }
 0x1f6   :  { %2695 = vmatprep.subr.bf16.mxu0 %v6246_v58  ;;  %v838_v36 = vadd.f32 %v774_v22, %v450_v4  ;;  %v3810_v4 = vld [vmem:[%s6201_s3 + $0x64] ss:$16 sps:$4 sm:$0xff]  }
 0x1f8   :  { %664 = vperm.xlu1 %3770, %v3957_v23   ;;  %v993_v55 = vpop.permute.xlu1 %992  ;;  %2159 = vperm.xlu0 %3798, %v1941_v53   ;;  %v1226_v54 = vadd.f32 %v1162_v1, %v838_v36  ;;  %v5320_v48 = vpop.permute.xlu0 %1104 }
 0x1f9   :  { %v1161_v8 = vmul.f32 %v4864_v7, %v993_v55 }
 0x1fb   :  { %v1225_v27 = vadd.f32 %v1161_v8, %v837_v10  ;;  %v3960_v8 = vld [vmem:[%s6199_s1 + $0x180] sm:$0xff]  ;;  %v6342_v10 = vld [vmem:[#allocation32_spill] sm:$0xff] }
 0x1fc   :  { %3771 = vset.pattern.permute.xlu1 %v6250_v38  ;;  %2169 = vperm.xlu0 %3798, %v1943_v30   ;;  %v5327_v30 = vpop.permute.xlu0 %1112 }
 0x1fd   :  { %1052 = vperm.xlu1 %3771, %v3957_v23   ;;  %v1466_v56 = vpop.permute.xlu1 %1465  ;;  %v1673_v35 = vadd.f32 %v6339_v45, %v1225_v27  ;;  %v3804_v23 = vld [vmem:[%s6201_s3 + $0x24] ss:$16 sps:$4 sm:$0xff]  }
 0x1fe   :  { %v1671_v40 = vadd.f32 %v1466_v56, %v1223_v0  ;;  %v840_v56 = vadd.f32 %v776_v25, %v452_v2  ;;  %v451_v0 = vmul.f32 %v4862_v32, %v6342_v10  ;;  %v3963_v2 = vld [vmem:[%s6199_s1 + $0x198] sm:$0xff] }
 0x1ff   :  { %v1737_v53 = vmax.f32 %v1673_v35, 0.0  ;;  %v3812_v35 = vld [vmem:[%s6201_s3 + $0x60] ss:$16 sps:$4 sm:$0xff]  }
 0x200   :  { %2179 = vperm.xlu0 %3798, %v1945_v41   ;;  %v1735_v49 = vmax.f32 %v1671_v40, 0.0  ;;  %v5341_v14 = vpop.permute.xlu0 %1120  ;;  %v3961_v40 = vld [vmem:[%s6199_s1 + $0x188] sm:$0xff] }
 0x201   :  { %3772 = vset.pattern.permute.xlu1 %v6246_v58  ;;  %v1471_v12 = vpop.permute.xlu1 %1470 }
 0x202   :  { %v1672_v20 = vadd.f32 %v1471_v12, %v1224_v57  ;;  %1535 = vperm.xlu1 %3772, %v1301_v47  }
 0x204   :  { %v1736_v42 = vmax.f32 %v1672_v20, 0.0  ;;  %3311 = vperm.xlu0 %3798, %v3308_v62   ;;  %v1491_v27 = vpop.permute.xlu0 %1490 }
 0x205   :  { %v1481_v17 = vpop.permute.xlu1 %1480 }
 0x206   :  { %v1674_v26 = vadd.f32 %v1481_v17, %v1226_v54  ;;  %3773 = vset.pattern.permute.xlu1 %v6239_v3  ;;  %v1881_v29 = vpack.c.bf16 %v1736_v42, %v1735_v49  ;;  %v3813_v49 = vld [vmem:[%s6201_s3 + $0x84] ss:$16 sps:$4 sm:$0xff]  }
 0x207   :  { %668 = vperm.xlu1 %3773, %v3958_v6   ;;  %v1305_v17 = vld [vmem:[%s6200_s2 + $0x170] sm:$0xff] }
 0x208   :  { %v1738_v11 = vmax.f32 %v1674_v26, 0.0  ;;  %2696 = vmatpush1.bf16.msra.mxu0 %v1881_v29  ;;  %v1501_v52 = vpop.permute.xlu0 %1500 }
 0x209   :  { %2697 = vmatprep.subr.bf16.mxu0 %v6246_v58 }
 0x20a   :  { %v613_v34 = vpop.permute.xlu1 %612  ;;  %v1882_v59 = vpack.c.bf16 %v1738_v11, %v1737_v53  ;;  %v3815_v53 = vld [vmem:[%s6201_s3 + $0x80] ss:$16 sps:$4 sm:$0xff]  }
 0x20b   :  { %672 = vperm.xlu1 %3773, %v3959_v50   ;;  %v775_v41 = vmul.f32 %v4857_v61, %v613_v34  ;;  %v6343_v34 = vld [vmem:[#allocation33_spill] sm:$0xff] }
 0x20c   :  { %2698 = vmatpush1.bf16.msra.mxu0 %v1882_v59  ;;  %v454_v59 = vmul.f32 %v4862_v32, %v6343_v34  ;;  %v1511_v34 = vpop.permute.xlu0 %1510 }
 0x20d   :  { %2892 = vmatprep.subr.bf16.mxu0 %v6246_v58  ;;  %v839_v57 = vadd.f32 %v775_v41, %v451_v0 }
 0x20f   :  { %3774 = vset.pattern.permute.xlu1 %v6250_v38  ;;  %v1001_v55 = vpop.permute.xlu1 %1000  ;;  %2700 = vmatmul.mubr.bf16.vlgmr.msra.gmra.mrb[0].mxu0 %v3801_v15  ;;  %v3816_v15 = vld [vmem:[%s6201_s3 + $0xa4] ss:$16 sps:$4 sm:$0xff]  }
 0x210   :  { %1060 = vperm.xlu1 %3774, %v3959_v50   ;;  %2707 = vmatprep.mubr.bf16.mxu0 %v3804_v23  ;;  %v1163_v1 = vmul.f32 %v4864_v7, %v1001_v55  ;;  %v3962_v23 = vld [vmem:[%s6199_s1 + $0x190] sm:$0xff]  ;;  %v6344_v55 = vld [vmem:[#allocation34_spill] sm:$0xff] }
 0x212   :  { %v1227_v62 = vadd.f32 %v1163_v1, %v839_v57  ;;  %v1307_v1 = vld [vmem:[%s6200_s2 + $0x180] sm:$0xff] }
 0x213   :  { %v1005_v43 = vpop.permute.xlu1 %1004 }
 0x214   :  { %3775 = vset.pattern.permute.xlu1 %v6246_v58  ;;  %v1164_v22 = vmul.f32 %v4864_v7, %v1005_v43  ;;  %v6345_v43 = vld [vmem:[#allocation83_spill] sm:$0xff] }
 0x215   :  { %1545 = vperm.xlu1 %3775, %v1303_v60   ;;  %v453_v60 = vmul.f32 %v4862_v32, %v6344_v55 }
 0x216   :  { %v1228_v47 = vadd.f32 %v1164_v22, %v840_v56 }
 0x217   :  { %2708 = vmatmul.mubr.bf16.gmra.mrb[4].mxu0 %v3806_v13  ;;  %v777_v13 = vmul.f32 %v4857_v61, %v6345_v43 }
 0x218   :  { %v625_v51 = vpop.permute.xlu1 %624  ;;  %2715 = vmatprep.mubr.bf16.mxu0 %v3807_v5  ;;  %v1676_v12 = vadd.f32 %v1491_v27, %v1228_v47  ;;  %v3821_v27 = vld [vmem:[%s6201_s3 + $0xc0] ss:$16 sps:$4 sm:$0xff]  }
 0x219   :  { %3776 = vset.pattern.permute.xlu1 %v6239_v3  ;;  %v778_v6 = vmul.f32 %v4857_v61, %v625_v51  ;;  %v841_v22 = vadd.f32 %v777_v13, %v453_v60  ;;  %v1309_v13 = vld [vmem:[%s6200_s2 + $0x190] sm:$0xff] }
 0x21a   :  { %676 = vperm.xlu1 %3776, %v3960_v8   ;;  %v1740_v42 = vmax.f32 %v1676_v12, 0.0  ;;  %v3818_v8 = vld [vmem:[%s6201_s3 + $0xa0] ss:$16 sps:$4 sm:$0xff]  }
 0x21b   :  { %v842_v5 = vadd.f32 %v778_v6, %v454_v59  ;;  %v1229_v41 = vadd.f32 %v1165_v63, %v841_v22  ;;  %v3965_v59 = vld [vmem:[%s6199_s1 + $0x1a8] sm:$0xff]  ;;  %v3828_v63 = vld [vmem:[%s6201_s3 + $0x124] ss:$16 sps:$4 sm:$0xff]   ;;  %v6348_v22 = vld [vmem:[#allocation37_spill] sm:$0xff] }
 0x21d   :  { %v1013_v36 = vpop.permute.xlu1 %1012 }
 0x21e   :  { %680 = vperm.xlu1 %3776, %v3961_v40   ;;  %v1166_v50 = vmul.f32 %v4864_v7, %v1013_v36 }
 0x21f   :  { %2716 = vmatmul.mubr.bf16.gmra.mrb[8].mxu0 %v3809_v39 }
 0x220   :  { %2723 = vmatprep.mubr.bf16.mxu0 %v3810_v4  ;;  %v1230_v25 = vadd.f32 %v1166_v50, %v842_v5  ;;  %v3825_v50 = vld [vmem:[%s6201_s3 + $0x104] ss:$16 sps:$4 sm:$0xff]   ;;  %v3827_v5 = vld [vmem:[%s6201_s3 + $0x100] ss:$16 sps:$4 sm:$0xff]  }
 0x222   :  { %3777 = vset.pattern.permute.xlu1 %v6250_v38  ;;  %v1486_v20 = vpop.permute.xlu1 %1485  ;;  %v1678_v56 = vadd.f32 %v1501_v52, %v1230_v25 }
 0x223   :  { %v1675_v45 = vadd.f32 %v1486_v20, %v1227_v62  ;;  %1068 = vperm.xlu1 %3777, %v3961_v40   ;;  %v3822_v40 = vld [vmem:[%s6201_s3 + $0xe4] ss:$16 sps:$4 sm:$0xff]   ;;  %v6346_v62 = vld [vmem:[#allocation35_spill] sm:$0xff] }
 0x224   :  { %v1742_v10 = vmax.f32 %v1678_v56, 0.0  ;;  %v456_v20 = vmul.f32 %v4862_v32, %v6346_v62 }
 0x225   :  { %v1739_v54 = vmax.f32 %v1675_v45, 0.0 }
 0x227   :  { %v1883_v26 = vpack.c.bf16 %v1740_v42, %v1739_v54  ;;  %3778 = vset.pattern.permute.xlu1 %v6246_v58  ;;  %v629_v29 = vpop.permute.xlu1 %628  ;;  %2724 = vmatmul.mubr.bf16.gmra.mrb[12].mxu0 %v3812_v35  ;;  %v6347_v42 = vld [vmem:[#allocation36_spill] sm:$0xff] }
 0x228   :  { %1555 = vperm.xlu1 %3778, %v1305_v17   ;;  %2731 = vmatprep.mubr.bf16.mxu0 %v3813_v49  ;;  %v779_v45 = vmul.f32 %v4857_v61, %v629_v29  ;;  %v3964_v49 = vld [vmem:[%s6199_s1 + $0x1a0] sm:$0xff]  ;;  %v455_v54 = vmul.f32 %v4862_v32, %v6347_v42 }
 0x229   :  { %2893 = vmatpush1.bf16.msra.mxu0 %v1883_v26  ;;  %3591 = vmatpush1.bf16.msra.mxu1 %v1883_v26  ;;  %v1167_v26 = vmul.f32 %v4864_v7, %v5161_v44 }
 0x22a   :  { %2894 = vmatprep.subr.bf16.mxu0 %v6246_v58  ;;  %3576 = vmatprep.subr.bf16.mxu1 %v6246_v58  ;;  %v843_v6 = vadd.f32 %v779_v45, %v455_v54 }
 0x22b   :  { %v633_v11 = vpop.permute.xlu1 %632 }
 0x22c   :  { %3779 = vset.pattern.permute.xlu1 %v6239_v3  ;;  %v780_v57 = vmul.f32 %v4857_v61, %v633_v11  ;;  %v1231_v44 = vadd.f32 %v1167_v26, %v843_v6 }
 0x22d   :  { %684 = vperm.xlu1 %3779, %v3962_v23  }
 0x22e   :  { %v844_v17 = vadd.f32 %v780_v57, %v456_v20  ;;  %v1521_v57 = vpop.permute.xlu0 %1520 }
 0x22f   :  { %2732 = vmatmul.mubr.bf16.gmra.mrb[16].mxu0 %v3815_v53  ;;  %v3824_v53 = vld [vmem:[%s6201_s3 + $0xe0] ss:$16 sps:$4 sm:$0xff]  }
 0x230   :  { %v1021_v51 = vpop.permute.xlu1 %1020  ;;  %2739 = vmatprep.mubr.bf16.mxu0 %v3816_v15 }
 0x231   :  { %688 = vperm.xlu1 %3779, %v3963_v2   ;;  %v1168_v35 = vmul.f32 %v4864_v7, %v1021_v51 }
 0x233   :  { %v1232_v29 = vadd.f32 %v1168_v35, %v844_v17  ;;  %v1311_v17 = vld [vmem:[%s6200_s2 + $0x1a0] sm:$0xff] }
 0x235   :  { %3780 = vset.pattern.permute.xlu1 %v6250_v38  ;;  %v1496_v39 = vpop.permute.xlu1 %1495  ;;  %v1680_v15 = vadd.f32 %v1511_v34, %v1232_v29  ;;  %v3837_v34 = vld [vmem:[%s6201_s3 + $0x184] ss:$16 sps:$4 sm:$0xff]  }
 0x236   :  { %v1677_v4 = vadd.f32 %v1496_v39, %v1229_v41  ;;  %1076 = vperm.xlu1 %3780, %v3963_v2   ;;  %v3830_v39 = vld [vmem:[%s6201_s3 + $0x120] ss:$16 sps:$4 sm:$0xff]  }
 0x237   :  { %2740 = vmatmul.mubr.bf16.gmra.mrb[20].mxu0 %v3818_v8  ;;  %v1744_v60 = vmax.f32 %v1680_v15, 0.0  ;;  %v458_v8 = vmul.f32 %v4862_v32, %v6348_v22  ;;  %v3840_v22 = vld [vmem:[%s6201_s3 + $0x1a4] ss:$16 sps:$4 sm:$0xff]  }
 0x238   :  { %v1741_v0 = vmax.f32 %v1677_v4, 0.0  ;;  %2747 = vmatprep.mubr.bf16.mxu0 %v3819_v19  ;;  %v3966_v19 = vld [vmem:[%s6199_s1 + $0x1b0] sm:$0xff]  ;;  %v6349_v4 = vld [vmem:[#allocation38_spill] sm:$0xff] }
 0x23a   :  { %v1884_v47 = vpack.c.bf16 %v1742_v10, %v1741_v0  ;;  %3781 = vset.pattern.permute.xlu1 %v6246_v58  ;;  %v637_v36 = vpop.permute.xlu1 %636  ;;  %v457_v10 = vmul.f32 %v4862_v32, %v6349_v4  ;;  %v1313_v4 = vld [vmem:[%s6200_s2 + $0x1b0] sm:$0xff] }
 0x23b   :  { %1565 = vperm.xlu1 %3781, %v1307_v1   ;;  %v781_v56 = vmul.f32 %v4857_v61, %v637_v36  ;;  %v3831_v1 = vld [vmem:[%s6201_s3 + $0x144] ss:$16 sps:$4 sm:$0xff]  }
 0x23c   :  { %2895 = vmatpush1.bf16.msra.mxu0 %v1884_v47  ;;  %3592 = vmatpush1.bf16.msra.mxu1 %v1884_v47  ;;  %v1169_v47 = vmul.f32 %v4864_v7, %v5177_v46  ;;  %v3833_v46 = vld [vmem:[%s6201_s3 + $0x140] ss:$16 sps:$4 sm:$0xff]  }
 0x23d   :  { %2896 = vmatprep.subr.bf16.mxu0 %v6246_v58  ;;  %3577 = vmatprep.subr.bf16.mxu1 %v6246_v58  ;;  %v845_v36 = vadd.f32 %v781_v56, %v457_v10 }
 0x23e   :  { %v641_v12 = vpop.permute.xlu1 %640 }
 0x23f   :  { %3782 = vset.pattern.permute.xlu1 %v6239_v3  ;;  %2748 = vmatmul.mubr.bf16.gmra.mrb[24].mxu0 %v3821_v27  ;;  %v782_v52 = vmul.f32 %v4857_v61, %v641_v12  ;;  %v3967_v12 = vld [vmem:[%s6199_s1 + $0x1b8] sm:$0xff]  ;;  %v1233_v20 = vadd.f32 %v1169_v47, %v845_v36  ;;  %v3843_v47 = vld [vmem:[%s6201_s3 + $0x1c4] ss:$16 sps:$4 sm:$0xff]  }
 0x240   :  { %692 = vperm.xlu1 %3782, %v3964_v49   ;;  %2755 = vmatprep.mubr.bf16.mxu0 %v3822_v40  ;;  %v3834_v49 = vld [vmem:[%s6201_s3 + $0x164] ss:$16 sps:$4 sm:$0xff]  }
 0x241   :  { %v846_v0 = vadd.f32 %v782_v52, %v458_v8  ;;  %v3969_v52 = vld [vmem:[%s6199_s1 + $0x1c8] sm:$0xff] }
 0x243   :  { %v1029_v11 = vpop.permute.xlu1 %1028 }
 0x244   :  { %696 = vperm.xlu1 %3782, %v3965_v59   ;;  %v1170_v41 = vmul.f32 %v4864_v7, %v1029_v11  ;;  %v3836_v11 = vld [vmem:[%s6201_s3 + $0x160] ss:$16 sps:$4 sm:$0xff]  }
 0x246   :  { %v1234_v27 = vadd.f32 %v1170_v41, %v846_v0 }
 0x247   :  { %2756 = vmatmul.mubr.bf16.gmra.mrb[28].mxu0 %v3824_v53 }
 0x248   :  { %3783 = vset.pattern.permute.xlu1 %v6250_v38  ;;  %v1506_v23 = vpop.permute.xlu1 %1505  ;;  %2763 = vmatprep.mubr.bf16.mxu0 %v3825_v50  ;;  %v1682_v62 = vadd.f32 %v1521_v57, %v1234_v27 }
 0x249   :  { %v1679_v55 = vadd.f32 %v1506_v23, %v1231_v44  ;;  %1084 = vperm.xlu1 %3783, %v3965_v59   ;;  %v6350_v59 = vld [vmem:[#allocation39_spill] sm:$0xff]  ;;  %v3968_v23 = vld [vmem:[%s6199_s1 + $0x1c0] sm:$0xff] }
 0x24a   :  { %v1746_v42 = vmax.f32 %v1682_v62, 0.0  ;;  %v460_v50 = vmul.f32 %v4862_v32, %v6350_v59 }
 0x24b   :  { %v1743_v43 = vmax.f32 %v1679_v55, 0.0  ;;  %v6351_v55 = vld [vmem:[#allocation40_spill] sm:$0xff] }
 0x24d   :  { %v1885_v25 = vpack.c.bf16 %v1744_v60, %v1743_v43  ;;  %3784 = vset.pattern.permute.xlu1 %v6246_v58  ;;  %v645_v51 = vpop.permute.xlu1 %644  ;;  %v459_v60 = vmul.f32 %v4862_v32, %v6351_v55  ;;  %v3849_v55 = vld [vmem:[%s6201_s3 + $0x204] ss:$16 sps:$4 sm:$0xff]  }
 0x24e   :  { %1575 = vperm.xlu1 %3784, %v1309_v13   ;;  %v783_v15 = vmul.f32 %v4857_v61, %v645_v51  ;;  %v1171_v13 = vmul.f32 %v4864_v7, %v5197_v9  ;;  %v1531_v51 = vpop.permute.xlu0 %1530 }
 0x24f   :  { %2764 = vmatmul.mubr.bf16.gmra.mrb[32].mxu0 %v3827_v5  ;;  %3593 = vmatpush1.bf16.msra.mxu1 %v1885_v25 }
 0x250   :  { %2897 = vmatpush1.bf16.msra.mxu0 %v1885_v25  ;;  %2771 = vmatprep.mubr.bf16.mxu0 %v3828_v63  ;;  %v847_v5 = vadd.f32 %v783_v15, %v459_v60 }
 0x251   :  { %v649_v2 = vpop.permute.xlu1 %648  ;;  %2898 = vmatprep.subr.bf16.mxu0 %v6246_v58  ;;  %3578 = vmatprep.subr.bf16.mxu1 %v6246_v58 }
 0x252   :  { %3785 = vset.pattern.permute.xlu1 %v6239_v3  ;;  %v784_v29 = vmul.f32 %v4857_v61, %v649_v2  ;;  %v3839_v2 = vld [vmem:[%s6201_s3 + $0x180] ss:$16 sps:$4 sm:$0xff]   ;;  %v1235_v56 = vadd.f32 %v1171_v13, %v847_v5 }
 0x253   :  { %700 = vperm.xlu1 %3785, %v3966_v19  }
 0x254   :  { %v848_v43 = vadd.f32 %v784_v29, %v460_v50  ;;  %v1541_v29 = vpop.permute.xlu0 %1540  ;;  %v3848_v50 = vld [vmem:[%s6201_s3 + $0x1e0] ss:$16 sps:$4 sm:$0xff]  }
 0x256   :  { %v1037_v40 = vpop.permute.xlu1 %1036 }
 0x257   :  { %704 = vperm.xlu1 %3785, %v3967_v12   ;;  %2772 = vmatmul.mubr.bf16.gmra.mrb[36].mxu0 %v3830_v39  ;;  %v1172_v44 = vmul.f32 %v4864_v7, %v1037_v40  ;;  %v6352_v40 = vld [vmem:[#allocation41_spill] sm:$0xff] }
 0x258   :  { %2779 = vmatprep.mubr.bf16.mxu0 %v3831_v1  ;;  %v3842_v1 = vld [vmem:[%s6201_s3 + $0x1a0] ss:$16 sps:$4 sm:$0xff]   ;;  %v462_v57 = vmul.f32 %v4862_v32, %v6352_v40  ;;  %v3855_v40 = vld [vmem:[%s6201_s3 + $0x244] ss:$16 sps:$4 sm:$0xff]  }
 0x259   :  { %v1236_v63 = vadd.f32 %v1172_v44, %v848_v43 }
 0x25b   :  { %3786 = vset.pattern.permute.xlu1 %v6250_v38  ;;  %v1516_v45 = vpop.permute.xlu1 %1515  ;;  %v1684_v8 = vadd.f32 %v1531_v51, %v1236_v63  ;;  %v6354_v63 = vld [vmem:[#allocation43_spill] sm:$0xff] }
 0x25c   :  { %v1681_v35 = vadd.f32 %v1516_v45, %v1233_v20  ;;  %1092 = vperm.xlu1 %3786, %v3967_v12   ;;  %v3970_v20 = vld [vmem:[%s6199_s1 + $0x1d0] sm:$0xff]  ;;  %v6353_v45 = vld [vmem:[#allocation42_spill] sm:$0xff] }
 0x25d   :  { %v1748_v19 = vmax.f32 %v1684_v8, 0.0  ;;  %v3852_v8 = vld [vmem:[%s6201_s3 + $0x224] ss:$16 sps:$4 sm:$0xff]  }
 0x25e   :  { %v1745_v54 = vmax.f32 %v1681_v35, 0.0 }
 0x25f   :  { %2780 = vmatmul.mubr.bf16.gmra.mrb[40].mxu0 %v3833_v46  ;;  %v461_v46 = vmul.f32 %v4862_v32, %v6353_v45 }
 0x260   :  { %v1886_v26 = vpack.c.bf16 %v1746_v42, %v1745_v54  ;;  %3787 = vset.pattern.permute.xlu1 %v6246_v58  ;;  %v653_v6 = vpop.permute.xlu1 %652  ;;  %2787 = vmatprep.mubr.bf16.mxu0 %v3834_v49  ;;  %v3845_v49 = vld [vmem:[%s6201_s3 + $0x1c0] ss:$16 sps:$4 sm:$0xff]   ;;  %v1173_v42 = vmul.f32 %v4864_v7, %v5208_v16 }
 0x261   :  { %1585 = vperm.xlu1 %3787, %v1311_v17   ;;  %v785_v12 = vmul.f32 %v4857_v61, %v653_v6  ;;  %v3846_v6 = vld [vmem:[%s6201_s3 + $0x1e4] ss:$16 sps:$4 sm:$0xff]  }
 0x262   :  { %2899 = vmatpush1.bf16.msra.mxu0 %v1886_v26  ;;  %3594 = vmatpush1.bf16.msra.mxu1 %v1886_v26 }
 0x263   :  { %2900 = vmatprep.subr.bf16.mxu0 %v6246_v58  ;;  %3579 = vmatprep.subr.bf16.mxu1 %v6246_v58  ;;  %v849_v54 = vadd.f32 %v785_v12, %v461_v46 }
 0x264   :  { %v657_v53 = vpop.permute.xlu1 %656 }
 0x265   :  { %3788 = vset.pattern.permute.xlu1 %v6239_v3  ;;  %v786_v36 = vmul.f32 %v4857_v61, %v657_v53 }
 0x266   :  { %708 = vperm.xlu1 %3788, %v3968_v23   ;;  %v1315_v23 = vld [vmem:[%s6200_s2 + $0x1c0] sm:$0xff] }
 0x267   :  { %2788 = vmatmul.mubr.bf16.gmra.mrb[44].mxu0 %v3836_v11  ;;  %v850_v35 = vadd.f32 %v786_v36, %v462_v57  ;;  %v3971_v11 = vld [vmem:[%s6199_s1 + $0x1d8] sm:$0xff] }
 0x268   :  { %2795 = vmatprep.mubr.bf16.mxu0 %v3837_v34  ;;  %v1237_v34 = vadd.f32 %v1173_v42, %v849_v54  ;;  %v3858_v42 = vld [vmem:[%s6201_s3 + $0x264] ss:$16 sps:$4 sm:$0xff]  }
 0x269   :  { %v1045_v25 = vpop.permute.xlu1 %1044 }
 0x26a   :  { %712 = vperm.xlu1 %3788, %v3969_v52   ;;  %v1174_v62 = vmul.f32 %v4864_v7, %v1045_v25  ;;  %v464_v25 = vmul.f32 %v4862_v32, %v6354_v63 }
 0x26c   :  { %v1238_v17 = vadd.f32 %v1174_v62, %v850_v35  ;;  %v3857_v35 = vld [vmem:[%s6201_s3 + $0x240] ss:$16 sps:$4 sm:$0xff]  }
 0x26e   :  { %3789 = vset.pattern.permute.xlu1 %v6250_v38  ;;  %v1526_v9 = vpop.permute.xlu1 %1525  ;;  %v1686_v53 = vadd.f32 %v1541_v29, %v1238_v17  ;;  %v6356_v17 = vld [vmem:[#allocation45_spill] sm:$0xff] }
 0x26f   :  { %v1683_v41 = vadd.f32 %v1526_v9, %v1235_v56  ;;  %1100 = vperm.xlu1 %3789, %v3969_v52   ;;  %2796 = vmatmul.mubr.bf16.gmra.mrb[48].mxu0 %v3839_v2  ;;  %v3851_v2 = vld [vmem:[%s6201_s3 + $0x200] ss:$16 sps:$4 sm:$0xff]  }
 0x270   :  { %2803 = vmatprep.mubr.bf16.mxu0 %v3840_v22  ;;  %v1750_v15 = vmax.f32 %v1686_v53, 0.0  ;;  %v3972_v22 = vld [vmem:[%s6199_s1 + $0x1e0] sm:$0xff]  ;;  %v6355_v56 = vld [vmem:[#allocation44_spill] sm:$0xff] }
 0x271   :  { %v1747_v39 = vmax.f32 %v1683_v41, 0.0  ;;  %v463_v9 = vmul.f32 %v4862_v32, %v6355_v56  ;;  %v6357_v53 = vld [vmem:[#allocation46_spill] sm:$0xff] }
 0x273   :  { %v1887_v10 = vpack.c.bf16 %v1748_v19, %v1747_v39  ;;  %3790 = vset.pattern.permute.xlu1 %v6246_v58  ;;  %v661_v0 = vpop.permute.xlu1 %660  ;;  %v1175_v19 = vmul.f32 %v4864_v7, %v5220_v37 }
 0x274   :  { %1595 = vperm.xlu1 %3790, %v1313_v4   ;;  %v787_v51 = vmul.f32 %v4857_v61, %v661_v0  ;;  %v3973_v0 = vld [vmem:[%s6199_s1 + $0x1e8] sm:$0xff] }
 0x275   :  { %2901 = vmatpush1.bf16.msra.mxu0 %v1887_v10  ;;  %3595 = vmatpush1.bf16.msra.mxu1 %v1887_v10 }
 0x276   :  { %2902 = vmatprep.subr.bf16.mxu0 %v6246_v58  ;;  %3580 = vmatprep.subr.bf16.mxu1 %v6246_v58  ;;  %v851_v39 = vadd.f32 %v787_v51, %v463_v9  ;;  %v1319_v51 = vld [vmem:[%s6200_s2 + $0x1e0] sm:$0xff] }
 0x277   :  { %v665_v27 = vpop.permute.xlu1 %664  ;;  %2804 = vmatmul.mubr.bf16.gmra.mrb[52].mxu0 %v3842_v1  ;;  %v1551_v1 = vpop.permute.xlu0 %1550 }
 0x278   :  { %3791 = vset.pattern.permute.xlu1 %v6239_v3  ;;  %2811 = vmatprep.mubr.bf16.mxu0 %v3843_v47  ;;  %v788_v13 = vmul.f32 %v4857_v61, %v665_v27  ;;  %v1239_v36 = vadd.f32 %v1175_v19, %v851_v39  ;;  %v3854_v27 = vld [vmem:[%s6201_s3 + $0x220] ss:$16 sps:$4 sm:$0xff]  }
 0x279   :  { %716 = vperm.xlu1 %3791, %v3970_v20   ;;  %v1317_v20 = vld [vmem:[%s6200_s2 + $0x1d0] sm:$0xff] }
 0x27a   :  { %v852_v41 = vadd.f32 %v788_v13, %v464_v25 }
 0x27c   :  { %v1053_v26 = vpop.permute.xlu1 %1052 }
 0x27d   :  { %720 = vperm.xlu1 %3791, %v3971_v11   ;;  %v1176_v52 = vmul.f32 %v4864_v7, %v1053_v26  ;;  %v466_v26 = vmul.f32 %v4862_v32, %v6356_v17 }
 0x27f   :  { %2812 = vmatmul.mubr.bf16.gmra.mrb[56].mxu0 %v3845_v49  ;;  %v1240_v4 = vadd.f32 %v1176_v52, %v852_v41  ;;  %v3863_v52 = vld [vmem:[%s6201_s3 + $0x280] ss:$16 sps:$4 sm:$0xff]  }
 0x280   :  { %2819 = vmatprep.mubr.bf16.mxu0 %v3846_v6  ;;  %v6358_v41 = vld [vmem:[#allocation47_spill] sm:$0xff] }
 0x281   :  { %3792 = vset.pattern.permute.xlu1 %v6250_v38  ;;  %v1536_v16 = vpop.permute.xlu1 %1535  ;;  %v1688_v47 = vadd.f32 %v1551_v1, %v1240_v4  ;;  %v468_v19 = vmul.f32 %v4862_v32, %v6358_v41 }
 0x282   :  { %v1685_v59 = vadd.f32 %v1536_v16, %v1237_v34  ;;  %1108 = vperm.xlu1 %3792, %v3971_v11   ;;  %v3974_v11 = vld [vmem:[%s6199_s1 + $0x1f0] sm:$0xff]  ;;  %v465_v34 = vmul.f32 %v4862_v32, %v6357_v53 }
 0x283   :  { %v1752_v62 = vmax.f32 %v1688_v47, 0.0 }
 0x284   :  { %v1749_v44 = vmax.f32 %v1685_v59, 0.0  ;;  %v1177_v59 = vmul.f32 %v4864_v7, %v5237_v33 }
 0x286   :  { %v1888_v60 = vpack.c.bf16 %v1750_v15, %v1749_v44  ;;  %3793 = vset.pattern.permute.xlu1 %v6246_v58  ;;  %v669_v43 = vpop.permute.xlu1 %668 }
 0x287   :  { %1605 = vperm.xlu1 %3793, %v1315_v23   ;;  %2820 = vmatmul.mubr.bf16.gmra.mrb[60].mxu0 %v3848_v50  ;;  %v789_v6 = vmul.f32 %v4857_v61, %v669_v43  ;;  %v3860_v23 = vld [vmem:[%s6201_s3 + $0x260] ss:$16 sps:$4 sm:$0xff]  }
 0x288   :  { %2903 = vmatpush1.bf16.msra.mxu0 %v1888_v60  ;;  %3596 = vmatpush1.bf16.msra.mxu1 %v1888_v60  ;;  %v1561_v60 = vpop.permute.xlu0 %1560 }
 0x289   :  { %2827 = vmatprep.mubr.bf16.mxu0 %v3849_v55  ;;  %2904 = vmatprep.subr.bf16.mxu0 %v6246_v58  ;;  %v853_v50 = vadd.f32 %v789_v6, %v465_v34  ;;  %v3861_v55 = vld [vmem:[%s6201_s3 + $0x284] ss:$16 sps:$4 sm:$0xff]   ;;  %v3878_v6 = vld [vmem:[%s6201_s3 + $0x6c] ss:$16 sps:$4 sm:$0xff]  }
 0x28a   :  { %v673_v5 = vpop.permute.xlu1 %672  ;;  %3581 = vmatprep.subr.bf16.mxu1 %v6246_v58  ;;  %2948 = vmatprep.mubr.bf16.mxu1 %v3878_v6  ;;  %v1910_v6 = vld [vmem:[%s6202_s4 + $0x58] sm:$0xff] }
 0x28b   :  { %3794 = vset.pattern.permute.xlu1 %v6239_v3  ;;  %v790_v49 = vmul.f32 %v4857_v61, %v673_v5  ;;  %v1241_v13 = vadd.f32 %v1177_v59, %v853_v50  ;;  %v3872_v50 = vld [vmem:[%s6201_s3 + $0x2e0] ss:$16 sps:$4 sm:$0xff]  }
 0x28c   :  { %724 = vperm.xlu1 %3794, %v3972_v22  }
 0x28d   :  { %v854_v16 = vadd.f32 %v790_v49, %v466_v26  ;;  %v1900_v49 = vld [vmem:[%s6202_s4 + $0x8] sm:$0xff] }
 0x28f   :  { %v1061_v10 = vpop.permute.xlu1 %1060  ;;  %2828 = vmatmul.mubr.bf16.gmra.mrb[64].mxu0 %v3851_v2 }
 0x290   :  { %728 = vperm.xlu1 %3794, %v3973_v0   ;;  %2835 = vmatprep.mubr.bf16.mxu0 %v3852_v8  ;;  %v1178_v29 = vmul.f32 %v4864_v7, %v1061_v10  ;;  %v1321_v8 = vld [vmem:[%s6200_s2 + $0x1f0] sm:$0xff]  ;;  %v1322_v10 = vld [vmem:[%s6200_s2 + $0x1f8] sm:$0xff] }
 0x292   :  { %v1242_v15 = vadd.f32 %v1178_v29, %v854_v16  ;;  %v1918_v29 = vld [vmem:[%s6202_s4 + $0x98] sm:$0xff] }
 0x293   :  { %v1902_v16 = vld [vmem:[%s6202_s4 + $0x18] sm:$0xff] }
 0x294   :  { %3795 = vset.pattern.permute.xlu1 %v6250_v38  ;;  %v1546_v37 = vpop.permute.xlu1 %1545  ;;  %v1690_v43 = vadd.f32 %v1561_v60, %v1242_v15  ;;  %v6360_v15 = vld [vmem:[#allocation49_spill] sm:$0xff]  ;;  %v6361_v60 = vld [vmem:[#allocation50_spill] sm:$0xff] }
 0x295   :  { %v1687_v57 = vadd.f32 %v1546_v37, %v1239_v36  ;;  %1116 = vperm.xlu1 %3795, %v3973_v0   ;;  %v6359_v0 = vld [vmem:[#allocation48_spill] sm:$0xff] }
 0x296   :  { %v1754_v25 = vmax.f32 %v1690_v43, 0.0  ;;  %v467_v1 = vmul.f32 %v4862_v32, %v6359_v0  ;;  %v3866_v36 = vld [vmem:[%s6201_s3 + $0x2a0] ss:$16 sps:$4 sm:$0xff]   ;;  %v469_v43 = vmul.f32 %v4862_v32, %v6361_v60 }
 0x297   :  { %v1751_v12 = vmax.f32 %v1687_v57, 0.0  ;;  %2836 = vmatmul.mubr.bf16.gmra.mrb[68].mxu0 %v3854_v27  ;;  %v3867_v27 = vld [vmem:[%s6201_s3 + $0x2c4] ss:$16 sps:$4 sm:$0xff]  }
 0x298   :  { %2843 = vmatprep.mubr.bf16.mxu0 %v3855_v40 }
 0x299   :  { %v1889_v45 = vpack.c.bf16 %v1752_v62, %v1751_v12  ;;  %3796 = vset.pattern.permute.xlu1 %v6246_v58  ;;  %v677_v46 = vpop.permute.xlu1 %676  ;;  %v1916_v12 = vld [vmem:[%s6202_s4 + $0x88] sm:$0xff]  ;;  %v1179_v62 = vmul.f32 %v4864_v7, %v5253_v21  ;;  %v3870_v21 = vld [vmem:[%s6201_s3 + $0x2e4] ss:$16 sps:$4 sm:$0xff]  }
 0x29a   :  { %1615 = vperm.xlu1 %3796, %v1317_v20   ;;  %v791_v39 = vmul.f32 %v4857_v61, %v677_v46  ;;  %v1571_v20 = vpop.permute.xlu0 %1570 }
 0x29b   :  { %2905 = vmatpush1.bf16.msra.mxu0 %v1889_v45  ;;  %3597 = vmatpush1.bf16.msra.mxu1 %v1889_v45 }
 0x29c   :  { %2906 = vmatprep.subr.bf16.mxu0 %v6246_v58  ;;  %3582 = vmatprep.subr.bf16.mxu1 %v6246_v58  ;;  %v855_v37 = vadd.f32 %v791_v39, %v467_v1  ;;  %v1924_v1 = vld [vmem:[%s6202_s4 + $0xc8] sm:$0xff] }
 0x29d   :  { %v681_v54 = vpop.permute.xlu1 %680 }
 0x29e   :  { %3797 = vset.pattern.permute.xlu1 %v6239_v3  ;;  %v3975_v3 = vld [vmem:[%s6199_s1 + $0x1f8] sm:$0xff]  ;;  %v792_v56 = vmul.f32 %v4857_v61, %v681_v54  ;;  %v1243_v46 = vadd.f32 %v1179_v62, %v855_v37  ;;  %v3869_v54 = vld [vmem:[%s6201_s3 + $0x2c0] ss:$16 sps:$4 sm:$0xff]   ;;  %v1908_v62 = vld [vmem:[%s6202_s4 + $0x48] sm:$0xff] }
 0x29f   :  { %732 = vperm.xlu1 %3797, %v3974_v11   ;;  %2844 = vmatmul.mubr.bf16.gmra.mrb[72].mxu0 %v3857_v35 }
 0x2a0   :  { %2851 = vmatprep.mubr.bf16.mxu0 %v3858_v42  ;;  %v856_v47 = vadd.f32 %v792_v56, %v468_v19 }
 0x2a2   :  { %v1069_v44 = vpop.permute.xlu1 %1068 }
 0x2a3   :  { %736 = vperm.xlu1 %3797, %v3975_v3   ;;  %v1180_v4 = vmul.f32 %v4864_v7, %v1069_v44  ;;  %v470_v44 = vmul.f32 %v4862_v32, %v6360_v15 }
 0x2a5   :  { %v1244_v40 = vadd.f32 %v1180_v4, %v856_v47  ;;  %v6362_v47 = vld [vmem:[#allocation51_spill] sm:$0xff] }
 0x2a7   :  { %3799 = vset.pattern.permute.xlu1 %v6250_v38  ;;  %v1556_v33 = vpop.permute.xlu1 %1555  ;;  %2852 = vmatmul.mubr.bf16.gmra.mrb[76].mxu0 %v3860_v23  ;;  %v3864_v38 = vld [vmem:[%s6201_s3 + $0x2a4] ss:$16 sps:$4 sm:$0xff]   ;;  %v1692_v45 = vadd.f32 %v1571_v20, %v1244_v40 }
 0x2a8   :  { %v1689_v5 = vadd.f32 %v1556_v33, %v1241_v13  ;;  %1124 = vperm.xlu1 %3799, %v3975_v3   ;;  %2859 = vmatprep.mubr.bf16.mxu0 %v3861_v55  ;;  %v3875_v55 = vld [vmem:[%s6201_s3 + $0xc] ss:$16 sps:$4 sm:$0xff]   ;;  %v6363_v40 = vld [vmem:[#allocation52_spill] sm:$0xff] }
 0x2a9   :  { %v1756_v26 = vmax.f32 %v1692_v45, 0.0  ;;  %v1920_v33 = vld [vmem:[%s6202_s4 + $0xa8] sm:$0xff] }
 0x2aa   :  { %v1753_v63 = vmax.f32 %v1689_v5, 0.0 }
 0x2ac   :  { %v1890_v2 = vpack.c.bf16 %v1754_v25, %v1753_v63  ;;  %3800 = vset.pattern.permute.xlu1 %v6246_v58  ;;  %v685_v22 = vpop.permute.xlu1 %684 }
 0x2ad   :  { %1625 = vperm.xlu1 %3800, %v1319_v51   ;;  %v793_v3 = vmul.f32 %v4857_v61, %v685_v22  ;;  %v1181_v51 = vmul.f32 %v4864_v7, %v5262_v18  ;;  %v1906_v18 = vld [vmem:[%s6202_s4 + $0x38] sm:$0xff] }
 0x2ae   :  { %2907 = vmatpush1.bf16.msra.mxu0 %v1890_v2  ;;  %3598 = vmatpush1.bf16.msra.mxu1 %v1890_v2  ;;  %v1581_v2 = vpop.permute.xlu0 %1580 }
 0x2af   :  { %2860 = vmatmul.mubr.bf16.gmra.mrb[80].mxu0 %v3863_v52  ;;  %2908 = vmatprep.subr.bf16.mxu0 %v6246_v58  ;;  %v857_v5 = vadd.f32 %v793_v3, %v469_v43  ;;  %v1904_v52 = vld [vmem:[%s6202_s4 + $0x28] sm:$0xff] }
 0x2b0   :  { %v689_v9 = vpop.permute.xlu1 %688  ;;  %2867 = vmatprep.mubr.bf16.mxu0 %v3864_v38  ;;  %3583 = vmatprep.subr.bf16.mxu1 %v6246_v58 }
 0x2b1   :  { %1635 = vperm.xlu1 %3800, %v1321_v8   ;;  %v794_v34 = vmul.f32 %v4857_v61, %v689_v9  ;;  %v1245_v22 = vadd.f32 %v1181_v51, %v857_v5  ;;  %v1922_v9 = vld [vmem:[%s6202_s4 + $0xb8] sm:$0xff] }
 0x2b3   :  { %v858_v13 = vadd.f32 %v794_v34, %v470_v44  ;;  %v1928_v34 = vld [vmem:[%s6202_s4 + $0xe8] sm:$0xff] }
 0x2b5   :  { %1640 = vperm.xlu1 %3800, %v1322_v10   ;;  %v1077_v57 = vpop.permute.xlu1 %1076 }
 0x2b6   :  { %v1182_v23 = vmul.f32 %v4864_v7, %v1077_v57  ;;  %v471_v57 = vmul.f32 %v4862_v32, %v6363_v40 }
 0x2b7   :  { %2868 = vmatmul.mubr.bf16.gmra.mrb[84].mxu0 %v3866_v36  ;;  %v472_v36 = vmul.f32 %v4862_v32, %v6362_v47  ;;  %v6366_v47 = vld [vmem:[#allocation55_spill] sm:$0xff] }
 0x2b8   :  { %2875 = vmatprep.mubr.bf16.mxu0 %v3867_v27  ;;  %v1246_v63 = vadd.f32 %v1182_v23, %v858_v13  ;;  %v1912_v23 = vld [vmem:[%s6202_s4 + $0x68] sm:$0xff] }
 0x2b9   :  { %2034 = vperm.xlu1 %3800, %v1916_v12  }
 0x2ba   :  { %v1566_v35 = vpop.permute.xlu1 %1565  ;;  %v1694_v38 = vadd.f32 %v1581_v2, %v1246_v63  ;;  %v1930_v63 = vld [vmem:[%s6202_s4 + $0xf8] sm:$0xff] }
 0x2bb   :  { %v1691_v42 = vadd.f32 %v1566_v35, %v1243_v46  ;;  %v1183_v35 = vmul.f32 %v4864_v7, %v5286_v31 }
 0x2bc   :  { %v1758_v19 = vmax.f32 %v1694_v38, 0.0 }
 0x2bd   :  { %v1755_v17 = vmax.f32 %v1691_v42, 0.0  ;;  %1954 = vperm.xlu1 %3800, %v1900_v49   ;;  %v1591_v49 = vpop.permute.xlu0 %1590  ;;  %v1926_v42 = vld [vmem:[%s6202_s4 + $0xd8] sm:$0xff] }
 0x2bf   :  { %v1891_v11 = vpack.c.bf16 %v1756_v26, %v1755_v17  ;;  %v693_v53 = vpop.permute.xlu1 %692  ;;  %2876 = vmatmul.mubr.bf16.gmra.mrb[88].mxu0 %v3869_v54 }
 0x2c0   :  { %2883 = vmatprep.mubr.bf16.mxu0 %v3870_v21  ;;  %v795_v27 = vmul.f32 %v4857_v61, %v693_v53 }
 0x2c1   :  { %2044 = vperm.xlu1 %3800, %v1918_v29   ;;  %2909 = vmatpush1.bf16.msra.mxu0 %v1891_v11  ;;  %v1601_v51 = vpop.permute.xlu0 %1600 }
 0x2c2   :  { %3599 = vmatpush1.bf16.msra.mxu1 %v1891_v11  ;;  %2910 = vmatprep.subr.bf16.mxu0 %v6246_v58  ;;  %v859_v20 = vadd.f32 %v795_v27, %v471_v57  ;;  %v1936_v57 = vld [vmem:[%s6202_s4 + $0x128] sm:$0xff] }
 0x2c3   :  { %v697_v59 = vpop.permute.xlu1 %696  ;;  %3584 = vmatprep.subr.bf16.mxu1 %v6246_v58 }
 0x2c4   :  { %v796_v10 = vmul.f32 %v4857_v61, %v697_v59  ;;  %v1247_v21 = vadd.f32 %v1183_v35, %v859_v20 }
 0x2c5   :  { %1964 = vperm.xlu1 %3800, %v1902_v16  }
 0x2c6   :  { %v860_v12 = vadd.f32 %v796_v10, %v472_v36  ;;  %v476_v36 = vmul.f32 %v4862_v32, %v6366_v47 }
 0x2c7   :  { %2884 = vmatmul.mubr.bf16.gmra.mrb[92].mxu0 %v3872_v50  ;;  %v6364_v50 = vld [vmem:[#allocation53_spill] sm:$0xff] }
 0x2c8   :  { %v1085_v25 = vpop.permute.xlu1 %1084  ;;  %2924 = vmatprep.mubr.bf16.mxu0 %v3875_v55  ;;  %v474_v15 = vmul.f32 %v4862_v32, %v6364_v50  ;;  %v6365_v55 = vld [vmem:[#allocation54_spill] sm:$0xff] }
 0x2c9   :  { %2054 = vperm.xlu1 %3800, %v1920_v33   ;;  %v1184_v37 = vmul.f32 %v4864_v7, %v1085_v25  ;;  %v473_v60 = vmul.f32 %v4862_v32, %v6365_v55  ;;  %v1185_v25 = vmul.f32 %v4864_v7, %v5303_v24 }
 0x2cb   :  { %v1248_v45 = vadd.f32 %v1184_v37, %v860_v12  ;;  %v6367_v12 = vld [vmem:[#allocation56_spill] sm:$0xff] }
 0x2cd   :  { %1974 = vperm.xlu1 %3800, %v1904_v52   ;;  %v1576_v8 = vpop.permute.xlu1 %1575  ;;  %v1696_v54 = vadd.f32 %v1591_v49, %v1248_v45 }
 0x2ce   :  { %v1693_v56 = vadd.f32 %v1576_v8, %v1245_v22  ;;  %v1914_v22 = vld [vmem:[%s6202_s4 + $0x78] sm:$0xff] }
 0x2cf   :  { %v1760_v11 = vmax.f32 %v1696_v54, 0.0  ;;  %v1187_v54 = vmul.f32 %v4864_v7, %v5308_v28  ;;  %v1942_v28 = vld [vmem:[%s6202_s4 + $0x158] sm:$0xff] }
 0x2d0   :  { %v1757_v41 = vmax.f32 %v1693_v56, 0.0 }
 0x2d1   :  { %2064 = vperm.xlu1 %3800, %v1922_v9  }
 0x2d2   :  { %v1892_v39 = vpack.c.bf16 %v1758_v19, %v1757_v41  ;;  %v701_v4 = vpop.permute.xlu1 %700  ;;  %v1932_v41 = vld [vmem:[%s6202_s4 + $0x108] sm:$0xff] }
 0x2d3   :  { %v797_v44 = vmul.f32 %v4857_v61, %v701_v4  ;;  %v1934_v4 = vld [vmem:[%s6202_s4 + $0x118] sm:$0xff] }
 0x2d4   :  { %2911 = vmatpush1.bf16.msra.mxu0 %v1892_v39  ;;  %3600 = vmatpush1.bf16.msra.mxu1 %v1892_v39 }
 0x2d5   :  { %1984 = vperm.xlu1 %3800, %v1906_v18   ;;  %2912 = vmatprep.subr.bf16.mxu0 %v6246_v58  ;;  %v861_v13 = vadd.f32 %v797_v44, %v473_v60 }
 0x2d6   :  { %v705_v0 = vpop.permute.xlu1 %704  ;;  %3585 = vmatprep.subr.bf16.mxu1 %v6246_v58 }
 0x2d7   :  { %v798_v16 = vmul.f32 %v4857_v61, %v705_v0  ;;  %v1249_v2 = vadd.f32 %v1185_v25, %v861_v13 }
 0x2d9   :  { %2074 = vperm.xlu1 %3800, %v1924_v1   ;;  %v862_v43 = vadd.f32 %v798_v16, %v474_v15 }
 0x2db   :  { %v1093_v46 = vpop.permute.xlu1 %1092 }
 0x2dc   :  { %v1186_v3 = vmul.f32 %v4864_v7, %v1093_v46 }
 0x2dd   :  { %1994 = vperm.xlu1 %3800, %v1908_v62   ;;  %v475_v62 = vmul.f32 %v4862_v32, %v6367_v12 }
 0x2de   :  { %v1250_v33 = vadd.f32 %v1186_v3, %v862_v43  ;;  %v1944_v43 = vld [vmem:[%s6202_s4 + $0x168] sm:$0xff] }
 0x2e0   :  { %v1586_v17 = vpop.permute.xlu1 %1585  ;;  %v1698_v52 = vadd.f32 %v1601_v51, %v1250_v33  ;;  %v6368_v33 = vld [vmem:[#allocation57_spill] sm:$0xff]  ;;  %v6369_v51 = vld [vmem:[#allocation58_spill] sm:$0xff] }
 0x2e1   :  { %v1695_v26 = vadd.f32 %v1586_v17, %v1247_v21  ;;  %2084 = vperm.xlu1 %3800, %v1926_v42   ;;  %v1938_v42 = vld [vmem:[%s6202_s4 + $0x138] sm:$0xff]  ;;  %v1611_v17 = vpop.permute.xlu0 %1610 }
 0x2e2   :  { %v1762_v9 = vmax.f32 %v1698_v52, 0.0  ;;  %v477_v52 = vmul.f32 %v4862_v32, %v6369_v51 }
 0x2e3   :  { %v1759_v29 = vmax.f32 %v1695_v26, 0.0 }
 0x2e5   :  { %v1893_v53 = vpack.c.bf16 %v1760_v11, %v1759_v29  ;;  %2004 = vperm.xlu1 %3800, %v1910_v6   ;;  %v709_v31 = vpop.permute.xlu1 %708 }
 0x2e6   :  { %v799_v27 = vmul.f32 %v4857_v61, %v709_v31  ;;  %v1940_v31 = vld [vmem:[%s6202_s4 + $0x148] sm:$0xff] }
 0x2e7   :  { %2913 = vmatpush1.bf16.msra.mxu0 %v1893_v53  ;;  %3601 = vmatpush1.bf16.msra.mxu1 %v1893_v53 }
 0x2e8   :  { %2914 = vmatprep.subr.bf16.mxu0 %v6246_v58  ;;  %3586 = vmatprep.subr.bf16.mxu1 %v6246_v58  ;;  %v863_v45 = vadd.f32 %v799_v27, %v475_v62 }
 0x2e9   :  { %2094 = vperm.xlu1 %3800, %v1928_v34   ;;  %v713_v59 = vpop.permute.xlu1 %712 }
 0x2ea   :  { %v800_v18 = vmul.f32 %v4857_v61, %v713_v59  ;;  %v1251_v29 = vadd.f32 %v1187_v54, %v863_v45 }
 0x2ec   :  { %v864_v20 = vadd.f32 %v800_v18, %v476_v36  ;;  %v1621_v18 = vpop.permute.xlu0 %1620 }
 0x2ed   :  { %2014 = vperm.xlu1 %3800, %v1912_v23  }
 0x2ee   :  { %v1101_v5 = vpop.permute.xlu1 %1100 }
 0x2ef   :  { %v1188_v37 = vmul.f32 %v4864_v7, %v1101_v5  ;;  %v478_v5 = vmul.f32 %v4862_v32, %v6368_v33 }
 0x2f1   :  { %2104 = vperm.xlu1 %3800, %v1930_v63   ;;  %v1252_v46 = vadd.f32 %v1188_v37, %v864_v20 }
 0x2f3   :  { %v1596_v38 = vpop.permute.xlu1 %1595  ;;  %v1700_v6 = vadd.f32 %v1611_v17, %v1252_v46 }
 0x2f4   :  { %v1697_v8 = vadd.f32 %v1596_v38, %v1249_v2  ;;  %v1946_v38 = vld [vmem:[%s6202_s4 + $0x178] sm:$0xff] }
 0x2f5   :  { %2024 = vperm.xlu1 %3800, %v1914_v22   ;;  %v1764_v59 = vmax.f32 %v1700_v6, 0.0 }
 0x2f6   :  { %v1761_v56 = vmax.f32 %v1697_v8, 0.0 }
 0x2f8   :  { %v1894_v19 = vpack.c.bf16 %v1762_v9, %v1761_v56  ;;  %v717_v39 = vpop.permute.xlu1 %716 }
 0x2f9   :  { %2114 = vperm.xlu1 %3800, %v1932_v41   ;;  %v801_v63 = vmul.f32 %v4857_v61, %v717_v39 }
 0x2fa   :  { %v5760_v24 = vpop.f32.mrb[12].mxu0  ;;  %2915 = vmatpush1.bf16.msra.mxu0 %v1894_v19  ;;  %3602 = vmatpush1.bf16.msra.mxu1 %v1894_v19 }
 0x2fb   :  { %v2727_v10 = vpop.f32.mrb[13].mxu0  ;;  %2916 = vmatprep.subr.bf16.mxu0 %v6246_v58  ;;  %3587 = vmatprep.subr.bf16.mxu1 %v6246_v58  ;;  %v865_v56 = vadd.f32 %v801_v63, %v477_v52 }
 0x2fc   :  { %v721_v0 = vpop.permute.xlu1 %720  ;;  %v5768_v1 = vpop.f32.mrb[14].mxu0 }
 0x2fd   :  { %2124 = vperm.xlu1 %3800, %v1934_v4   ;;  %v2730_v40 = vpop.f32.mrb[15].mxu0  ;;  %v802_v60 = vmul.f32 %v4857_v61, %v721_v0  ;;  %v1189_v4 = vmul.f32 %v4864_v7, %v5320_v48 }
 0x2ff   :  { %v866_v2 = vadd.f32 %v802_v60, %v478_v5  ;;  %v1253_v0 = vadd.f32 %v1189_v4, %v865_v56  ;;  %v6372_v60 = vld [vmem:[#allocation62_spill] sm:$0xff]  ;;  %v1193_v56 = vmul.f32 %v4864_v7, %v5341_v14 }
 0x301   :  { %2134 = vperm.xlu1 %3800, %v1936_v57   ;;  %v1109_v35 = vpop.permute.xlu1 %1108 }
 0x302   :  { %v5779_v49 = vpop.f32.mrb[16].mxu0  ;;  %v1190_v25 = vmul.f32 %v4864_v7, %v1109_v35 }
 0x303   :  { %v2735_v21 = vpop.f32.mrb[17].mxu0 }
 0x304   :  { %v5786_v26 = vpop.f32.mrb[18].mxu0  ;;  %v1254_v9 = vadd.f32 %v1190_v25, %v866_v2 }
 0x305   :  { %2144 = vperm.xlu1 %3800, %v1938_v42   ;;  %v2738_v11 = vpop.f32.mrb[19].mxu0  ;;  %v6370_v42 = vld [vmem:[#allocation59_spill] sm:$0xff] }
 0x306   :  { %v1606_v53 = vpop.permute.xlu1 %1605  ;;  %v1702_v10 = vadd.f32 %v1621_v18, %v1254_v9  ;;  %v480_v54 = vmul.f32 %v4862_v32, %v6370_v42  ;;  %v6371_v11 = vld [vmem:[#allocation60_spill] sm:$0xff] }
 0x307   :  { %v1699_v34 = vadd.f32 %v1606_v53, %v1251_v29  ;;  %v479_v53 = vmul.f32 %v4862_v32, %v6371_v11  ;;  %v3883_v11 = vld [vmem:[%s6201_s3 + $0x28] ss:$16 sps:$4 sm:$0xff]  }
 0x308   :  { %v1766_v57 = vmax.f32 %v1702_v10, 0.0 }
 0x309   :  { %v1763_v16 = vmax.f32 %v1699_v34, 0.0  ;;  %2154 = vperm.xlu1 %3800, %v1940_v31  }
 0x30a   :  { %v5791_v50 = vpop.f32.mrb[20].mxu0 }
 0x30b   :  { %v1895_v15 = vpack.c.bf16 %v1764_v59, %v1763_v16  ;;  %v725_v44 = vpop.permute.xlu1 %724  ;;  %v2743_v3 = vpop.f32.mrb[21].mxu0 }
 0x30c   :  { %v5796_v23 = vpop.f32.mrb[22].mxu0  ;;  %v803_v21 = vmul.f32 %v4857_v61, %v725_v44 }
 0x30d   :  { %2164 = vperm.xlu1 %3800, %v1942_v28   ;;  %2917 = vmatpush1.bf16.msra.mxu0 %v1895_v15  ;;  %v2746_v55 = vpop.f32.mrb[23].mxu0 }
 0x30e   :  { %3603 = vmatpush1.bf16.msra.mxu1 %v1895_v15  ;;  %2918 = vmatprep.subr.bf16.mxu0 %v6246_v58  ;;  %v867_v16 = vadd.f32 %v803_v21, %v479_v53  ;;  %v1191_v15 = vmul.f32 %v4864_v7, %v5327_v30  ;;  %v1631_v55 = vpop.permute.xlu0 %1630  ;;  %v6373_v30 = vld [vmem:[#allocation61_spill] sm:$0xff] }
 0x30f   :  { %v729_v13 = vpop.permute.xlu1 %728  ;;  %3588 = vmatprep.subr.bf16.mxu1 %v6246_v58  ;;  %v3884_v53 = vld [vmem:[%s6201_s3 + $0x88] ss:$16 sps:$4 sm:$0xff]  }
 0x310   :  { %v804_v46 = vmul.f32 %v4857_v61, %v729_v13  ;;  %v1255_v33 = vadd.f32 %v1191_v15, %v867_v16  ;;  %v3887_v16 = vld [vmem:[%s6201_s3 + $0xac] ss:$16 sps:$4 sm:$0xff]  }
 0x311   :  { %2174 = vperm.xlu1 %3800, %v1944_v43   ;;  %v481_v43 = vmul.f32 %v4862_v32, %v6372_v60 }
 0x312   :  { %v5810_v22 = vpop.f32.mrb[24].mxu0  ;;  %v868_v31 = vadd.f32 %v804_v46, %v480_v54  ;;  %v3873_v46 = vld [vmem:[%s6201_s3 + $0x8] ss:$16 sps:$4 sm:$0xff]   ;;  %v3881_v54 = vld [vmem:[%s6201_s3 + $0x8c] ss:$16 sps:$4 sm:$0xff]  }
 0x313   :  { %v2751_v8 = vpop.f32.mrb[25].mxu0 }
 0x314   :  { %v1117_v41 = vpop.permute.xlu1 %1116  ;;  %v5815_v19 = vpop.f32.mrb[26].mxu0  ;;  %v482_v8 = vmul.f32 %v4862_v32, %v6373_v30 }
 0x315   :  { %2184 = vperm.xlu1 %3800, %v1946_v38   ;;  %v2754_v39 = vpop.f32.mrb[27].mxu0  ;;  %v1192_v17 = vmul.f32 %v4864_v7, %v1117_v41 }
 0x317   :  { %v1256_v59 = vadd.f32 %v1192_v17, %v868_v31 }
 0x319   :  { %v1616_v47 = vpop.permute.xlu1 %1615  ;;  %v1704_v13 = vadd.f32 %v1631_v55, %v1256_v59  ;;  %v3890_v55 = vld [vmem:[%s6201_s3 + $0xa8] ss:$16 sps:$4 sm:$0xff]  }
 0x31a   :  { %v1701_v36 = vadd.f32 %v1616_v47, %v1253_v0  ;;  %v5819_v27 = vpop.f32.mrb[28].mxu0 }
 0x31b   :  { %v2759_v37 = vpop.f32.mrb[29].mxu0  ;;  %v1768_v39 = vmax.f32 %v1704_v13, 0.0 }
 0x31c   :  { %v1765_v40 = vmax.f32 %v1701_v36, 0.0  ;;  %v5821_v12 = vpop.f32.mrb[30].mxu0 }
 0x31d   :  { %v2762_v62 = vpop.f32.mrb[31].mxu0 }
 0x31e   :  { %v1896_v20 = vpack.c.bf16 %v1766_v57, %v1765_v40  ;;  %v733_v45 = vpop.permute.xlu1 %732 }
 0x31f   :  { %v805_v3 = vmul.f32 %v4857_v61, %v733_v45 }
 0x320   :  { %2919 = vmatpush1.bf16.msra.mxu0 %v1896_v20  ;;  %3604 = vmatpush1.bf16.msra.mxu1 %v1896_v20 }
 0x321   :  { %2920 = vmatprep.subr.bf16.mxu0 %v6246_v58  ;;  %3589 = vmatprep.subr.bf16.mxu1 %v6246_v58  ;;  %v869_v51 = vadd.f32 %v805_v3, %v481_v43  ;;  %v3889_v3 = vld [vmem:[%s6201_s3 + $0x48] ss:$16 sps:$4 sm:$0xff]   ;;  %v3891_v43 = vld [vmem:[%s6201_s3 + $0xcc] ss:$16 sps:$4 sm:$0xff]  }
 0x322   :  { %v737_v48 = vpop.permute.xlu1 %736  ;;  %v5826_v35 = vpop.f32.mrb[32].mxu0 }
 0x323   :  { %v2767_v6 = vpop.f32.mrb[33].mxu0  ;;  %v806_v52 = vmul.f32 %v4857_v61, %v737_v48  ;;  %v1257_v0 = vadd.f32 %v1193_v56, %v869_v51  ;;  %v3876_v48 = vld [vmem:[%s6201_s3 + $0x68] ss:$16 sps:$4 sm:$0xff]  }
 0x324   :  { %v5832_v29 = vpop.f32.mrb[34].mxu0 }
 0x325   :  { %v2770_v34 = vpop.f32.mrb[35].mxu0  ;;  %v870_v18 = vadd.f32 %v806_v52, %v482_v8  ;;  %v3894_v52 = vld [vmem:[%s6201_s3 + $0xec] ss:$16 sps:$4 sm:$0xff]   ;;  %v3896_v8 = vld [vmem:[%s6201_s3 + $0xe8] ss:$16 sps:$4 sm:$0xff]  }
 0x326   :  { %v3885_v34 = vld [vmem:[%s6201_s3 + $0x4c] ss:$16 sps:$4 sm:$0xff]  }
 0x327   :  { %v1125_v28 = vpop.permute.xlu1 %1124 }
 0x328   :  { %v1194_v9 = vmul.f32 %v4864_v7, %v1125_v28 }
 0x32a   :  { %v5839_v44 = vpop.f32.mrb[36].mxu0  ;;  %v1258_v61 = vadd.f32 %v1194_v9, %v870_v18  ;;  %v3897_v9 = vld [vmem:[%s6201_s3 + $0x10c] ss:$16 sps:$4 sm:$0xff]   ;;  %v3899_v18 = vld [vmem:[%s6201_s3 + $0x108] ss:$16 sps:$4 sm:$0xff]  }
 0x32b   :  { %v2775_v5 = vpop.f32.mrb[37].mxu0 }
 0x32c   :  { %v1626_v63 = vpop.permute.xlu1 %1625  ;;  %v5843_v25 = vpop.f32.mrb[38].mxu0 }
 0x32d   :  { %v1703_v2 = vadd.f32 %v1626_v63, %v1255_v33  ;;  %v2778_v38 = vpop.f32.mrb[39].mxu0  ;;  %v3893_v63 = vld [vmem:[%s6201_s3 + $0xc8] ss:$16 sps:$4 sm:$0xff]  }
 0x32f   :  { %v1767_v41 = vmax.f32 %v1703_v2, 0.0 }
 0x330   :  { %v1636_v4 = vpop.permute.xlu1 %1635 }
 0x331   :  { %v1897_v10 = vpack.c.bf16 %v1768_v39, %v1767_v41  ;;  %v1705_v36 = vadd.f32 %v1636_v4, %v1257_v0  ;;  %v3900_v0 = vld [vmem:[%s6201_s3 + $0x12c] ss:$16 sps:$4 sm:$0xff]  }
 0x332   :  { %v5851_v47 = vpop.f32.mrb[40].mxu0 }
 0x333   :  { %2921 = vmatpush1.bf16.msra.mxu0 %v1897_v10  ;;  %3605 = vmatpush1.bf16.msra.mxu1 %v1897_v10  ;;  %v2783_v37 = vpop.f32.mrb[41].mxu0  ;;  %v1769_v57 = vmax.f32 %v1705_v36, 0.0 }
 0x334   :  { %v1641_v40 = vpop.permute.xlu1 %1640  ;;  %v5853_v32 = vpop.f32.mrb[42].mxu0  ;;  %2922 = vmatprep.subr.bf16.mxu0 %v6246_v58  ;;  %3590 = vmatprep.subr.bf16.mxu1 %v6246_v58  ;;  %v3879_v58 = vld [vmem:[%s6201_s3 + $0x2c] ss:$16 sps:$4 sm:$0xff]  }
 0x335   :  { %v1706_v7 = vadd.f32 %v1641_v40, %v1258_v61  ;;  %v2786_v14 = vpop.f32.mrb[43].mxu0  ;;  %v3902_v40 = vld [vmem:[%s6201_s3 + $0x128] ss:$16 sps:$4 sm:$0xff]  }
 0x336   :  { %v3903_v14 = vld [vmem:[%s6201_s3 + $0x14c] ss:$16 sps:$4 sm:$0xff]  }
 0x337   :  { %v1770_v62 = vmax.f32 %v1706_v7, 0.0 }
 0x339   :  { %v1898_v20 = vpack.c.bf16 %v1770_v62, %v1769_v57 }
 0x33a   :  { %v5857_v45 = vpop.f32.mrb[44].mxu0 }
 0x33b   :  { %2923 = vmatpush1.bf16.msra.mxu0 %v1898_v20  ;;  %3606 = vmatpush1.bf16.msra.mxu1 %v1898_v20  ;;  %v2791_v42 = vpop.f32.mrb[45].mxu0 }
 0x33c   :  { %v5871_v21 = vpop.f32.mrb[46].mxu0  ;;  %v3906_v42 = vld [vmem:[%s6201_s3 + $0x16c] ss:$16 sps:$4 sm:$0xff]  }
 0x33d   :  { %v2794_v17 = vpop.f32.mrb[47].mxu0 }
 0x33e   :  { %2925 = vmatmul.mubr.bf16.vlgmr.msra.gmra.mrb[0].mxu0 %v3873_v46  ;;  %2949 = vmatmul.mubr.bf16.vlgmr.msra.gmra.mrb[0].mxu1 %v3876_v48  ;;  %v3905_v46 = vld [vmem:[%s6201_s3 + $0x148] ss:$16 sps:$4 sm:$0xff]  }
 0x33f   :  { %2932 = vmatprep.mubr.bf16.mxu0 %v3879_v58  ;;  %2956 = vmatprep.mubr.bf16.mxu1 %v3881_v54 }
 0x342   :  { %v5873_v6 = vpop.f32.mrb[48].mxu0 }
 0x343   :  { %v2799_v31 = vpop.f32.mrb[49].mxu0 }
 0x344   :  { %v5887_v59 = vpop.f32.mrb[50].mxu0  ;;  %v3909_v31 = vld [vmem:[%s6201_s3 + $0x18c] ss:$16 sps:$4 sm:$0xff]  }
 0x345   :  { %v2802_v28 = vpop.f32.mrb[51].mxu0 }
 0x346   :  { %2933 = vmatmul.mubr.bf16.gmra.mrb[4].mxu0 %v3883_v11  ;;  %2957 = vmatmul.mubr.bf16.gmra.mrb[4].mxu1 %v3884_v53  ;;  %v3908_v11 = vld [vmem:[%s6201_s3 + $0x168] ss:$16 sps:$4 sm:$0xff]  }
 0x347   :  { %2940 = vmatprep.mubr.bf16.mxu0 %v3885_v34  ;;  %2964 = vmatprep.mubr.bf16.mxu1 %v3887_v16 }
 0x34a   :  { %v5889_v15 = vpop.f32.mrb[52].mxu0 }
 0x34b   :  { %v2807_v60 = vpop.f32.mrb[53].mxu0 }
 0x34c   :  { %v5900_v13 = vpop.f32.mrb[54].mxu0  ;;  %v3912_v60 = vld [vmem:[%s6201_s3 + $0x1ac] ss:$16 sps:$4 sm:$0xff]  }
 0x34d   :  { %6374 = vst [vmem:[#allocation7_spill] sm:$0xff] %v5900_v13  ;;  %v2810_v33 = vpop.f32.mrb[55].mxu0 }
 0x34e   :  { %2941 = vmatmul.mubr.bf16.gmra.mrb[8].mxu0 %v3889_v3  ;;  %2965 = vmatmul.mubr.bf16.gmra.mrb[8].mxu1 %v3890_v55  ;;  %v3911_v3 = vld [vmem:[%s6201_s3 + $0x188] ss:$16 sps:$4 sm:$0xff]  }
 0x34f   :  { %2972 = vmatprep.mubr.bf16.mxu1 %v3891_v43 }
 0x352   :  { %v5902_v5 = vpop.f32.mrb[56].mxu0 }
 0x353   :  { %6375 = vst [vmem:[#allocation8_spill] sm:$0xff] %v5902_v5  ;;  %v2815_v51 = vpop.f32.mrb[57].mxu0 }
 0x354   :  { %v5910_v2 = vpop.f32.mrb[58].mxu0  ;;  %v3914_v51 = vld [vmem:[%s6201_s3 + $0x1a8] ss:$16 sps:$4 sm:$0xff]  }
 0x355   :  { %6376 = vst [vmem:[#allocation10_spill] sm:$0xff] %v5910_v2  ;;  %v2818_v38 = vpop.f32.mrb[59].mxu0 }
 0x356   :  { %2973 = vmatmul.mubr.bf16.gmra.mrb[12].mxu1 %v3893_v63  ;;  %v3915_v38 = vld [vmem:[%s6201_s3 + $0x1cc] ss:$16 sps:$4 sm:$0xff]  }
 0x357   :  { %2980 = vmatprep.mubr.bf16.mxu1 %v3894_v52 }
 0x35a   :  { %v5912_v30 = vpop.f32.mrb[60].mxu0 }
 0x35b   :  { %6377 = vst [vmem:[#allocation6_spill] sm:$0xff] %v5912_v30  ;;  %v2823_v56 = vpop.f32.mrb[61].mxu0 }
 0x35c   :  { %v5920_v41 = vpop.f32.mrb[62].mxu0 }
 0x35d   :  { %6378 = vst [vmem:[#allocation9_spill] sm:$0xff] %v5920_v41  ;;  %v2826_v39 = vpop.f32.mrb[63].mxu0 }
 0x35e   :  { %2981 = vmatmul.mubr.bf16.gmra.mrb[16].mxu1 %v3896_v8  ;;  %v3917_v39 = vld [vmem:[%s6201_s3 + $0x1c8] ss:$16 sps:$4 sm:$0xff]  }
 0x35f   :  { %2988 = vmatprep.mubr.bf16.mxu1 %v3897_v9 }
 0x362   :  { %v5922_v4 = vpop.f32.mrb[64].mxu0 }
 0x363   :  { %6379 = vst [vmem:[#allocation12_spill] sm:$0xff] %v5922_v4  ;;  %v2831_v10 = vpop.f32.mrb[65].mxu0 }
 0x364   :  { %v5930_v36 = vpop.f32.mrb[66].mxu0  ;;  %v3918_v10 = vld [vmem:[%s6201_s3 + $0x1ec] ss:$16 sps:$4 sm:$0xff]  }
 0x365   :  { %6380 = vst [vmem:[#allocation11_spill] sm:$0xff] %v5930_v36  ;;  %v2834_v61 = vpop.f32.mrb[67].mxu0 }
 0x366   :  { %2989 = vmatmul.mubr.bf16.gmra.mrb[20].mxu1 %v3899_v18 }
 0x367   :  { %2996 = vmatprep.mubr.bf16.mxu1 %v3900_v0 }
 0x36a   :  { %v5932_v37 = vpop.f32.mrb[68].mxu0 }
 0x36b   :  { %6381 = vst [vmem:[#allocation14_spill] sm:$0xff] %v5932_v37  ;;  %v2839_v7 = vpop.f32.mrb[69].mxu0 }
 0x36c   :  { %v5940_v57 = vpop.f32.mrb[70].mxu0  ;;  %v3920_v7 = vld [vmem:[%s6201_s3 + $0x1e8] ss:$16 sps:$4 sm:$0xff]  }
 0x36d   :  { %6382 = vst [vmem:[#allocation13_spill] sm:$0xff] %v5940_v57  ;;  %v2842_v62 = vpop.f32.mrb[71].mxu0 }
 0x36e   :  { %2997 = vmatmul.mubr.bf16.gmra.mrb[24].mxu1 %v3902_v40  ;;  %v3921_v62 = vld [vmem:[%s6201_s3 + $0x20c] ss:$16 sps:$4 sm:$0xff]  }
 0x36f   :  { %3004 = vmatprep.mubr.bf16.mxu1 %v3903_v14 }
 0x372   :  { %v5942_v20 = vpop.f32.mrb[72].mxu0 }
 0x373   :  { %6383 = vst [vmem:[#allocation15_spill] sm:$0xff] %v5942_v20  ;;  %v2847_v48 = vpop.f32.mrb[73].mxu0 }
 0x374   :  { %v5950_v58 = vpop.f32.mrb[74].mxu0 }
 0x375   :  { %6384 = vst [vmem:[#allocation16_spill] sm:$0xff] %v5950_v58  ;;  %v2850_v54 = vpop.f32.mrb[75].mxu0 }
 0x376   :  { %3005 = vmatmul.mubr.bf16.gmra.mrb[28].mxu1 %v3905_v46  ;;  %v3924_v54 = vld [vmem:[%s6201_s3 + $0x22c] ss:$16 sps:$4 sm:$0xff]  }
 0x377   :  { %3012 = vmatprep.mubr.bf16.mxu1 %v3906_v42  ;;  %v3923_v42 = vld [vmem:[%s6201_s3 + $0x208] ss:$16 sps:$4 sm:$0xff]  }
 0x37a   :  { %v5952_v17 = vpop.f32.mrb[76].mxu0 }
 0x37b   :  { %6385 = vst [vmem:[#allocation63_spill] sm:$0xff] %v5952_v17  ;;  %v2855_v53 = vpop.f32.mrb[77].mxu0 }
 0x37c   :  { %v5960_v34 = vpop.f32.mrb[78].mxu0  ;;  %v3927_v53 = vld [vmem:[%s6201_s3 + $0x24c] ss:$16 sps:$4 sm:$0xff]  }
 0x37d   :  { %6386 = vst [vmem:[#allocation18_spill] sm:$0xff] %v5960_v34  ;;  %v2858_v16 = vpop.f32.mrb[79].mxu0 }
 0x37e   :  { %3013 = vmatmul.mubr.bf16.gmra.mrb[32].mxu1 %v3908_v11  ;;  %v3926_v11 = vld [vmem:[%s6201_s3 + $0x228] ss:$16 sps:$4 sm:$0xff]   ;;  %v3930_v16 = vld [vmem:[%s6201_s3 + $0x26c] ss:$16 sps:$4 sm:$0xff]  }
 0x37f   :  { %3020 = vmatprep.mubr.bf16.mxu1 %v3909_v31  ;;  %v3929_v31 = vld [vmem:[%s6201_s3 + $0x248] ss:$16 sps:$4 sm:$0xff]  }
 0x382   :  { %v5962_v28 = vpop.f32.mrb[80].mxu0 }
 0x383   :  { %6387 = vst [vmem:[#allocation65_spill] sm:$0xff] %v5962_v28  ;;  %v2863_v55 = vpop.f32.mrb[81].mxu0 }
 0x384   :  { %v5970_v43 = vpop.f32.mrb[82].mxu0  ;;  %v3933_v55 = vld [vmem:[%s6201_s3 + $0x28c] ss:$16 sps:$4 sm:$0xff]  }
 0x385   :  { %6388 = vst [vmem:[#allocation75_spill] sm:$0xff] %v5970_v43  ;;  %v2866_v33 = vpop.f32.mrb[83].mxu0 }
 0x386   :  { %3021 = vmatmul.mubr.bf16.gmra.mrb[36].mxu1 %v3911_v3  ;;  %v3932_v3 = vld [vmem:[%s6201_s3 + $0x268] ss:$16 sps:$4 sm:$0xff]   ;;  %v3936_v33 = vld [vmem:[%s6201_s3 + $0x2ac] ss:$16 sps:$4 sm:$0xff]  }
 0x387   :  { %3028 = vmatprep.mubr.bf16.mxu1 %v3912_v60  ;;  %v3935_v60 = vld [vmem:[%s6201_s3 + $0x288] ss:$16 sps:$4 sm:$0xff]  }
 0x38a   :  { %v5972_v63 = vpop.f32.mrb[84].mxu0 }
 0x38b   :  { %6389 = vst [vmem:[#allocation17_spill] sm:$0xff] %v5972_v63  ;;  %v2871_v52 = vpop.f32.mrb[85].mxu0 }
 0x38c   :  { %v5980_v8 = vpop.f32.mrb[86].mxu0  ;;  %v3939_v52 = vld [vmem:[%s6201_s3 + $0x2cc] ss:$16 sps:$4 sm:$0xff]  }
 0x38d   :  { %6390 = vst [vmem:[#allocation76_spill] sm:$0xff] %v5980_v8  ;;  %v2874_v56 = vpop.f32.mrb[87].mxu0 }
 0x38e   :  { %3029 = vmatmul.mubr.bf16.gmra.mrb[40].mxu1 %v3914_v51  ;;  %v3938_v51 = vld [vmem:[%s6201_s3 + $0x2a8] ss:$16 sps:$4 sm:$0xff]   ;;  %v6040_v56 = vpop.permute.xlu1 %2034 }
 0x38f   :  { %3036 = vmatprep.mubr.bf16.mxu1 %v3915_v38  ;;  %v6038_v38 = vpop.permute.xlu0 %2029 }
 0x392   :  { %v5982_v9 = vpop.f32.mrb[88].mxu0 }
 0x393   :  { %6391 = vst [vmem:[#allocation64_spill] sm:$0xff] %v5982_v9  ;;  %v2879_v18 = vpop.f32.mrb[89].mxu0 }
 0x394   :  { %v5990_v0 = vpop.f32.mrb[90].mxu0  ;;  %v3942_v18 = vld [vmem:[%s6201_s3 + $0x2ec] ss:$16 sps:$4 sm:$0xff]  }
 0x395   :  { %6392 = vst [vmem:[#allocation19_spill] sm:$0xff] %v5990_v0  ;;  %v2882_v61 = vpop.f32.mrb[91].mxu0 }
 0x396   :  { %3037 = vmatmul.mubr.bf16.gmra.mrb[44].mxu1 %v3917_v39  ;;  %v3941_v39 = vld [vmem:[%s6201_s3 + $0x2c8] ss:$16 sps:$4 sm:$0xff]   ;;  %v1955_v61 = vpop.permute.xlu1 %1954 }
 0x397   :  { %3044 = vmatprep.mubr.bf16.mxu1 %v3918_v10  ;;  %v1950_v10 = vpop.permute.xlu0 %1949 }
 0x39a   :  { %v5992_v40 = vpop.f32.mrb[92].mxu0 }
 0x39b   :  { %6393 = vst [vmem:[#allocation20_spill] sm:$0xff] %v5992_v40  ;;  %v2887_v14 = vpop.f32.mrb[93].mxu0 }
 0x39c   :  { %v6000_v46 = vpop.f32.mrb[94].mxu0  ;;  %v6050_v14 = vpop.permute.xlu1 %2044 }
 0x39d   :  { %6394 = vst [vmem:[#allocation67_spill] sm:$0xff] %v6000_v46  ;;  %v2890_v48 = vpop.f32.mrb[95].mxu0 }
 0x39e   :  { %3045 = vmatmul.mubr.bf16.gmra.mrb[48].mxu1 %v3920_v7  ;;  %v6048_v7 = vpop.permute.xlu0 %2039 }
 0x39f   :  { %3052 = vmatprep.mubr.bf16.mxu1 %v3921_v62  ;;  %v3944_v62 = vld [vmem:[%s6201_s3 + $0x2e8] ss:$16 sps:$4 sm:$0xff]  }
 0x3a2   :  { %v1960_v48 = vpop.permute.xlu0 %1959 }
 0x3a6   :  { %3053 = vmatmul.mubr.bf16.gmra.mrb[52].mxu1 %v3923_v42  ;;  %v1965_v42 = vpop.permute.xlu1 %1964 }
 0x3a7   :  { %3060 = vmatprep.mubr.bf16.mxu1 %v3924_v54  ;;  %v6055_v54 = vpop.permute.xlu0 %2049 }
 0x3ae   :  { %3061 = vmatmul.mubr.bf16.gmra.mrb[56].mxu1 %v3926_v11  ;;  %v6057_v11 = vpop.permute.xlu1 %2054 }
 0x3af   :  { %3068 = vmatprep.mubr.bf16.mxu1 %v3927_v53  ;;  %v6059_v53 = vpop.permute.xlu0 %1969 }
 0x3b6   :  { %3069 = vmatmul.mubr.bf16.gmra.mrb[60].mxu1 %v3929_v31  ;;  %v6061_v31 = vpop.permute.xlu1 %1974 }
 0x3b7   :  { %3076 = vmatprep.mubr.bf16.mxu1 %v3930_v16  ;;  %v6063_v16 = vpop.permute.xlu0 %2059 }
 0x3be   :  { %3077 = vmatmul.mubr.bf16.gmra.mrb[64].mxu1 %v3932_v3  ;;  %v6065_v3 = vpop.permute.xlu1 %2064 }
 0x3bf   :  { %3084 = vmatprep.mubr.bf16.mxu1 %v3933_v55  ;;  %v1980_v55 = vpop.permute.xlu0 %1979 }
 0x3c0   :  { %v2726_v0 = vadd.f32 %v5760_v24, %v1980_v55 }
 0x3c6   :  { %3085 = vmatmul.mubr.bf16.gmra.mrb[68].mxu1 %v3935_v60  ;;  %v1985_v60 = vpop.permute.xlu1 %1984 }
 0x3c7   :  { %3092 = vmatprep.mubr.bf16.mxu1 %v3936_v33  ;;  %v6067_v33 = vpop.permute.xlu0 %2069  ;;  %v2729_v43 = vadd.f32 %v5768_v1, %v1985_v60 }
 0x3ce   :  { %3093 = vmatmul.mubr.bf16.gmra.mrb[72].mxu1 %v3938_v51  ;;  %v6069_v51 = vpop.permute.xlu1 %2074 }
 0x3cf   :  { %3100 = vmatprep.mubr.bf16.mxu1 %v3939_v52  ;;  %v3166_v52 = vld [vmem:[%s6203_s5 + $0x8] sm:$0xff] }
 0x3d6   :  { %3101 = vmatmul.mubr.bf16.gmra.mrb[76].mxu1 %v3941_v39  ;;  %v1990_v39 = vpop.permute.xlu0 %1989 }
 0x3d7   :  { %3108 = vmatprep.mubr.bf16.mxu1 %v3942_v18  ;;  %v1995_v18 = vpop.permute.xlu1 %1994  ;;  %v2734_v55 = vadd.f32 %v5779_v49, %v1990_v39 }
 0x3db   :  { %v6076_v46 = vpop.permute.xlu1 %2084 }
 0x3de   :  { %3109 = vmatmul.mubr.bf16.gmra.mrb[80].mxu1 %v3944_v62  ;;  %v6074_v62 = vpop.permute.xlu0 %2079 }
 0x3df   :  { %3232 = vmatprep.mubr.f32.mxu1 %v3166_v52  ;;  %v2005_v9 = vpop.permute.xlu1 %2004 }
 0x3e2   :  { %v2000_v40 = vpop.permute.xlu0 %1999 }
 0x3e3   :  { %v6083_v13 = vpop.permute.xlu1 %2094 }
 0x3e6   :  { %v6080_v24 = vpop.permute.xlu0 %2089 }
 0x3e7   :  { %v2015_v60 = vpop.permute.xlu1 %2014 }
 0x411   :  { %v2926_v8 = vpop.f32.mrb[0].mxu0  ;;  %v2950_v63 = vpop.f32.mrb[0].mxu1 }
 0x412   :  { %v3607_v28 = vadd.f32 %v2926_v8, %v1950_v10  ;;  %v2951_v34 = vadd.f32 %v2950_v63, %v2726_v0  ;;  %v2928_v17 = vpop.f32.mrb[1].mxu0  ;;  %v2952_v58 = vpop.f32.mrb[1].mxu1 }
 0x413   :  { %v2929_v20 = vpop.f32.mrb[2].mxu0  ;;  %v2953_v52 = vpop.f32.mrb[2].mxu1 }
 0x414   :  { %v3608_v57 = vadd.f32 %v2929_v20, %v1955_v61  ;;  %v2954_v37 = vadd.f32 %v2953_v52, %v2729_v43  ;;  %v2931_v36 = vpop.f32.mrb[3].mxu0  ;;  %v2955_v4 = vpop.f32.mrb[3].mxu1  ;;  %v3117_v41 = vmax.f32 %v3607_v28, 0.0  ;;  %v3123_v30 = vmax.f32 %v2951_v34, 0.0 }
 0x415   :  { %v2737_v20 = vadd.f32 %v5786_v26, %v1995_v18  ;;  %v2745_v52 = vadd.f32 %v5796_v23, %v2005_v9 }
 0x416   :  { %v3118_v2 = vmax.f32 %v3608_v57, 0.0  ;;  %v3124_v5 = vmax.f32 %v2954_v37, 0.0 }
 0x418   :  { %v6085_v1 = vpack.c.bf16 %v3118_v2, %v3117_v41  ;;  %v6087_v17 = vpack.c.bf16 %v3124_v5, %v3123_v30  ;;  %v2010_v5 = vpop.permute.xlu0 %2009  ;;  %v2742_v30 = vadd.f32 %v5791_v50, %v2000_v40 }
 0x419   :  { %v2934_v58 = vpop.f32.mrb[4].mxu0  ;;  %v2958_v63 = vpop.f32.mrb[4].mxu1  ;;  %v2750_v23 = vadd.f32 %v5810_v22, %v2010_v5 }
 0x41a   :  { %v3609_v36 = vadd.f32 %v2934_v58, %v1960_v48  ;;  %v2959_v4 = vadd.f32 %v2958_v63, %v2734_v55  ;;  %v2936_v28 = vpop.f32.mrb[5].mxu0  ;;  %v2960_v34 = vpop.f32.mrb[5].mxu1 }
 0x41b   :  { %v2937_v57 = vpop.f32.mrb[6].mxu0  ;;  %v2961_v37 = vpop.f32.mrb[6].mxu1 }
 0x41c   :  { %v3610_v43 = vadd.f32 %v2937_v57, %v1965_v42  ;;  %v2962_v8 = vadd.f32 %v2961_v37, %v2737_v20  ;;  %v2939_v0 = vpop.f32.mrb[7].mxu0  ;;  %v2963_v49 = vpop.f32.mrb[7].mxu1  ;;  %v3119_v10 = vmax.f32 %v3609_v36, 0.0  ;;  %v3125_v61 = vmax.f32 %v2959_v4, 0.0 }
 0x41d   :  { %v6105_v0 = vpop.permute.xlu1 %2104 }
 0x41e   :  { %v3120_v2 = vmax.f32 %v3610_v43, 0.0  ;;  %v3126_v41 = vmax.f32 %v2962_v8, 0.0  ;;  %v6098_v8 = vpop.permute.xlu0 %2099 }
 0x420   :  { %v6091_v39 = vpack.c.bf16 %v3120_v2, %v3119_v10  ;;  %v6093_v26 = vpack.c.bf16 %v3126_v41, %v3125_v61 }
 0x421   :  { %v2942_v48 = vpop.f32.mrb[8].mxu0  ;;  %v2966_v18 = vpop.f32.mrb[8].mxu1 }
 0x422   :  { %v3611_v42 = vadd.f32 %v2942_v48, %v6059_v53  ;;  %v2967_v55 = vadd.f32 %v2966_v18, %v2742_v30  ;;  %v2944_v58 = vpop.f32.mrb[9].mxu0  ;;  %v2968_v63 = vpop.f32.mrb[9].mxu1 }
 0x423   :  { %v2945_v20 = vpop.f32.mrb[10].mxu0  ;;  %v2969_v36 = vpop.f32.mrb[10].mxu1 }
 0x424   :  { %v3612_v4 = vadd.f32 %v2945_v20, %v6061_v31  ;;  %v2970_v28 = vadd.f32 %v2969_v36, %v2745_v52  ;;  %v2947_v50 = vpop.f32.mrb[11].mxu0  ;;  %v2971_v40 = vpop.f32.mrb[11].mxu1  ;;  %v3121_v34 = vmax.f32 %v3611_v42, 0.0  ;;  %v3127_v57 = vmax.f32 %v2967_v55, 0.0 }
 0x425   :  { %v2753_v31 = vadd.f32 %v5815_v19, %v2015_v60  ;;  %v2020_v52 = vpop.permute.xlu0 %2019  ;;  %v2025_v42 = vpop.permute.xlu1 %2024  ;;  %v2766_v50 = vadd.f32 %v5826_v35, %v6038_v38  ;;  %v2777_v35 = vadd.f32 %v5843_v25, %v6050_v14 }
 0x426   :  { %v3122_v37 = vmax.f32 %v3612_v4, 0.0  ;;  %v3128_v43 = vmax.f32 %v2970_v28, 0.0  ;;  %v2758_v22 = vadd.f32 %v5819_v27, %v2020_v52  ;;  %v2761_v58 = vadd.f32 %v5821_v12, %v2025_v42 }
 0x427   :  { %v2769_v27 = vadd.f32 %v5832_v29, %v6040_v56  ;;  %v2782_v52 = vadd.f32 %v5851_v47, %v6055_v54  ;;  %v2793_v54 = vadd.f32 %v5871_v21, %v6065_v3 }
 0x428   :  { %v6101_v9 = vpack.c.bf16 %v3122_v37, %v3121_v34  ;;  %v6103_v53 = vpack.c.bf16 %v3128_v43, %v3127_v57 }
 0x429   :  { %v2974_v49 = vpop.f32.mrb[12].mxu1 }
 0x42a   :  { %v2975_v10 = vadd.f32 %v2974_v49, %v2750_v23  ;;  %v2976_v61 = vpop.f32.mrb[13].mxu1 }
 0x42b   :  { %v2977_v2 = vpop.f32.mrb[14].mxu1 }
 0x42c   :  { %v2978_v41 = vadd.f32 %v2977_v2, %v2753_v31  ;;  %v2979_v30 = vpop.f32.mrb[15].mxu1  ;;  %v3129_v48 = vmax.f32 %v2975_v10, 0.0  ;;  %v2774_v10 = vadd.f32 %v5839_v44, %v6048_v7  ;;  %v2785_v7 = vadd.f32 %v5853_v32, %v6057_v11 }
 0x42e   :  { %v3130_v18 = vmax.f32 %v2978_v41, 0.0 }
 0x430   :  { %v6109_v5 = vpack.c.bf16 %v3130_v18, %v3129_v48 }
 0x431   :  { %v2982_v55 = vpop.f32.mrb[16].mxu1 }
 0x432   :  { %v2983_v63 = vadd.f32 %v2982_v55, %v2758_v22  ;;  %v2984_v20 = vpop.f32.mrb[17].mxu1 }
 0x433   :  { %v2985_v36 = vpop.f32.mrb[18].mxu1  ;;  %v2790_v20 = vadd.f32 %v5857_v45, %v6063_v16  ;;  %v2801_v16 = vadd.f32 %v5887_v59, %v6069_v51 }
 0x434   :  { %v2986_v19 = vadd.f32 %v2985_v36, %v2761_v58  ;;  %v2987_v60 = vpop.f32.mrb[19].mxu1  ;;  %v3131_v4 = vmax.f32 %v2983_v63, 0.0 }
 0x436   :  { %v3132_v28 = vmax.f32 %v2986_v19, 0.0 }
 0x438   :  { %v6114_v40 = vpack.c.bf16 %v3132_v28, %v3131_v4 }
 0x439   :  { %v2990_v34 = vpop.f32.mrb[20].mxu1 }
 0x43a   :  { %v2991_v57 = vadd.f32 %v2990_v34, %v2766_v50  ;;  %v2992_v37 = vpop.f32.mrb[21].mxu1  ;;  %v2798_v50 = vadd.f32 %v5873_v6, %v6067_v33  ;;  %v6395_v33 = vld [vmem:[#allocation7_spill] sm:$0xff] }
 0x43b   :  { %v2993_v43 = vpop.f32.mrb[22].mxu1 }
 0x43c   :  { %v2994_v12 = vadd.f32 %v2993_v43, %v2769_v27  ;;  %v2995_v23 = vpop.f32.mrb[23].mxu1  ;;  %v3133_v49 = vmax.f32 %v2991_v57, 0.0 }
 0x43e   :  { %v3134_v31 = vmax.f32 %v2994_v12, 0.0  ;;  %v2806_v12 = vadd.f32 %v5889_v15, %v6074_v62  ;;  %v6397_v62 = vld [vmem:[#allocation10_spill] sm:$0xff] }
 0x440   :  { %v3519_v61 = vpack.c.bf16 %v3134_v31, %v3133_v49  ;;  %v2809_v49 = vadd.f32 %v6395_v33, %v6076_v46 }
 0x441   :  { %v2998_v2 = vpop.f32.mrb[24].mxu1 }
 0x442   :  { %v2999_v38 = vadd.f32 %v2998_v2, %v2774_v10  ;;  %v3000_v41 = vpop.f32.mrb[25].mxu1  ;;  %3520 = vmatprep.subr.bf16.mxu1 %v3519_v61 }
 0x443   :  { %v3001_v30 = vpop.f32.mrb[26].mxu1  ;;  %3522 = vmatpush3.bf16.msra.mxu1 %v6085_v1 }
 0x444   :  { %v3002_v29 = vadd.f32 %v3001_v30, %v2777_v35  ;;  %v3003_v56 = vpop.f32.mrb[27].mxu1  ;;  %v3135_v48 = vmax.f32 %v2999_v38, 0.0  ;;  %v6396_v35 = vld [vmem:[#allocation8_spill] sm:$0xff]  ;;  %v2817_v30 = vadd.f32 %v6397_v62, %v6083_v13 }
 0x445   :  { %v2814_v38 = vadd.f32 %v6396_v35, %v6080_v24 }
 0x446   :  { %v3136_v18 = vmax.f32 %v3002_v29, 0.0 }
 0x448   :  { %v3523_v42 = vpack.c.bf16 %v3136_v18, %v3135_v48 }
 0x449   :  { %v3006_v44 = vpop.f32.mrb[28].mxu1 }
 0x44a   :  { %v3007_v22 = vadd.f32 %v3006_v44, %v2782_v52  ;;  %v3008_v25 = vpop.f32.mrb[29].mxu1  ;;  %3524 = vmatprep.subr.bf16.mxu1 %v3523_v42  ;;  %v6398_v42 = vld [vmem:[#allocation6_spill] sm:$0xff] }
 0x44b   :  { %v3009_v14 = vpop.f32.mrb[30].mxu1  ;;  %3526 = vmatpush3.bf16.msra.mxu1 %v6091_v39  ;;  %v2822_v44 = vadd.f32 %v6398_v42, %v6098_v8 }
 0x44c   :  { %v3010_v55 = vadd.f32 %v3009_v14, %v2785_v7  ;;  %v3011_v1 = vpop.f32.mrb[31].mxu1  ;;  %v3137_v58 = vmax.f32 %v3007_v22, 0.0  ;;  %v6399_v22 = vld [vmem:[#allocation9_spill] sm:$0xff] }
 0x44d   :  { %v2825_v25 = vadd.f32 %v6399_v22, %v6105_v0 }
 0x44e   :  { %v3138_v63 = vmax.f32 %v3010_v55, 0.0 }
 0x450   :  { %v3527_v36 = vpack.c.bf16 %v3138_v63, %v3137_v58 }
 0x451   :  { %v3014_v47 = vpop.f32.mrb[32].mxu1 }
 0x452   :  { %v3015_v19 = vadd.f32 %v3014_v47, %v2790_v20  ;;  %v3016_v32 = vpop.f32.mrb[33].mxu1  ;;  %3528 = vmatprep.subr.bf16.mxu1 %v3527_v36  ;;  %v2110_v20 = vpop.permute.xlu0 %2109  ;;  %v6400_v47 = vld [vmem:[#allocation12_spill] sm:$0xff] }
 0x453   :  { %v3017_v11 = vpop.f32.mrb[34].mxu1  ;;  %3530 = vmatpush3.bf16.msra.mxu1 %v6101_v9  ;;  %v2115_v36 = vpop.permute.xlu1 %2114  ;;  %v6401_v32 = vld [vmem:[#allocation11_spill] sm:$0xff] }
 0x454   :  { %v3018_v60 = vadd.f32 %v3017_v11, %v2793_v54  ;;  %v3019_v39 = vpop.f32.mrb[35].mxu1  ;;  %v3139_v4 = vmax.f32 %v3015_v19, 0.0  ;;  %v2830_v54 = vadd.f32 %v6400_v47, %v2110_v20  ;;  %v2833_v11 = vadd.f32 %v6401_v32, %v2115_v36  ;;  %v6408_v36 = vld [vmem:[#allocation65_spill] sm:$0xff] }
 0x456   :  { %v3140_v28 = vmax.f32 %v3018_v60, 0.0 }
 0x458   :  { %v3531_v34 = vpack.c.bf16 %v3140_v28, %v3139_v4 }
 0x459   :  { %v3022_v45 = vpop.f32.mrb[36].mxu1 }
 0x45a   :  { %v3023_v27 = vadd.f32 %v3022_v45, %v2798_v50  ;;  %v3024_v21 = vpop.f32.mrb[37].mxu1  ;;  %3532 = vmatprep.subr.bf16.mxu1 %v3531_v34  ;;  %v4003_v50 = vmov 0.0|0.0  }
 0x45b   :  { %v3025_v3 = vpop.f32.mrb[38].mxu1  ;;  %3534 = vmatpush3.bf16.msra.mxu1 %v6087_v17  ;;  %v4005_v21 = vmov 0.0  }
 0x45c   :  { %v3026_v57 = vadd.f32 %v3025_v3, %v2801_v16  ;;  %v3027_v9 = vpop.f32.mrb[39].mxu1  ;;  %v3141_v37 = vmax.f32 %v3023_v27, 0.0  ;;  %v2120_v16 = vpop.permute.xlu0 %2119  ;;  %v6402_v3 = vld [vmem:[#allocation14_spill] sm:$0xff] }
 0x45d   :  { %v2125_v27 = vpop.permute.xlu1 %2124 }
 0x45e   :  { %v3142_v43 = vmax.f32 %v3026_v57, 0.0  ;;  %v2838_v57 = vadd.f32 %v6402_v3, %v2120_v16  ;;  %v6410_v16 = vld [vmem:[#allocation17_spill] sm:$0xff] }
 0x460   :  { %v3535_v23 = vpack.c.bf16 %v3142_v43, %v3141_v37  ;;  %v6403_v37 = vld [vmem:[#allocation13_spill] sm:$0xff] }
 0x461   :  { %v3030_v6 = vpop.f32.mrb[40].mxu1  ;;  %v2841_v43 = vadd.f32 %v6403_v37, %v2125_v27 }
 0x462   :  { %v3031_v31 = vadd.f32 %v3030_v6, %v2806_v12  ;;  %v3032_v59 = vpop.f32.mrb[41].mxu1  ;;  %3536 = vmatprep.subr.bf16.mxu1 %v3535_v23 }
 0x463   :  { %v3033_v51 = vpop.f32.mrb[42].mxu1  ;;  %3538 = vmatpush3.bf16.msra.mxu1 %v6093_v26 }
 0x464   :  { %v3034_v10 = vadd.f32 %v3033_v51, %v2809_v49  ;;  %v3035_v17 = vpop.f32.mrb[43].mxu1  ;;  %v3143_v61 = vmax.f32 %v3031_v31, 0.0  ;;  %v2130_v51 = vpop.permute.xlu0 %2129 }
 0x465   :  { %v6404_v17 = vld [vmem:[#allocation15_spill] sm:$0xff] }
 0x466   :  { %v3144_v2 = vmax.f32 %v3034_v10, 0.0  ;;  %v2135_v10 = vpop.permute.xlu1 %2134 }
 0x468   :  { %v3539_v41 = vpack.c.bf16 %v3144_v2, %v3143_v61  ;;  %v2846_v61 = vadd.f32 %v6404_v17, %v2130_v51 }
 0x469   :  { %v3038_v15 = vpop.f32.mrb[44].mxu1 }
 0x46a   :  { %v3039_v29 = vadd.f32 %v3038_v15, %v2814_v38  ;;  %v3040_v46 = vpop.f32.mrb[45].mxu1  ;;  %3540 = vmatprep.subr.bf16.mxu1 %v3539_v41  ;;  %v6405_v38 = vld [vmem:[#allocation16_spill] sm:$0xff] }
 0x46b   :  { %v3041_v56 = vpop.f32.mrb[46].mxu1  ;;  %3542 = vmatpush3.bf16.msra.mxu1 %v6103_v53  ;;  %v2849_v41 = vadd.f32 %v6405_v38, %v2135_v10 }
 0x46c   :  { %v3042_v48 = vadd.f32 %v3041_v56, %v2817_v30  ;;  %v3043_v26 = vpop.f32.mrb[47].mxu1  ;;  %v3145_v18 = vmax.f32 %v3039_v29, 0.0 }
 0x46d   :  { %v2140_v26 = vpop.permute.xlu0 %2139 }
 0x46e   :  { %v3146_v52 = vmax.f32 %v3042_v48, 0.0 }
 0x470   :  { %v3543_v7 = vpack.c.bf16 %v3146_v52, %v3145_v18  ;;  %v2145_v18 = vpop.permute.xlu1 %2144  ;;  %v6406_v52 = vld [vmem:[#allocation63_spill] sm:$0xff] }
 0x471   :  { %v3046_v24 = vpop.f32.mrb[48].mxu1  ;;  %v2854_v42 = vadd.f32 %v6406_v52, %v2140_v26 }
 0x472   :  { %v3047_v14 = vadd.f32 %v3046_v24, %v2822_v44  ;;  %v3048_v13 = vpop.f32.mrb[49].mxu1  ;;  %3544 = vmatprep.subr.bf16.mxu1 %v3543_v7  ;;  %v6407_v24 = vld [vmem:[#allocation18_spill] sm:$0xff] }
 0x473   :  { %v3049_v55 = vpop.f32.mrb[50].mxu1  ;;  %3546 = vmatpush3.bf16.msra.mxu1 %v6109_v5  ;;  %v3165_v5 = vld [vmem:[%s6203_s5] sm:$0xff]  ;;  %v2857_v22 = vadd.f32 %v6407_v24, %v2145_v18 }
 0x474   :  { %v3050_v1 = vadd.f32 %v3049_v55, %v2825_v25  ;;  %v3051_v53 = vpop.f32.mrb[51].mxu1  ;;  %v3147_v58 = vmax.f32 %v3047_v14, 0.0  ;;  %v2155_v20 = vpop.permute.xlu1 %2154 }
 0x476   :  { %v3148_v63 = vmax.f32 %v3050_v1, 0.0 }
 0x478   :  { %v3547_v8 = vpack.c.bf16 %v3148_v63, %v3147_v58  ;;  %v2150_v63 = vpop.permute.xlu0 %2149 }
 0x479   :  { %v3054_v19 = vpop.f32.mrb[52].mxu1  ;;  %v2862_v47 = vadd.f32 %v6408_v36, %v2150_v63 }
 0x47a   :  { %v3055_v60 = vadd.f32 %v3054_v19, %v2830_v54  ;;  %v3056_v0 = vpop.f32.mrb[53].mxu1  ;;  %3548 = vmatprep.subr.bf16.mxu1 %v3547_v8  ;;  %v6409_v19 = vld [vmem:[#allocation75_spill] sm:$0xff] }
 0x47b   :  { %v3057_v39 = vpop.f32.mrb[54].mxu1  ;;  %3550 = vmatpush3.bf16.msra.mxu1 %v6114_v40  ;;  %v2865_v32 = vadd.f32 %v6409_v19, %v2155_v20 }
 0x47c   :  { %v3058_v4 = vadd.f32 %v3057_v39, %v2833_v11  ;;  %v3059_v28 = vpop.f32.mrb[55].mxu1  ;;  %3551 = vmatprep.subr.bf16.mxu1 %v4003_v50  ;;  %v3149_v34 = vmax.f32 %v3055_v60, 0.0 }
 0x47e   :  { %v3150_v45 = vmax.f32 %v3058_v4, 0.0  ;;  %3233 = vmatmul.mubr.f32.vlgmr.msra.gmra.mrb[84].mxu1 %v3165_v5 }
 0x47f   :  { %3516 = vmatprep.mubr.msk.f32.mxu1 %vm4004_vm0, %v4005_v21 }
 0x480   :  { %v3552_v40 = vpack.c.bf16 %v3150_v45, %v3149_v34  ;;  %v2160_v34 = vpop.permute.xlu0 %2159  ;;  %v2165_v45 = vpop.permute.xlu1 %2164 }
 0x481   :  { %v3062_v9 = vpop.f32.mrb[56].mxu1  ;;  %v2870_v27 = vadd.f32 %v6410_v16, %v2160_v34 }
 0x482   :  { %v3063_v12 = vadd.f32 %v3062_v9, %v2838_v57  ;;  %v3064_v23 = vpop.f32.mrb[57].mxu1  ;;  %3553 = vmatpush3.bf16.msra.mxu1 %v3552_v40  ;;  %v6411_v57 = vld [vmem:[#allocation76_spill] sm:$0xff] }
 0x483   :  { %v3065_v6 = vpop.f32.mrb[58].mxu1  ;;  %3554 = vmatprep.subr.bf16.mxu1 %v4003_v50  ;;  %v2873_v40 = vadd.f32 %v6411_v57, %v2165_v45 }
 0x484   :  { %v3066_v33 = vadd.f32 %v3065_v6, %v2841_v43  ;;  %v3067_v49 = vpop.f32.mrb[59].mxu1  ;;  %v3151_v31 = vmax.f32 %v3063_v12, 0.0  ;;  %v2175_v10 = vpop.permute.xlu1 %2174 }
 0x485   :  { %v2170_v49 = vpop.permute.xlu0 %2169 }
 0x486   :  { %v3152_v59 = vmax.f32 %v3066_v33, 0.0 }
 0x488   :  { %v3555_v2 = vpack.c.bf16 %v3152_v59, %v3151_v31  ;;  %v6412_v31 = vld [vmem:[#allocation64_spill] sm:$0xff]  ;;  %v2185_v18 = vpop.permute.xlu1 %2184 }
 0x489   :  { %v3070_v35 = vpop.f32.mrb[60].mxu1  ;;  %v2878_v59 = vadd.f32 %v6412_v31, %v2170_v49 }
 0x48a   :  { %v3071_v15 = vadd.f32 %v3070_v35, %v2846_v61  ;;  %v3072_v62 = vpop.f32.mrb[61].mxu1  ;;  %3556 = vmatpush3.bf16.msra.mxu1 %v3555_v2  ;;  %v6413_v61 = vld [vmem:[#allocation19_spill] sm:$0xff] }
 0x48b   :  { %v3073_v30 = vpop.f32.mrb[62].mxu1  ;;  %3557 = vmatprep.subr.bf16.mxu1 %v4003_v50  ;;  %v2881_v2 = vadd.f32 %v6413_v61, %v2175_v10 }
 0x48c   :  { %v3074_v29 = vadd.f32 %v3073_v30, %v2849_v41  ;;  %v3075_v46 = vpop.f32.mrb[63].mxu1  ;;  %v3153_v56 = vmax.f32 %v3071_v15, 0.0 }
 0x48d   :  { %v2180_v46 = vpop.permute.xlu0 %2179 }
 0x48e   :  { %v3154_v48 = vmax.f32 %v3074_v29, 0.0 }
 0x490   :  { %v3558_v44 = vpack.c.bf16 %v3154_v48, %v3153_v56  ;;  %v6414_v56 = vld [vmem:[#allocation20_spill] sm:$0xff] }
 0x491   :  { %v3078_v7 = vpop.f32.mrb[64].mxu1  ;;  %v2886_v48 = vadd.f32 %v6414_v56, %v2180_v46  ;;  %v3312_v36 = vpop.permute.xlu0 %3311 }
 0x492   :  { %v3079_v25 = vadd.f32 %v3078_v7, %v2854_v42  ;;  %v3080_v14 = vpop.f32.mrb[65].mxu1  ;;  %3559 = vmatpush3.bf16.msra.mxu1 %v3558_v44  ;;  %v6415_v42 = vld [vmem:[#allocation67_spill] sm:$0xff] }
 0x493   :  { %v3081_v13 = vpop.f32.mrb[66].mxu1  ;;  %3560 = vmatprep.subr.bf16.mxu1 %v4003_v50  ;;  %v2889_v44 = vadd.f32 %v6415_v42, %v2185_v18 }
 0x494   :  { %v3082_v55 = vadd.f32 %v3081_v13, %v2857_v22  ;;  %v3083_v1 = vpop.f32.mrb[67].mxu1  ;;  %v3155_v53 = vmax.f32 %v3079_v25, 0.0 }
 0x496   :  { %v3156_v58 = vmax.f32 %v3082_v55, 0.0 }
 0x498   :  { %v3561_v54 = vpack.c.bf16 %v3156_v58, %v3155_v53  ;;  %v3167_v53 = vld [vmem:[%s6203_s5 + $0x10] sm:$0xff]  ;;  %s3976_s5 = scalar_lea.vmem %s3329_s27, 16 }
 0x499   :  { %v3086_v8 = vpop.f32.mrb[68].mxu1  ;;  %p3977_p0 = scmp.ne.s32.totalorder %s3329_s27, %s3976_s5  ;;  %p3982_p2 = scmp.lt.s32.totalorder %s3980_s28, %s3976_s5 }
 0x49a   :  { %v3087_v11 = vadd.f32 %v3086_v8, %v2862_v47  ;;  %v3088_v60 = vpop.f32.mrb[69].mxu1  ;;  %3562 = vmatpush3.bf16.msra.mxu1 %v3561_v54  ;;  %v6416_v54 = vld [vmem:[#allocation79_spill] sm:$0xff] }
 0x49b   :  { %v3089_v0 = vpop.f32.mrb[70].mxu1  ;;  %3563 = vmatprep.subr.bf16.mxu1 %v4003_v50  ;;  %v6417_v8 = vsub.s32 0, %v6416_v54  ;;  %p3983_p3 = por %p3982_p2, %p3981_p1 }
 0x49c   :  { %v3090_v39 = vadd.f32 %v3089_v0, %v2865_v32  ;;  %v3091_v5 = vpop.f32.mrb[71].mxu1  ;;  %v3157_v4 = vmax.f32 %v3087_v11, 0.0 }
 0x49d   :  { %v3317_v19 = vrot.slane %v3312_v36, %v6417_v8  ;;  %p3984_p4 = pnand %p3983_p3, %p3977_p0 }
 0x49e   :  { %v3158_v28 = vmax.f32 %v3090_v39, 0.0 }
 0x4a0   :  { %v3564_v21 = vpack.c.bf16 %v3158_v28, %v3157_v4 }
 0x4a1   :  { %v3094_v3 = vpop.f32.mrb[72].mxu1 }
 0x4a2   :  { %v3095_v9 = vadd.f32 %v3094_v3, %v2870_v27  ;;  %v3096_v37 = vpop.f32.mrb[73].mxu1  ;;  %3565 = vmatpush3.bf16.msra.mxu1 %v3564_v21 }
 0x4a3   :  { %v3097_v43 = vpop.f32.mrb[74].mxu1  ;;  %3566 = vmatprep.subr.bf16.mxu1 %v4003_v50 }
 0x4a4   :  { %v3098_v12 = vadd.f32 %v3097_v43, %v2873_v40  ;;  %v3099_v23 = vpop.f32.mrb[75].mxu1  ;;  %v3159_v6 = vmax.f32 %v3095_v9, 0.0 }
 0x4a6   :  { %v3160_v33 = vmax.f32 %v3098_v12, 0.0 }
 0x4a8   :  { %v3567_v51 = vpack.c.bf16 %v3160_v33, %v3159_v6 }
 0x4a9   :  { %v3102_v17 = vpop.f32.mrb[76].mxu1 }
 0x4aa   :  { %v3103_v35 = vadd.f32 %v3102_v17, %v2878_v59  ;;  %v3104_v38 = vpop.f32.mrb[77].mxu1  ;;  %3568 = vmatpush3.bf16.msra.mxu1 %v3567_v51 }
 0x4ab   :  { %v3105_v41 = vpop.f32.mrb[78].mxu1  ;;  %3569 = vmatprep.subr.bf16.mxu1 %v4003_v50 }
 0x4ac   :  { %v3106_v15 = vadd.f32 %v3105_v41, %v2881_v2  ;;  %v3107_v62 = vpop.f32.mrb[79].mxu1  ;;  %v3161_v30 = vmax.f32 %v3103_v35, 0.0 }
 0x4ae   :  { %v3162_v29 = vmax.f32 %v3106_v15, 0.0 }
 0x4b0   :  { %v3570_v26 = vpack.c.bf16 %v3162_v29, %v3161_v30 }
 0x4b1   :  { %v3110_v52 = vpop.f32.mrb[80].mxu1 }
 0x4b2   :  { %v3111_v7 = vadd.f32 %v3110_v52, %v2886_v48  ;;  %v3112_v24 = vpop.f32.mrb[81].mxu1  ;;  %3571 = vmatpush3.bf16.msra.mxu1 %v3570_v26 }
 0x4b3   :  { %v3113_v22 = vpop.f32.mrb[82].mxu1  ;;  %3572 = vmatprep.subr.bf16.mxu1 %v4003_v50 }
 0x4b4   :  { %v3114_v25 = vadd.f32 %v3113_v22, %v2889_v44  ;;  %v3115_v14 = vpop.f32.mrb[83].mxu1  ;;  %v3163_v13 = vmax.f32 %v3111_v7, 0.0 }
 0x4b6   :  { %v3164_v55 = vmax.f32 %v3114_v25, 0.0 }
 0x4b8   :  { %v3573_v1 = vpack.c.bf16 %v3164_v55, %v3163_v13 }
 0x4ba   :  { %3574 = vmatpush3.bf16.msra.mxu1 %v3573_v1 }
 0x4bd   :  { %3517 = vmatmul.mubr.f32.vlgmr.msra.gmra.mrb[86].mxu1 %v3167_v53 }
 0x551   :  { %v3464_v58 = vpop.f32.mrb[84].mxu1 }
 0x552   :  { %v3465_v63 = vpop.f32.mrb[85].mxu1 }
 0x553   :  { %v3466_v20 = vadd.f32 %v3465_v63, %v3464_v58 }
 0x590   :  { %v3304_v47 = vpop.f32.mrb[86].mxu1 }
 0x591   :  { %v3305_v50 = vadd.f32 %v3466_v20, %v3304_v47  ;;  %v3518_v32 = vpop.f32.mrb[87].mxu1 }
 0x593   :  { %v3318_v11 = vadd.f32 %v3317_v19, %v3305_v50 }
 0x595   :  { %3945 = vtanh.f32 %v3318_v11 }
 0x59f   :  { %v3946_v60 = vpop.eup %3945 }
 0x5a0   :  { %3321 = vst.msk [vmem:[#allocation3] sm:$0x1] %vm3320_vm1, %v3946_v60 }
 0x5a1   :  { %3987 = shalt.err (!%p3984_p4)
}
 0x5a2   :  { %s3988_s30 = scalar_lea.hbm %s6205_s7, 16 }
 0x5a3   :  { %p3989_p5 = scmp.ne.s32.totalorder %s6205_s7, %s3988_s30  ;;  %p3992_p6 = scmp.lt.u32.totalorder %s3988_s30, %s6205_s7 }
 0x5a5   :  { %p3994_p7 = pnand %p3992_p6, %p3989_p5 }
 0x5a7   :  { %3997 = shalt.err (!%p3994_p7)
}
 0x5a8   :  { %3331 = dma.vmem_to_hbm [thread:$0]  %s3329_s27, 16, %s6205_s7, [#allocation4]  }
 0x5a9   :  { %3998 = dma.done.wait [#allocation4], 16  }
 0x5aa   :  { %3999 = vsyncadd [#allocation4], 4294967280 }
 0x5ab   :  { %3335 = vsyncpa [#allocation4], 1 }

</bundles_post_ra>
